<compile_context>
chip_gen: v5e
topology: v5e:2x2
jax: 0.10.0
libtpu: 0.0.40
codegen_flags: <defaults>
</compile_context>

<pallas_src>
import numpy as np
import jax
import jax.numpy as jnp
from jax.experimental import pallas as pl
from jax.experimental.pallas import tpu as pltpu

# ----------------------------- small config ---------------------------------
SR = 8000
N_FFT = 128
WIN_LEN = 96
HOP = 64                        # == N_FFT // 2 -> non-overlapping chunk trick works
N_MELS = 32                     # PaSST uses 128; scaled down
PATCH = 16                      # fstride = tstride = 16 -> non-overlapping patches
EMBED_DIM = 64                  # PaSST-S uses 768
NUM_HEADS = 4
HEAD_DIM = EMBED_DIM // NUM_HEADS
DEPTH = 2                       # PaSST-S uses 12
MLP_RATIO = 4
HIDDEN = EMBED_DIM * MLP_RATIO
LN_EPS = 1e-6
B = 2
N_FRAMES = 32
AUDIO_LEN = (N_FRAMES - 1) * HOP + 1   # pre-emphasis drops 1 sample -> 32 STFT frames
N_BINS = N_FFT // 2 + 1                # 65 valid bins
N_BINS_PAD = 128                       # lane-dense padding of the bin axis
F_PATCHES = N_MELS // PATCH
T_PATCHES = N_FRAMES // PATCH
N_PATCH_TOK = F_PATCHES * T_PATCHES
N_TOKENS = N_PATCH_TOK + 2             # + cls + dist
NT = B * N_TOKENS                      # batch folded into rows
N_CHUNKS = N_FRAMES + 1                # padded signal = 33 non-overlapping 64-sample chunks


def _const_spec(shape):
    """Full-array block, same for the single grid step (weights / constants / inputs)."""
    nd = len(shape)
    return pl.BlockSpec(shape, lambda i, _nd=nd: (0,) * _nd)


# ------------------------------ fused kernel --------------------------------------
def _layernorm(x, g, b):
    mu = jnp.mean(x, axis=-1, keepdims=True)
    var = jnp.mean(jnp.square(x - mu), axis=-1, keepdims=True)
    return (x - mu) * jax.lax.rsqrt(var + LN_EPS) * g + b


def _fused_kernel(chunks_ref, dft_ref, melwt_ref, pw_ref, tb_ref, am_ref,
                  ln1g_ref, ln1b_ref, wqkv_ref, bqkv_ref, wproj_ref, bproj_ref,
                  ln2g_ref, ln2b_ref, w1_ref, b1_ref, w2_ref, b2_ref,
                  fg_ref, fb_ref, o_ref):
    f32 = jnp.float32
    bf16 = jnp.bfloat16
    scale = float(HEAD_DIM) ** -0.5

    # ---------------- mel frontend (f32, batch folded into rows) ----------------
    # chunks: (B*(N_FRAMES+1), HOP).  Frame t = [chunk[t] | chunk[t+1]] since HOP = n_fft/2,
    # so the framed DFT is two matmuls against the top/bottom halves of the fused DFT matrix.
    ch = chunks_ref[...]
    lo = jnp.concatenate(
        [ch[b * N_CHUNKS:b * N_CHUNKS + N_FRAMES] for b in range(B)], axis=0)       # (BT, HOP)
    hi = jnp.concatenate(
        [ch[b * N_CHUNKS + 1:b * N_CHUNKS + 1 + N_FRAMES] for b in range(B)], axis=0)
    ri = (jnp.dot(lo, dft_ref[0:HOP, :], preferred_element_type=f32)
          + jnp.dot(hi, dft_ref[HOP:N_FFT, :], preferred_element_type=f32))         # (BT, 256)
    re = ri[:, :N_BINS_PAD]
    im = ri[:, N_BINS_PAD:]
    power = re * re + im * im                                                        # (BT, 128)
    mel = jnp.dot(power, melwt_ref[...], preferred_element_type=f32)                 # (BT, n_mels)
    mel = (jnp.log(mel + 1e-5) + 4.5) / 5.0

    # ---------------- im2col: (B*T, n_mels) -> (B*N_TOKENS, 256) patch rows ------
    # Rows per batch: [cls(zeros), dist(zeros), (fp,tp)=(0,0),(0,1),(1,0),(1,1)].
    # Within-patch lane order is p = kt*PATCH + kf; the patch-embed weight was row-permuted
    # on the host to match the conv's (kf, kt) flatten order.  Only static slices and lane
    # concats are used (layout-safe, no generic in-kernel transpose).
    zero_row = jnp.zeros((1, PATCH * PATCH), f32)
    rows = []
    for b in range(B):
        rows.append(zero_row)                      # cls  (embedding lives in tok_bias)
        rows.append(zero_row)                      # dist
        for fp in range(F_PATCHES):
            for tp in range(T_PATCHES):
                r0 = b * N_FRAMES + tp * PATCH
                c0 = fp * PATCH
                pieces = [mel[r0 + kt:r0 + kt + 1, c0:c0 + PATCH] for kt in range(PATCH)]
                rows.append(jnp.concatenate(pieces, axis=1))                         # (1, 256)
    patches = jnp.concatenate(rows, axis=0)                                          # (NT, 256)

    # ---------------- patch embed + token / positional bias ----------------------
    x = (jnp.dot(patches.astype(bf16), pw_ref[...], preferred_element_type=f32)
         + tb_ref[...])                                                              # (NT, D) f32

    amask = am_ref[...]                            # (NT, NT): 0 within batch, -1e30 across

    # TODO(synk): at real PaSST-S scale (D=768, DEPTH=12, N~250) resident bf16 weights exceed
    # v7x's 64 MiB VMEM; replace this fully-unrolled all-resident loop with a depth grid axis
    # (or pltpu.emit_pipeline) streaming double-buffered per-layer weights.
    for l in range(DEPTH):
        # ---------------- MHSA (pre-norm), batch folded, cross-batch masked -------
        h = _layernorm(x, ln1g_ref[l], ln1b_ref[l])
        qkv = (jnp.dot(h.astype(bf16), wqkv_ref[l], preferred_element_type=f32)
               + bqkv_ref[l])                                                        # (NT, 3D)
        q = qkv[:, :EMBED_DIM] * scale
        k = qkv[:, EMBED_DIM:2 * EMBED_DIM]
        v = qkv[:, 2 * EMBED_DIM:]
        heads = []
        for hd in range(NUM_HEADS):
            sl = slice(hd * HEAD_DIM, (hd + 1) * HEAD_DIM)
            s = jnp.einsum('nd,md->nm', q[:, sl].astype(bf16), k[:, sl].astype(bf16),
                           preferred_element_type=f32) + amask                       # (NT, NT)
            m = jnp.max(s, axis=-1, keepdims=True)
            e = jnp.exp(s - m)
            p = e * pl.reciprocal(jnp.sum(e, axis=-1, keepdims=True), approx=True)
            heads.append(jnp.dot(p.astype(bf16), v[:, sl].astype(bf16),
                                 preferred_element_type=f32))                        # (NT, dh)
        # single K=64 projection matmul per layer on the lane-concatenated head outputs
        attn = jnp.concatenate(heads, axis=-1)                                       # (NT, D)
        x = x + jnp.dot(attn.astype(bf16), wproj_ref[l],
                        preferred_element_type=f32) + bproj_ref[l]

        # ---------------- MLP (pre-norm) ------------------------------------------
        h = _layernorm(x, ln2g_ref[l], ln2b_ref[l])
        h = jnp.dot(h.astype(bf16), w1_ref[l], preferred_element_type=f32) + b1_ref[l]
        # TODO(synk): torch nn.GELU default is exact erf; tanh approximation used (EUP path).
        h = jax.nn.gelu(h, approximate=True)
        h = jnp.dot(h.astype(bf16), w2_ref[l], preferred_element_type=f32) + b2_ref[l]
        x = x + h

    # final LayerNorm + tokens = (cls + dist) / 2       (output 64 lanes: masked vst, negligible)
    xn = _layernorm(x, fg_ref[...], fb_ref[...])                                     # (NT, D)
    cls = jnp.concatenate([xn[b * N_TOKENS:b * N_TOKENS + 1] for b in range(B)], axis=0)
    dst = jnp.concatenate([xn[b * N_TOKENS + 1:b * N_TOKENS + 2] for b in range(B)], axis=0)
    o_ref[...] = 0.5 * (cls + dst)                                                   # (B, D)


# --------------------------- pallas_call wrapper -----------------------------
def passt_fused(chunks, kp, dft, melwt):
    args = (chunks, dft, melwt, kp["patch_w"], kp["tok_bias"], kp["attn_mask"],
            kp["ln1_g"], kp["ln1_b"], kp["wqkv"], kp["bqkv"], kp["wproj"], kp["bproj"],
            kp["ln2_g"], kp["ln2_b"], kp["w1"], kp["b1"], kp["w2"], kp["b2"],
            kp["final_g"], kp["final_b"])
    return pl.pallas_call(
        _fused_kernel,
        out_shape=jax.ShapeDtypeStruct((B, EMBED_DIM), jnp.float32),
        grid=(1,),
        in_specs=[_const_spec(a.shape) for a in args],
        out_specs=pl.BlockSpec((B, EMBED_DIM), lambda i: (0, 0)),
        compiler_params=pltpu.CompilerParams(dimension_semantics=("arbitrary",)),
    )(*args)


# ---------------------------- constants & params ------------------------------
def _mel_filterbank(n_mels, n_fft, sr, fmin, fmax):
    n_bins = n_fft // 2 + 1
    fft_freqs = np.linspace(0.0, sr / 2.0, n_bins)
    hz2mel = lambda f: 2595.0 * np.log10(1.0 + f / 700.0)
    mel2hz = lambda m: 700.0 * (10.0 ** (m / 2595.0) - 1.0)
    mels = np.linspace(hz2mel(fmin), hz2mel(fmax), n_mels + 2)
    f_pts = mel2hz(mels)
    fb = np.zeros((n_mels, n_bins), dtype=np.float64)
    for m in range(n_mels):
        lo, ce, hi = f_pts[m], f_pts[m + 1], f_pts[m + 2]
        up = (fft_freqs - lo) / max(ce - lo, 1e-9)
        dn = (hi - fft_freqs) / max(hi - ce, 1e-9)
        fb[m] = np.maximum(0.0, np.minimum(up, dn))
    enorm = 2.0 / (f_pts[2:n_mels + 2] - f_pts[:n_mels])   # slaney norm (norm=1)
    fb *= enorm[:, None]
    return fb


def make_stft_constants():
    n = np.arange(WIN_LEN)
    hann = 0.5 - 0.5 * np.cos(2.0 * np.pi * n / WIN_LEN)   # periodic Hann
    win = np.zeros(N_FFT)
    left = (N_FFT - WIN_LEN) // 2
    win[left:left + WIN_LEN] = hann
    t = np.arange(N_FFT)[:, None]
    k = np.arange(N_BINS)[None, :]
    ang = 2.0 * np.pi * t * k / N_FFT
    # fused cos|sin DFT matrix, bins zero-padded 65 -> 128 for lane-dense tiles
    dft = np.zeros((N_FFT, 2 * N_BINS_PAD), dtype=np.float32)
    dft[:, :N_BINS] = win[:, None] * np.cos(ang)
    dft[:, N_BINS_PAD:N_BINS_PAD + N_BINS] = -win[:, None] * np.sin(ang)
    melwt = np.zeros((N_BINS_PAD, N_MELS), dtype=np.float32)
    melwt[:N_BINS, :] = _mel_filterbank(N_MELS, N_FFT, SR, 0.0, SR / 2.0).T
    return jnp.asarray(dft), jnp.asarray(melwt)


def init_params(key):
    ks = iter(jax.random.split(key, 16))
    nrm = lambda shape, s=0.02: (s * jax.random.normal(next(ks), shape)).astype(jnp.float32)
    return {
        "patch_w": nrm((PATCH * PATCH, EMBED_DIM)),      # rows p = kf*16 + kt (conv flatten order)
        "patch_b": jnp.zeros((1, EMBED_DIM), jnp.float32),
        "freq_pos": nrm((F_PATCHES, EMBED_DIM)),
        "time_pos": nrm((T_PATCHES, EMBED_DIM)),
        "cls_tok": nrm((1, EMBED_DIM)),
        "dist_tok": nrm((1, EMBED_DIM)),
        "tok_pos": nrm((2, EMBED_DIM)),
        "final_g": jnp.ones((1, EMBED_DIM), jnp.float32),
        "final_b": jnp.zeros((1, EMBED_DIM), jnp.float32),
        # per-layer weights stacked along a leading DEPTH axis
        "ln1_g": jnp.ones((DEPTH, 1, EMBED_DIM), jnp.float32),
        "ln1_b": jnp.zeros((DEPTH, 1, EMBED_DIM), jnp.float32),
        "wqkv": nrm((DEPTH, EMBED_DIM, 3 * EMBED_DIM)),
        "bqkv": jnp.zeros((DEPTH, 1, 3 * EMBED_DIM), jnp.float32),
        "wproj": nrm((DEPTH, EMBED_DIM, EMBED_DIM)),
        "bproj": jnp.zeros((DEPTH, 1, EMBED_DIM), jnp.float32),
        "ln2_g": jnp.ones((DEPTH, 1, EMBED_DIM), jnp.float32),
        "ln2_b": jnp.zeros((DEPTH, 1, EMBED_DIM), jnp.float32),
        "w1": nrm((DEPTH, EMBED_DIM, HIDDEN)),
        "b1": jnp.zeros((DEPTH, 1, HIDDEN), jnp.float32),
        "w2": nrm((DEPTH, HIDDEN, EMBED_DIM)),
        "b2": jnp.zeros((DEPTH, 1, EMBED_DIM), jnp.float32),
    }


def prepare_kernel_params(params):
    """Fold cls/dist tokens + positional embeds + patch bias into one per-row bias table
    (tiled over the folded batch), row-permute the patch-embed weight to the kernel's
    (kt, kf) im2col order, build the cross-batch attention mask, and cast MXU weight
    operands to bf16 (f32 accumulation in-kernel)."""
    pos = params["freq_pos"][:, None, :] + params["time_pos"][None, :, :]
    patch_bias = params["patch_b"] + pos.reshape(N_PATCH_TOK, EMBED_DIM)
    tok_bias = jnp.concatenate(
        [params["cls_tok"] + params["tok_pos"][0:1],
         params["dist_tok"] + params["tok_pos"][1:2],
         patch_bias], axis=0)                                    # (N_TOKENS, D)
    tok_bias = jnp.tile(tok_bias, (B, 1)).astype(jnp.float32)    # (B*N_TOKENS, D)

    # conv-order rows (kf*16 + kt) -> kernel im2col order rows (kt*16 + kf)
    wp = params["patch_w"].reshape(PATCH, PATCH, EMBED_DIM)      # [kf, kt, d]
    wp = jnp.transpose(wp, (1, 0, 2)).reshape(PATCH * PATCH, EMBED_DIM)

    # block-diagonal additive mask: 0 within a batch sample, -1e30 across samples
    ids = np.repeat(np.arange(B), N_TOKENS)
    amask = np.where(ids[:, None] == ids[None, :], 0.0, -1e30).astype(np.float32)

    bf = lambda a: a.astype(jnp.bfloat16)
    return {
        "patch_w": bf(wp),
        "tok_bias": tok_bias,
        "attn_mask": jnp.asarray(amask),
        "ln1_g": params["ln1_g"], "ln1_b": params["ln1_b"],
        "wqkv": bf(params["wqkv"]), "bqkv": params["bqkv"],
        "wproj": bf(params["wproj"]), "bproj": params["bproj"],
        "ln2_g": params["ln2_g"], "ln2_b": params["ln2_b"],
        "w1": bf(params["w1"]), "b1": params["b1"],
        "w2": bf(params["w2"]), "b2": params["b2"],
        "final_g": params["final_g"], "final_b": params["final_b"],
    }


# ------------------------------- forward --------------------------------------
def passt_forward(x, kparams, dft, melwt):
    # ---- AugmentMelSTFT host prologue (eval mode, no freq/time masking) ----
    # TODO(synk): pre-emphasis + reflect padding kept as two tiny host XLA ops; the
    # sample-shift / flip across the 1984-sample axis has no clean in-kernel form.
    y = x[:, 1:] - 0.97 * x[:, :-1]                        # pre-emphasis conv1d([-0.97, 1])
    pad = N_FFT // 2
    yp = jnp.pad(y, ((0, 0), (pad, pad)), mode="reflect")  # center=True reflect pad
    # HOP = n_fft/2 -> padded signal splits into non-overlapping chunks (free reshape);
    # the overlapping-frame assembly happens inside the kernel as two DFT matmuls.
    chunks = yp.reshape(B * N_CHUNKS, HOP)                 # (B*33, 64)

    # TODO(synk): structured patchout (s_patchout_t=15, s_patchout_f=2) is random and
    # training-only in PaSST; eval-mode forward keeps all patches, so it is omitted.
    return passt_fused(chunks, kparams, dft, melwt)        # (B, D), single pallas_call


# --------------------------------- main ----------------------------------------
if __name__ == "__main__":
    key = jax.random.PRNGKey(0)
    params = init_params(jax.random.fold_in(key, 1))
    kparams = prepare_kernel_params(params)
    dft, melwt = make_stft_constants()
    x = 0.1 * jax.random.normal(key, (B, AUDIO_LEN), dtype=jnp.float32)

    fwd = jax.jit(lambda a: passt_forward(a, kparams, dft, melwt))
    out = fwd(x)
    jax.block_until_ready(out)

    assert out.shape == (B, EMBED_DIM), out.shape
    assert bool(jnp.all(jnp.isfinite(out)))
    print("KERNEL_OK")
</pallas_src>

<mosaic_0001>
module attributes {stable_mosaic.version = 11 : i64} {
  func.func @_fused_kernel(%arg0: i32, %arg1: memref<66x64xf32, #tpu.memory_space<vmem>>, %arg2: memref<128x256xf32, #tpu.memory_space<vmem>>, %arg3: memref<128x32xf32, #tpu.memory_space<vmem>>, %arg4: memref<256x64xbf16, #tpu.memory_space<vmem>>, %arg5: memref<12x64xf32, #tpu.memory_space<vmem>>, %arg6: memref<12x12xf32, #tpu.memory_space<vmem>>, %arg7: memref<2x1x64xf32, #tpu.memory_space<vmem>>, %arg8: memref<2x1x64xf32, #tpu.memory_space<vmem>>, %arg9: memref<2x64x192xbf16, #tpu.memory_space<vmem>>, %arg10: memref<2x1x192xf32, #tpu.memory_space<vmem>>, %arg11: memref<2x64x64xbf16, #tpu.memory_space<vmem>>, %arg12: memref<2x1x64xf32, #tpu.memory_space<vmem>>, %arg13: memref<2x1x64xf32, #tpu.memory_space<vmem>>, %arg14: memref<2x1x64xf32, #tpu.memory_space<vmem>>, %arg15: memref<2x64x256xbf16, #tpu.memory_space<vmem>>, %arg16: memref<2x1x256xf32, #tpu.memory_space<vmem>>, %arg17: memref<2x256x64xbf16, #tpu.memory_space<vmem>>, %arg18: memref<2x1x64xf32, #tpu.memory_space<vmem>>, %arg19: memref<1x64xf32, #tpu.memory_space<vmem>>, %arg20: memref<1x64xf32, #tpu.memory_space<vmem>>, %arg21: memref<2x64xf32, #tpu.memory_space<vmem>>) attributes {dimension_semantics = [#tpu.dimension_semantics<arbitrary>], iteration_bounds = array<i64: 1>, scalar_prefetch = 0 : i64, scratch_operands = 0 : i64, tpu.core_type = #tpu.core_type<tc>, window_params = [{pipeline_mode = #tpu.pipeline_mode<synchronous>, transform_indices = @transform_0, window_bounds = array<i64: 66, 64>}, {pipeline_mode = #tpu.pipeline_mode<synchronous>, transform_indices = @transform_1, window_bounds = array<i64: 128, 256>}, {pipeline_mode = #tpu.pipeline_mode<synchronous>, transform_indices = @transform_2, window_bounds = array<i64: 128, 32>}, {pipeline_mode = #tpu.pipeline_mode<synchronous>, transform_indices = @transform_3, window_bounds = array<i64: 256, 64>}, {pipeline_mode = #tpu.pipeline_mode<synchronous>, transform_indices = @transform_4, window_bounds = array<i64: 12, 64>}, {pipeline_mode = #tpu.pipeline_mode<synchronous>, transform_indices = @transform_5, window_bounds = array<i64: 12, 12>}, {pipeline_mode = #tpu.pipeline_mode<synchronous>, transform_indices = @transform_6, window_bounds = array<i64: 2, 1, 64>}, {pipeline_mode = #tpu.pipeline_mode<synchronous>, transform_indices = @transform_7, window_bounds = array<i64: 2, 1, 64>}, {pipeline_mode = #tpu.pipeline_mode<synchronous>, transform_indices = @transform_8, window_bounds = array<i64: 2, 64, 192>}, {pipeline_mode = #tpu.pipeline_mode<synchronous>, transform_indices = @transform_9, window_bounds = array<i64: 2, 1, 192>}, {pipeline_mode = #tpu.pipeline_mode<synchronous>, transform_indices = @transform_10, window_bounds = array<i64: 2, 64, 64>}, {pipeline_mode = #tpu.pipeline_mode<synchronous>, transform_indices = @transform_11, window_bounds = array<i64: 2, 1, 64>}, {pipeline_mode = #tpu.pipeline_mode<synchronous>, transform_indices = @transform_12, window_bounds = array<i64: 2, 1, 64>}, {pipeline_mode = #tpu.pipeline_mode<synchronous>, transform_indices = @transform_13, window_bounds = array<i64: 2, 1, 64>}, {pipeline_mode = #tpu.pipeline_mode<synchronous>, transform_indices = @transform_14, window_bounds = array<i64: 2, 64, 256>}, {pipeline_mode = #tpu.pipeline_mode<synchronous>, transform_indices = @transform_15, window_bounds = array<i64: 2, 1, 256>}, {pipeline_mode = #tpu.pipeline_mode<synchronous>, transform_indices = @transform_16, window_bounds = array<i64: 2, 256, 64>}, {pipeline_mode = #tpu.pipeline_mode<synchronous>, transform_indices = @transform_17, window_bounds = array<i64: 2, 1, 64>}, {pipeline_mode = #tpu.pipeline_mode<synchronous>, transform_indices = @transform_18, window_bounds = array<i64: 1, 64>}, {pipeline_mode = #tpu.pipeline_mode<synchronous>, transform_indices = @transform_19, window_bounds = array<i64: 1, 64>}, {pipeline_mode = #tpu.pipeline_mode<synchronous>, transform_indices = @transform_20, window_bounds = array<i64: 2, 64>}]} {
    %c0 = arith.constant 0 : index
    %c0_0 = arith.constant 0 : index
    %0 = vector.load %arg1[%c0, %c0_0] : memref<66x64xf32, #tpu.memory_space<vmem>>, vector<66x64xf32>
    %1 = vector.extract_strided_slice %0 {offsets = [0, 0], sizes = [32, 64], strides = [1, 1]} : vector<66x64xf32> to vector<32x64xf32>
    %2 = vector.extract_strided_slice %0 {offsets = [33, 0], sizes = [32, 64], strides = [1, 1]} : vector<66x64xf32> to vector<32x64xf32>
    %3 = tpu.concatenate %1, %2 in 0 : vector<32x64xf32>, vector<32x64xf32> -> vector<64x64xf32>
    %4 = vector.extract_strided_slice %0 {offsets = [1, 0], sizes = [32, 64], strides = [1, 1]} : vector<66x64xf32> to vector<32x64xf32>
    %5 = vector.extract_strided_slice %0 {offsets = [34, 0], sizes = [32, 64], strides = [1, 1]} : vector<66x64xf32> to vector<32x64xf32>
    %6 = tpu.concatenate %4, %5 in 0 : vector<32x64xf32>, vector<32x64xf32> -> vector<64x64xf32>
    %c0_1 = arith.constant 0 : index
    %c0_2 = arith.constant 0 : index
    %7 = vector.load %arg2[%c0_1, %c0_2] : memref<128x256xf32, #tpu.memory_space<vmem>>, vector<64x256xf32>
    %cst = arith.constant dense<0.000000e+00> : vector<64x256xf32>
    %8 = tpu.matmul %3, %7, %cst {dimension_numbers = #tpu.dot_dimension_numbers<[1], [0], [0], [1], [0, 0, 1, 1], [], []>} : vector<64x64xf32>, vector<64x256xf32>, vector<64x256xf32> -> vector<64x256xf32>
    %c64 = arith.constant 64 : index
    %c0_3 = arith.constant 0 : index
    %9 = vector.load %arg2[%c64, %c0_3] : memref<128x256xf32, #tpu.memory_space<vmem>>, vector<64x256xf32>
    %cst_4 = arith.constant dense<0.000000e+00> : vector<64x256xf32>
    %10 = tpu.matmul %6, %9, %cst_4 {dimension_numbers = #tpu.dot_dimension_numbers<[1], [0], [0], [1], [0, 0, 1, 1], [], []>} : vector<64x64xf32>, vector<64x256xf32>, vector<64x256xf32> -> vector<64x256xf32>
    %11 = arith.addf %8, %10 : vector<64x256xf32>
    %12 = vector.extract_strided_slice %11 {offsets = [0, 0], sizes = [64, 128], strides = [1, 1]} : vector<64x256xf32> to vector<64x128xf32>
    %13 = vector.extract_strided_slice %11 {offsets = [0, 128], sizes = [64, 128], strides = [1, 1]} : vector<64x256xf32> to vector<64x128xf32>
    %14 = arith.mulf %12, %12 : vector<64x128xf32>
    %15 = arith.mulf %13, %13 : vector<64x128xf32>
    %16 = arith.addf %14, %15 : vector<64x128xf32>
    %c0_5 = arith.constant 0 : index
    %c0_6 = arith.constant 0 : index
    %17 = vector.load %arg3[%c0_5, %c0_6] : memref<128x32xf32, #tpu.memory_space<vmem>>, vector<128x32xf32>
    %cst_7 = arith.constant dense<0.000000e+00> : vector<64x32xf32>
    %18 = tpu.matmul %16, %17, %cst_7 {dimension_numbers = #tpu.dot_dimension_numbers<[1], [0], [0], [1], [0, 0, 1, 1], [], []>} : vector<64x128xf32>, vector<128x32xf32>, vector<64x32xf32> -> vector<64x32xf32>
    %cst_8 = arith.constant 9.99999974E-6 : f32
    %19 = vector.broadcast %cst_8 : f32 to vector<64x32xf32>
    %20 = arith.addf %18, %19 : vector<64x32xf32>
    %21 = math.log %20 : vector<64x32xf32>
    %cst_9 = arith.constant 4.500000e+00 : f32
    %22 = vector.broadcast %cst_9 : f32 to vector<64x32xf32>
    %23 = arith.addf %21, %22 : vector<64x32xf32>
    %cst_10 = arith.constant 5.000000e+00 : f32
    %24 = vector.broadcast %cst_10 : f32 to vector<64x32xf32>
    %25 = arith.divf %23, %24 : vector<64x32xf32>
    %cst_11 = arith.constant 0.000000e+00 : f32
    %26 = vector.broadcast %cst_11 : f32 to vector<1x256xf32>
    %27 = vector.extract_strided_slice %25 {offsets = [0, 0], sizes = [1, 16], strides = [1, 1]} : vector<64x32xf32> to vector<1x16xf32>
    %28 = vector.extract_strided_slice %25 {offsets = [1, 0], sizes = [1, 16], strides = [1, 1]} : vector<64x32xf32> to vector<1x16xf32>
    %29 = vector.extract_strided_slice %25 {offsets = [2, 0], sizes = [1, 16], strides = [1, 1]} : vector<64x32xf32> to vector<1x16xf32>
    %30 = vector.extract_strided_slice %25 {offsets = [3, 0], sizes = [1, 16], strides = [1, 1]} : vector<64x32xf32> to vector<1x16xf32>
    %31 = vector.extract_strided_slice %25 {offsets = [4, 0], sizes = [1, 16], strides = [1, 1]} : vector<64x32xf32> to vector<1x16xf32>
    %32 = vector.extract_strided_slice %25 {offsets = [5, 0], sizes = [1, 16], strides = [1, 1]} : vector<64x32xf32> to vector<1x16xf32>
    %33 = vector.extract_strided_slice %25 {offsets = [6, 0], sizes = [1, 16], strides = [1, 1]} : vector<64x32xf32> to vector<1x16xf32>
    %34 = vector.extract_strided_slice %25 {offsets = [7, 0], sizes = [1, 16], strides = [1, 1]} : vector<64x32xf32> to vector<1x16xf32>
    %35 = vector.extract_strided_slice %25 {offsets = [8, 0], sizes = [1, 16], strides = [1, 1]} : vector<64x32xf32> to vector<1x16xf32>
    %36 = vector.extract_strided_slice %25 {offsets = [9, 0], sizes = [1, 16], strides = [1, 1]} : vector<64x32xf32> to vector<1x16xf32>
    %37 = vector.extract_strided_slice %25 {offsets = [10, 0], sizes = [1, 16], strides = [1, 1]} : vector<64x32xf32> to vector<1x16xf32>
    %38 = vector.extract_strided_slice %25 {offsets = [11, 0], sizes = [1, 16], strides = [1, 1]} : vector<64x32xf32> to vector<1x16xf32>
    %39 = vector.extract_strided_slice %25 {offsets = [12, 0], sizes = [1, 16], strides = [1, 1]} : vector<64x32xf32> to vector<1x16xf32>
    %40 = vector.extract_strided_slice %25 {offsets = [13, 0], sizes = [1, 16], strides = [1, 1]} : vector<64x32xf32> to vector<1x16xf32>
    %41 = vector.extract_strided_slice %25 {offsets = [14, 0], sizes = [1, 16], strides = [1, 1]} : vector<64x32xf32> to vector<1x16xf32>
    %42 = vector.extract_strided_slice %25 {offsets = [15, 0], sizes = [1, 16], strides = [1, 1]} : vector<64x32xf32> to vector<1x16xf32>
    %43 = tpu.concatenate %27, %28, %29, %30, %31, %32, %33, %34, %35, %36, %37, %38, %39, %40, %41, %42 in 1 : vector<1x16xf32>, vector<1x16xf32>, vector<1x16xf32>, vector<1x16xf32>, vector<1x16xf32>, vector<1x16xf32>, vector<1x16xf32>, vector<1x16xf32>, vector<1x16xf32>, vector<1x16xf32>, vector<1x16xf32>, vector<1x16xf32>, vector<1x16xf32>, vector<1x16xf32>, vector<1x16xf32>, vector<1x16xf32> -> vector<1x256xf32>
    %44 = vector.extract_strided_slice %25 {offsets = [16, 0], sizes = [1, 16], strides = [1, 1]} : vector<64x32xf32> to vector<1x16xf32>
    %45 = vector.extract_strided_slice %25 {offsets = [17, 0], sizes = [1, 16], strides = [1, 1]} : vector<64x32xf32> to vector<1x16xf32>
    %46 = vector.extract_strided_slice %25 {offsets = [18, 0], sizes = [1, 16], strides = [1, 1]} : vector<64x32xf32> to vector<1x16xf32>
    %47 = vector.extract_strided_slice %25 {offsets = [19, 0], sizes = [1, 16], strides = [1, 1]} : vector<64x32xf32> to vector<1x16xf32>
    %48 = vector.extract_strided_slice %25 {offsets = [20, 0], sizes = [1, 16], strides = [1, 1]} : vector<64x32xf32> to vector<1x16xf32>
    %49 = vector.extract_strided_slice %25 {offsets = [21, 0], sizes = [1, 16], strides = [1, 1]} : vector<64x32xf32> to vector<1x16xf32>
    %50 = vector.extract_strided_slice %25 {offsets = [22, 0], sizes = [1, 16], strides = [1, 1]} : vector<64x32xf32> to vector<1x16xf32>
    %51 = vector.extract_strided_slice %25 {offsets = [23, 0], sizes = [1, 16], strides = [1, 1]} : vector<64x32xf32> to vector<1x16xf32>
    %52 = vector.extract_strided_slice %25 {offsets = [24, 0], sizes = [1, 16], strides = [1, 1]} : vector<64x32xf32> to vector<1x16xf32>
    %53 = vector.extract_strided_slice %25 {offsets = [25, 0], sizes = [1, 16], strides = [1, 1]} : vector<64x32xf32> to vector<1x16xf32>
    %54 = vector.extract_strided_slice %25 {offsets = [26, 0], sizes = [1, 16], strides = [1, 1]} : vector<64x32xf32> to vector<1x16xf32>
    %55 = vector.extract_strided_slice %25 {offsets = [27, 0], sizes = [1, 16], strides = [1, 1]} : vector<64x32xf32> to vector<1x16xf32>
    %56 = vector.extract_strided_slice %25 {offsets = [28, 0], sizes = [1, 16], strides = [1, 1]} : vector<64x32xf32> to vector<1x16xf32>
    %57 = vector.extract_strided_slice %25 {offsets = [29, 0], sizes = [1, 16], strides = [1, 1]} : vector<64x32xf32> to vector<1x16xf32>
    %58 = vector.extract_strided_slice %25 {offsets = [30, 0], sizes = [1, 16], strides = [1, 1]} : vector<64x32xf32> to vector<1x16xf32>
    %59 = vector.extract_strided_slice %25 {offsets = [31, 0], sizes = [1, 16], strides = [1, 1]} : vector<64x32xf32> to vector<1x16xf32>
    %60 = tpu.concatenate %44, %45, %46, %47, %48, %49, %50, %51, %52, %53, %54, %55, %56, %57, %58, %59 in 1 : vector<1x16xf32>, vector<1x16xf32>, vector<1x16xf32>, vector<1x16xf32>, vector<1x16xf32>, vector<1x16xf32>, vector<1x16xf32>, vector<1x16xf32>, vector<1x16xf32>, vector<1x16xf32>, vector<1x16xf32>, vector<1x16xf32>, vector<1x16xf32>, vector<1x16xf32>, vector<1x16xf32>, vector<1x16xf32> -> vector<1x256xf32>
    %61 = vector.extract_strided_slice %25 {offsets = [0, 16], sizes = [1, 16], strides = [1, 1]} : vector<64x32xf32> to vector<1x16xf32>
    %62 = vector.extract_strided_slice %25 {offsets = [1, 16], sizes = [1, 16], strides = [1, 1]} : vector<64x32xf32> to vector<1x16xf32>
    %63 = vector.extract_strided_slice %25 {offsets = [2, 16], sizes = [1, 16], strides = [1, 1]} : vector<64x32xf32> to vector<1x16xf32>
    %64 = vector.extract_strided_slice %25 {offsets = [3, 16], sizes = [1, 16], strides = [1, 1]} : vector<64x32xf32> to vector<1x16xf32>
    %65 = vector.extract_strided_slice %25 {offsets = [4, 16], sizes = [1, 16], strides = [1, 1]} : vector<64x32xf32> to vector<1x16xf32>
    %66 = vector.extract_strided_slice %25 {offsets = [5, 16], sizes = [1, 16], strides = [1, 1]} : vector<64x32xf32> to vector<1x16xf32>
    %67 = vector.extract_strided_slice %25 {offsets = [6, 16], sizes = [1, 16], strides = [1, 1]} : vector<64x32xf32> to vector<1x16xf32>
    %68 = vector.extract_strided_slice %25 {offsets = [7, 16], sizes = [1, 16], strides = [1, 1]} : vector<64x32xf32> to vector<1x16xf32>
    %69 = vector.extract_strided_slice %25 {offsets = [8, 16], sizes = [1, 16], strides = [1, 1]} : vector<64x32xf32> to vector<1x16xf32>
    %70 = vector.extract_strided_slice %25 {offsets = [9, 16], sizes = [1, 16], strides = [1, 1]} : vector<64x32xf32> to vector<1x16xf32>
    %71 = vector.extract_strided_slice %25 {offsets = [10, 16], sizes = [1, 16], strides = [1, 1]} : vector<64x32xf32> to vector<1x16xf32>
    %72 = vector.extract_strided_slice %25 {offsets = [11, 16], sizes = [1, 16], strides = [1, 1]} : vector<64x32xf32> to vector<1x16xf32>
    %73 = vector.extract_strided_slice %25 {offsets = [12, 16], sizes = [1, 16], strides = [1, 1]} : vector<64x32xf32> to vector<1x16xf32>
    %74 = vector.extract_strided_slice %25 {offsets = [13, 16], sizes = [1, 16], strides = [1, 1]} : vector<64x32xf32> to vector<1x16xf32>
    %75 = vector.extract_strided_slice %25 {offsets = [14, 16], sizes = [1, 16], strides = [1, 1]} : vector<64x32xf32> to vector<1x16xf32>
    %76 = vector.extract_strided_slice %25 {offsets = [15, 16], sizes = [1, 16], strides = [1, 1]} : vector<64x32xf32> to vector<1x16xf32>
    %77 = tpu.concatenate %61, %62, %63, %64, %65, %66, %67, %68, %69, %70, %71, %72, %73, %74, %75, %76 in 1 : vector<1x16xf32>, vector<1x16xf32>, vector<1x16xf32>, vector<1x16xf32>, vector<1x16xf32>, vector<1x16xf32>, vector<1x16xf32>, vector<1x16xf32>, vector<1x16xf32>, vector<1x16xf32>, vector<1x16xf32>, vector<1x16xf32>, vector<1x16xf32>, vector<1x16xf32>, vector<1x16xf32>, vector<1x16xf32> -> vector<1x256xf32>
    %78 = vector.extract_strided_slice %25 {offsets = [16, 16], sizes = [1, 16], strides = [1, 1]} : vector<64x32xf32> to vector<1x16xf32>
    %79 = vector.extract_strided_slice %25 {offsets = [17, 16], sizes = [1, 16], strides = [1, 1]} : vector<64x32xf32> to vector<1x16xf32>
    %80 = vector.extract_strided_slice %25 {offsets = [18, 16], sizes = [1, 16], strides = [1, 1]} : vector<64x32xf32> to vector<1x16xf32>
    %81 = vector.extract_strided_slice %25 {offsets = [19, 16], sizes = [1, 16], strides = [1, 1]} : vector<64x32xf32> to vector<1x16xf32>
    %82 = vector.extract_strided_slice %25 {offsets = [20, 16], sizes = [1, 16], strides = [1, 1]} : vector<64x32xf32> to vector<1x16xf32>
    %83 = vector.extract_strided_slice %25 {offsets = [21, 16], sizes = [1, 16], strides = [1, 1]} : vector<64x32xf32> to vector<1x16xf32>
    %84 = vector.extract_strided_slice %25 {offsets = [22, 16], sizes = [1, 16], strides = [1, 1]} : vector<64x32xf32> to vector<1x16xf32>
    %85 = vector.extract_strided_slice %25 {offsets = [23, 16], sizes = [1, 16], strides = [1, 1]} : vector<64x32xf32> to vector<1x16xf32>
    %86 = vector.extract_strided_slice %25 {offsets = [24, 16], sizes = [1, 16], strides = [1, 1]} : vector<64x32xf32> to vector<1x16xf32>
    %87 = vector.extract_strided_slice %25 {offsets = [25, 16], sizes = [1, 16], strides = [1, 1]} : vector<64x32xf32> to vector<1x16xf32>
    %88 = vector.extract_strided_slice %25 {offsets = [26, 16], sizes = [1, 16], strides = [1, 1]} : vector<64x32xf32> to vector<1x16xf32>
    %89 = vector.extract_strided_slice %25 {offsets = [27, 16], sizes = [1, 16], strides = [1, 1]} : vector<64x32xf32> to vector<1x16xf32>
    %90 = vector.extract_strided_slice %25 {offsets = [28, 16], sizes = [1, 16], strides = [1, 1]} : vector<64x32xf32> to vector<1x16xf32>
    %91 = vector.extract_strided_slice %25 {offsets = [29, 16], sizes = [1, 16], strides = [1, 1]} : vector<64x32xf32> to vector<1x16xf32>
    %92 = vector.extract_strided_slice %25 {offsets = [30, 16], sizes = [1, 16], strides = [1, 1]} : vector<64x32xf32> to vector<1x16xf32>
    %93 = vector.extract_strided_slice %25 {offsets = [31, 16], sizes = [1, 16], strides = [1, 1]} : vector<64x32xf32> to vector<1x16xf32>
    %94 = tpu.concatenate %78, %79, %80, %81, %82, %83, %84, %85, %86, %87, %88, %89, %90, %91, %92, %93 in 1 : vector<1x16xf32>, vector<1x16xf32>, vector<1x16xf32>, vector<1x16xf32>, vector<1x16xf32>, vector<1x16xf32>, vector<1x16xf32>, vector<1x16xf32>, vector<1x16xf32>, vector<1x16xf32>, vector<1x16xf32>, vector<1x16xf32>, vector<1x16xf32>, vector<1x16xf32>, vector<1x16xf32>, vector<1x16xf32> -> vector<1x256xf32>
    %95 = vector.extract_strided_slice %25 {offsets = [32, 0], sizes = [1, 16], strides = [1, 1]} : vector<64x32xf32> to vector<1x16xf32>
    %96 = vector.extract_strided_slice %25 {offsets = [33, 0], sizes = [1, 16], strides = [1, 1]} : vector<64x32xf32> to vector<1x16xf32>
    %97 = vector.extract_strided_slice %25 {offsets = [34, 0], sizes = [1, 16], strides = [1, 1]} : vector<64x32xf32> to vector<1x16xf32>
    %98 = vector.extract_strided_slice %25 {offsets = [35, 0], sizes = [1, 16], strides = [1, 1]} : vector<64x32xf32> to vector<1x16xf32>
    %99 = vector.extract_strided_slice %25 {offsets = [36, 0], sizes = [1, 16], strides = [1, 1]} : vector<64x32xf32> to vector<1x16xf32>
    %100 = vector.extract_strided_slice %25 {offsets = [37, 0], sizes = [1, 16], strides = [1, 1]} : vector<64x32xf32> to vector<1x16xf32>
    %101 = vector.extract_strided_slice %25 {offsets = [38, 0], sizes = [1, 16], strides = [1, 1]} : vector<64x32xf32> to vector<1x16xf32>
    %102 = vector.extract_strided_slice %25 {offsets = [39, 0], sizes = [1, 16], strides = [1, 1]} : vector<64x32xf32> to vector<1x16xf32>
    %103 = vector.extract_strided_slice %25 {offsets = [40, 0], sizes = [1, 16], strides = [1, 1]} : vector<64x32xf32> to vector<1x16xf32>
    %104 = vector.extract_strided_slice %25 {offsets = [41, 0], sizes = [1, 16], strides = [1, 1]} : vector<64x32xf32> to vector<1x16xf32>
    %105 = vector.extract_strided_slice %25 {offsets = [42, 0], sizes = [1, 16], strides = [1, 1]} : vector<64x32xf32> to vector<1x16xf32>
    %106 = vector.extract_strided_slice %25 {offsets = [43, 0], sizes = [1, 16], strides = [1, 1]} : vector<64x32xf32> to vector<1x16xf32>
    %107 = vector.extract_strided_slice %25 {offsets = [44, 0], sizes = [1, 16], strides = [1, 1]} : vector<64x32xf32> to vector<1x16xf32>
    %108 = vector.extract_strided_slice %25 {offsets = [45, 0], sizes = [1, 16], strides = [1, 1]} : vector<64x32xf32> to vector<1x16xf32>
    %109 = vector.extract_strided_slice %25 {offsets = [46, 0], sizes = [1, 16], strides = [1, 1]} : vector<64x32xf32> to vector<1x16xf32>
    %110 = vector.extract_strided_slice %25 {offsets = [47, 0], sizes = [1, 16], strides = [1, 1]} : vector<64x32xf32> to vector<1x16xf32>
    %111 = tpu.concatenate %95, %96, %97, %98, %99, %100, %101, %102, %103, %104, %105, %106, %107, %108, %109, %110 in 1 : vector<1x16xf32>, vector<1x16xf32>, vector<1x16xf32>, vector<1x16xf32>, vector<1x16xf32>, vector<1x16xf32>, vector<1x16xf32>, vector<1x16xf32>, vector<1x16xf32>, vector<1x16xf32>, vector<1x16xf32>, vector<1x16xf32>, vector<1x16xf32>, vector<1x16xf32>, vector<1x16xf32>, vector<1x16xf32> -> vector<1x256xf32>
    %112 = vector.extract_strided_slice %25 {offsets = [48, 0], sizes = [1, 16], strides = [1, 1]} : vector<64x32xf32> to vector<1x16xf32>
    %113 = vector.extract_strided_slice %25 {offsets = [49, 0], sizes = [1, 16], strides = [1, 1]} : vector<64x32xf32> to vector<1x16xf32>
    %114 = vector.extract_strided_slice %25 {offsets = [50, 0], sizes = [1, 16], strides = [1, 1]} : vector<64x32xf32> to vector<1x16xf32>
    %115 = vector.extract_strided_slice %25 {offsets = [51, 0], sizes = [1, 16], strides = [1, 1]} : vector<64x32xf32> to vector<1x16xf32>
    %116 = vector.extract_strided_slice %25 {offsets = [52, 0], sizes = [1, 16], strides = [1, 1]} : vector<64x32xf32> to vector<1x16xf32>
    %117 = vector.extract_strided_slice %25 {offsets = [53, 0], sizes = [1, 16], strides = [1, 1]} : vector<64x32xf32> to vector<1x16xf32>
    %118 = vector.extract_strided_slice %25 {offsets = [54, 0], sizes = [1, 16], strides = [1, 1]} : vector<64x32xf32> to vector<1x16xf32>
    %119 = vector.extract_strided_slice %25 {offsets = [55, 0], sizes = [1, 16], strides = [1, 1]} : vector<64x32xf32> to vector<1x16xf32>
    %120 = vector.extract_strided_slice %25 {offsets = [56, 0], sizes = [1, 16], strides = [1, 1]} : vector<64x32xf32> to vector<1x16xf32>
    %121 = vector.extract_strided_slice %25 {offsets = [57, 0], sizes = [1, 16], strides = [1, 1]} : vector<64x32xf32> to vector<1x16xf32>
    %122 = vector.extract_strided_slice %25 {offsets = [58, 0], sizes = [1, 16], strides = [1, 1]} : vector<64x32xf32> to vector<1x16xf32>
    %123 = vector.extract_strided_slice %25 {offsets = [59, 0], sizes = [1, 16], strides = [1, 1]} : vector<64x32xf32> to vector<1x16xf32>
    %124 = vector.extract_strided_slice %25 {offsets = [60, 0], sizes = [1, 16], strides = [1, 1]} : vector<64x32xf32> to vector<1x16xf32>
    %125 = vector.extract_strided_slice %25 {offsets = [61, 0], sizes = [1, 16], strides = [1, 1]} : vector<64x32xf32> to vector<1x16xf32>
    %126 = vector.extract_strided_slice %25 {offsets = [62, 0], sizes = [1, 16], strides = [1, 1]} : vector<64x32xf32> to vector<1x16xf32>
    %127 = vector.extract_strided_slice %25 {offsets = [63, 0], sizes = [1, 16], strides = [1, 1]} : vector<64x32xf32> to vector<1x16xf32>
    %128 = tpu.concatenate %112, %113, %114, %115, %116, %117, %118, %119, %120, %121, %122, %123, %124, %125, %126, %127 in 1 : vector<1x16xf32>, vector<1x16xf32>, vector<1x16xf32>, vector<1x16xf32>, vector<1x16xf32>, vector<1x16xf32>, vector<1x16xf32>, vector<1x16xf32>, vector<1x16xf32>, vector<1x16xf32>, vector<1x16xf32>, vector<1x16xf32>, vector<1x16xf32>, vector<1x16xf32>, vector<1x16xf32>, vector<1x16xf32> -> vector<1x256xf32>
    %129 = vector.extract_strided_slice %25 {offsets = [32, 16], sizes = [1, 16], strides = [1, 1]} : vector<64x32xf32> to vector<1x16xf32>
    %130 = vector.extract_strided_slice %25 {offsets = [33, 16], sizes = [1, 16], strides = [1, 1]} : vector<64x32xf32> to vector<1x16xf32>
    %131 = vector.extract_strided_slice %25 {offsets = [34, 16], sizes = [1, 16], strides = [1, 1]} : vector<64x32xf32> to vector<1x16xf32>
    %132 = vector.extract_strided_slice %25 {offsets = [35, 16], sizes = [1, 16], strides = [1, 1]} : vector<64x32xf32> to vector<1x16xf32>
    %133 = vector.extract_strided_slice %25 {offsets = [36, 16], sizes = [1, 16], strides = [1, 1]} : vector<64x32xf32> to vector<1x16xf32>
    %134 = vector.extract_strided_slice %25 {offsets = [37, 16], sizes = [1, 16], strides = [1, 1]} : vector<64x32xf32> to vector<1x16xf32>
    %135 = vector.extract_strided_slice %25 {offsets = [38, 16], sizes = [1, 16], strides = [1, 1]} : vector<64x32xf32> to vector<1x16xf32>
    %136 = vector.extract_strided_slice %25 {offsets = [39, 16], sizes = [1, 16], strides = [1, 1]} : vector<64x32xf32> to vector<1x16xf32>
    %137 = vector.extract_strided_slice %25 {offsets = [40, 16], sizes = [1, 16], strides = [1, 1]} : vector<64x32xf32> to vector<1x16xf32>
    %138 = vector.extract_strided_slice %25 {offsets = [41, 16], sizes = [1, 16], strides = [1, 1]} : vector<64x32xf32> to vector<1x16xf32>
    %139 = vector.extract_strided_slice %25 {offsets = [42, 16], sizes = [1, 16], strides = [1, 1]} : vector<64x32xf32> to vector<1x16xf32>
    %140 = vector.extract_strided_slice %25 {offsets = [43, 16], sizes = [1, 16], strides = [1, 1]} : vector<64x32xf32> to vector<1x16xf32>
    %141 = vector.extract_strided_slice %25 {offsets = [44, 16], sizes = [1, 16], strides = [1, 1]} : vector<64x32xf32> to vector<1x16xf32>
    %142 = vector.extract_strided_slice %25 {offsets = [45, 16], sizes = [1, 16], strides = [1, 1]} : vector<64x32xf32> to vector<1x16xf32>
    %143 = vector.extract_strided_slice %25 {offsets = [46, 16], sizes = [1, 16], strides = [1, 1]} : vector<64x32xf32> to vector<1x16xf32>
    %144 = vector.extract_strided_slice %25 {offsets = [47, 16], sizes = [1, 16], strides = [1, 1]} : vector<64x32xf32> to vector<1x16xf32>
    %145 = tpu.concatenate %129, %130, %131, %132, %133, %134, %135, %136, %137, %138, %139, %140, %141, %142, %143, %144 in 1 : vector<1x16xf32>, vector<1x16xf32>, vector<1x16xf32>, vector<1x16xf32>, vector<1x16xf32>, vector<1x16xf32>, vector<1x16xf32>, vector<1x16xf32>, vector<1x16xf32>, vector<1x16xf32>, vector<1x16xf32>, vector<1x16xf32>, vector<1x16xf32>, vector<1x16xf32>, vector<1x16xf32>, vector<1x16xf32> -> vector<1x256xf32>
    %146 = vector.extract_strided_slice %25 {offsets = [48, 16], sizes = [1, 16], strides = [1, 1]} : vector<64x32xf32> to vector<1x16xf32>
    %147 = vector.extract_strided_slice %25 {offsets = [49, 16], sizes = [1, 16], strides = [1, 1]} : vector<64x32xf32> to vector<1x16xf32>
    %148 = vector.extract_strided_slice %25 {offsets = [50, 16], sizes = [1, 16], strides = [1, 1]} : vector<64x32xf32> to vector<1x16xf32>
    %149 = vector.extract_strided_slice %25 {offsets = [51, 16], sizes = [1, 16], strides = [1, 1]} : vector<64x32xf32> to vector<1x16xf32>
    %150 = vector.extract_strided_slice %25 {offsets = [52, 16], sizes = [1, 16], strides = [1, 1]} : vector<64x32xf32> to vector<1x16xf32>
    %151 = vector.extract_strided_slice %25 {offsets = [53, 16], sizes = [1, 16], strides = [1, 1]} : vector<64x32xf32> to vector<1x16xf32>
    %152 = vector.extract_strided_slice %25 {offsets = [54, 16], sizes = [1, 16], strides = [1, 1]} : vector<64x32xf32> to vector<1x16xf32>
    %153 = vector.extract_strided_slice %25 {offsets = [55, 16], sizes = [1, 16], strides = [1, 1]} : vector<64x32xf32> to vector<1x16xf32>
    %154 = vector.extract_strided_slice %25 {offsets = [56, 16], sizes = [1, 16], strides = [1, 1]} : vector<64x32xf32> to vector<1x16xf32>
    %155 = vector.extract_strided_slice %25 {offsets = [57, 16], sizes = [1, 16], strides = [1, 1]} : vector<64x32xf32> to vector<1x16xf32>
    %156 = vector.extract_strided_slice %25 {offsets = [58, 16], sizes = [1, 16], strides = [1, 1]} : vector<64x32xf32> to vector<1x16xf32>
    %157 = vector.extract_strided_slice %25 {offsets = [59, 16], sizes = [1, 16], strides = [1, 1]} : vector<64x32xf32> to vector<1x16xf32>
    %158 = vector.extract_strided_slice %25 {offsets = [60, 16], sizes = [1, 16], strides = [1, 1]} : vector<64x32xf32> to vector<1x16xf32>
    %159 = vector.extract_strided_slice %25 {offsets = [61, 16], sizes = [1, 16], strides = [1, 1]} : vector<64x32xf32> to vector<1x16xf32>
    %160 = vector.extract_strided_slice %25 {offsets = [62, 16], sizes = [1, 16], strides = [1, 1]} : vector<64x32xf32> to vector<1x16xf32>
    %161 = vector.extract_strided_slice %25 {offsets = [63, 16], sizes = [1, 16], strides = [1, 1]} : vector<64x32xf32> to vector<1x16xf32>
    %162 = tpu.concatenate %146, %147, %148, %149, %150, %151, %152, %153, %154, %155, %156, %157, %158, %159, %160, %161 in 1 : vector<1x16xf32>, vector<1x16xf32>, vector<1x16xf32>, vector<1x16xf32>, vector<1x16xf32>, vector<1x16xf32>, vector<1x16xf32>, vector<1x16xf32>, vector<1x16xf32>, vector<1x16xf32>, vector<1x16xf32>, vector<1x16xf32>, vector<1x16xf32>, vector<1x16xf32>, vector<1x16xf32>, vector<1x16xf32> -> vector<1x256xf32>
    %163 = tpu.concatenate %26, %26, %43, %60, %77, %94, %26, %26, %111, %128, %145, %162 in 0 : vector<1x256xf32>, vector<1x256xf32>, vector<1x256xf32>, vector<1x256xf32>, vector<1x256xf32>, vector<1x256xf32>, vector<1x256xf32>, vector<1x256xf32>, vector<1x256xf32>, vector<1x256xf32>, vector<1x256xf32>, vector<1x256xf32> -> vector<12x256xf32>
    %164 = arith.truncf %163 : vector<12x256xf32> to vector<12x256xbf16>
    %c0_12 = arith.constant 0 : index
    %c0_13 = arith.constant 0 : index
    %165 = vector.load %arg4[%c0_12, %c0_13] : memref<256x64xbf16, #tpu.memory_space<vmem>>, vector<256x64xbf16>
    %cst_14 = arith.constant dense<0.000000e+00> : vector<12x64xf32>
    %166 = tpu.matmul %164, %165, %cst_14 {dimension_numbers = #tpu.dot_dimension_numbers<[1], [0], [0], [1], [0, 0, 1, 1], [], []>} : vector<12x256xbf16>, vector<256x64xbf16>, vector<12x64xf32> -> vector<12x64xf32>
    %c0_15 = arith.constant 0 : index
    %c0_16 = arith.constant 0 : index
    %167 = vector.load %arg5[%c0_15, %c0_16] : memref<12x64xf32, #tpu.memory_space<vmem>>, vector<12x64xf32>
    %168 = arith.addf %166, %167 : vector<12x64xf32>
    %c0_17 = arith.constant 0 : index
    %c0_18 = arith.constant 0 : index
    %169 = vector.load %arg6[%c0_17, %c0_18] : memref<12x12xf32, #tpu.memory_space<vmem>>, vector<12x12xf32>
    %c0_19 = arith.constant 0 : index
    %c0_20 = arith.constant 0 : index
    %c0_21 = arith.constant 0 : index
    %170 = vector.load %arg7[%c0_19, %c0_20, %c0_21] : memref<2x1x64xf32, #tpu.memory_space<vmem>>, vector<1x1x64xf32>
    %171 = vector.shape_cast %170 : vector<1x1x64xf32> to vector<1x64xf32>
    %c0_22 = arith.constant 0 : index
    %c0_23 = arith.constant 0 : index
    %c0_24 = arith.constant 0 : index
    %172 = vector.load %arg8[%c0_22, %c0_23, %c0_24] : memref<2x1x64xf32, #tpu.memory_space<vmem>>, vector<1x1x64xf32>
    %173 = vector.shape_cast %172 : vector<1x1x64xf32> to vector<1x64xf32>
    %cst_25 = arith.constant dense<0.000000e+00> : vector<12xf32>
    %174 = vector.multi_reduction <add>, %168, %cst_25 [1] : vector<12x64xf32> to vector<12xf32>
    %175 = vector.shape_cast %174 : vector<12xf32> to vector<12x1xf32>
    %cst_26 = arith.constant 6.400000e+01 : f32
    %176 = vector.broadcast %cst_26 : f32 to vector<12x1xf32>
    %177 = arith.divf %175, %176 : vector<12x1xf32>
    %178 = vector.broadcast %177 : vector<12x1xf32> to vector<12x64xf32>
    %179 = arith.subf %168, %178 : vector<12x64xf32>
    %180 = arith.mulf %179, %179 : vector<12x64xf32>
    %cst_27 = arith.constant dense<0.000000e+00> : vector<12xf32>
    %181 = vector.multi_reduction <add>, %180, %cst_27 [1] : vector<12x64xf32> to vector<12xf32>
    %182 = vector.shape_cast %181 : vector<12xf32> to vector<12x1xf32>
    %cst_28 = arith.constant 6.400000e+01 : f32
    %183 = vector.broadcast %cst_28 : f32 to vector<12x1xf32>
    %184 = arith.divf %182, %183 : vector<12x1xf32>
    %185 = vector.broadcast %177 : vector<12x1xf32> to vector<12x64xf32>
    %186 = arith.subf %168, %185 : vector<12x64xf32>
    %cst_29 = arith.constant 9.99999997E-7 : f32
    %187 = vector.broadcast %cst_29 : f32 to vector<12x1xf32>
    %188 = arith.addf %184, %187 : vector<12x1xf32>
    %189 = math.rsqrt %188 : vector<12x1xf32>
    %190 = vector.broadcast %189 : vector<12x1xf32> to vector<12x64xf32>
    %191 = arith.mulf %186, %190 : vector<12x64xf32>
    %192 = vector.broadcast %171 : vector<1x64xf32> to vector<12x64xf32>
    %193 = arith.mulf %191, %192 : vector<12x64xf32>
    %194 = vector.broadcast %173 : vector<1x64xf32> to vector<12x64xf32>
    %195 = arith.addf %193, %194 : vector<12x64xf32>
    %196 = arith.truncf %195 : vector<12x64xf32> to vector<12x64xbf16>
    %c0_30 = arith.constant 0 : index
    %c0_31 = arith.constant 0 : index
    %c0_32 = arith.constant 0 : index
    %197 = vector.load %arg9[%c0_30, %c0_31, %c0_32] : memref<2x64x192xbf16, #tpu.memory_space<vmem>>, vector<1x64x192xbf16>
    %198 = vector.shape_cast %197 : vector<1x64x192xbf16> to vector<64x192xbf16>
    %cst_33 = arith.constant dense<0.000000e+00> : vector<12x192xf32>
    %199 = tpu.matmul %196, %198, %cst_33 {dimension_numbers = #tpu.dot_dimension_numbers<[1], [0], [0], [1], [0, 0, 1, 1], [], []>} : vector<12x64xbf16>, vector<64x192xbf16>, vector<12x192xf32> -> vector<12x192xf32>
    %c0_34 = arith.constant 0 : index
    %c0_35 = arith.constant 0 : index
    %c0_36 = arith.constant 0 : index
    %200 = vector.load %arg10[%c0_34, %c0_35, %c0_36] : memref<2x1x192xf32, #tpu.memory_space<vmem>>, vector<1x1x192xf32>
    %201 = vector.shape_cast %200 : vector<1x1x192xf32> to vector<1x192xf32>
    %202 = vector.broadcast %201 : vector<1x192xf32> to vector<12x192xf32>
    %203 = arith.addf %199, %202 : vector<12x192xf32>
    %204 = vector.extract_strided_slice %203 {offsets = [0, 0], sizes = [12, 64], strides = [1, 1]} : vector<12x192xf32> to vector<12x64xf32>
    %cst_37 = arith.constant 2.500000e-01 : f32
    %205 = vector.broadcast %cst_37 : f32 to vector<12x64xf32>
    %206 = arith.mulf %204, %205 : vector<12x64xf32>
    %207 = vector.extract_strided_slice %203 {offsets = [0, 64], sizes = [12, 64], strides = [1, 1]} : vector<12x192xf32> to vector<12x64xf32>
    %208 = vector.extract_strided_slice %203 {offsets = [0, 128], sizes = [12, 64], strides = [1, 1]} : vector<12x192xf32> to vector<12x64xf32>
    %209 = vector.extract_strided_slice %206 {offsets = [0, 0], sizes = [12, 16], strides = [1, 1]} : vector<12x64xf32> to vector<12x16xf32>
    %210 = arith.truncf %209 : vector<12x16xf32> to vector<12x16xbf16>
    %211 = vector.extract_strided_slice %207 {offsets = [0, 0], sizes = [12, 16], strides = [1, 1]} : vector<12x64xf32> to vector<12x16xf32>
    %212 = arith.truncf %211 : vector<12x16xf32> to vector<12x16xbf16>
    "tpu.trace_start"() <{level = 10 : i32, message = "nd,md->nm"}> : () -> ()
    %cst_38 = arith.constant dense<0.000000e+00> : vector<12x12xf32>
    %213 = tpu.matmul %210, %212, %cst_38 {dimension_numbers = #tpu.dot_dimension_numbers<[1], [1], [0], [0], [0, 0, 1, 0], [], []>} : vector<12x16xbf16>, vector<12x16xbf16>, vector<12x12xf32> -> vector<12x12xf32>
    "tpu.trace_stop"() : () -> ()
    %214 = arith.addf %213, %169 : vector<12x12xf32>
    %cst_39 = arith.constant dense<0xFF800000> : vector<12xf32>
    %215 = vector.multi_reduction <maximumf>, %214, %cst_39 [1] : vector<12x12xf32> to vector<12xf32>
    %216 = vector.shape_cast %215 : vector<12xf32> to vector<12x1xf32>
    %217 = vector.broadcast %216 : vector<12x1xf32> to vector<12x12xf32>
    %218 = arith.subf %214, %217 : vector<12x12xf32>
    %219 = math.exp %218 : vector<12x12xf32>
    %cst_40 = arith.constant dense<0.000000e+00> : vector<12xf32>
    %220 = vector.multi_reduction <add>, %219, %cst_40 [1] : vector<12x12xf32> to vector<12xf32>
    %221 = vector.shape_cast %220 : vector<12xf32> to vector<12x1xf32>
    %222 = tpu.reciprocal %221 {approx = true} : vector<12x1xf32> -> vector<12x1xf32>
    %223 = vector.broadcast %222 : vector<12x1xf32> to vector<12x12xf32>
    %224 = arith.mulf %219, %223 : vector<12x12xf32>
    %225 = arith.truncf %224 : vector<12x12xf32> to vector<12x12xbf16>
    %226 = vector.extract_strided_slice %208 {offsets = [0, 0], sizes = [12, 16], strides = [1, 1]} : vector<12x64xf32> to vector<12x16xf32>
    %227 = arith.truncf %226 : vector<12x16xf32> to vector<12x16xbf16>
    %cst_41 = arith.constant dense<0.000000e+00> : vector<12x16xf32>
    %228 = tpu.matmul %225, %227, %cst_41 {dimension_numbers = #tpu.dot_dimension_numbers<[1], [0], [0], [1], [0, 0, 1, 1], [], []>} : vector<12x12xbf16>, vector<12x16xbf16>, vector<12x16xf32> -> vector<12x16xf32>
    %229 = vector.extract_strided_slice %206 {offsets = [0, 16], sizes = [12, 16], strides = [1, 1]} : vector<12x64xf32> to vector<12x16xf32>
    %230 = arith.truncf %229 : vector<12x16xf32> to vector<12x16xbf16>
    %231 = vector.extract_strided_slice %207 {offsets = [0, 16], sizes = [12, 16], strides = [1, 1]} : vector<12x64xf32> to vector<12x16xf32>
    %232 = arith.truncf %231 : vector<12x16xf32> to vector<12x16xbf16>
    "tpu.trace_start"() <{level = 10 : i32, message = "nd,md->nm"}> : () -> ()
    %cst_42 = arith.constant dense<0.000000e+00> : vector<12x12xf32>
    %233 = tpu.matmul %230, %232, %cst_42 {dimension_numbers = #tpu.dot_dimension_numbers<[1], [1], [0], [0], [0, 0, 1, 0], [], []>} : vector<12x16xbf16>, vector<12x16xbf16>, vector<12x12xf32> -> vector<12x12xf32>
    "tpu.trace_stop"() : () -> ()
    %234 = arith.addf %233, %169 : vector<12x12xf32>
    %cst_43 = arith.constant dense<0xFF800000> : vector<12xf32>
    %235 = vector.multi_reduction <maximumf>, %234, %cst_43 [1] : vector<12x12xf32> to vector<12xf32>
    %236 = vector.shape_cast %235 : vector<12xf32> to vector<12x1xf32>
    %237 = vector.broadcast %236 : vector<12x1xf32> to vector<12x12xf32>
    %238 = arith.subf %234, %237 : vector<12x12xf32>
    %239 = math.exp %238 : vector<12x12xf32>
    %cst_44 = arith.constant dense<0.000000e+00> : vector<12xf32>
    %240 = vector.multi_reduction <add>, %239, %cst_44 [1] : vector<12x12xf32> to vector<12xf32>
    %241 = vector.shape_cast %240 : vector<12xf32> to vector<12x1xf32>
    %242 = tpu.reciprocal %241 {approx = true} : vector<12x1xf32> -> vector<12x1xf32>
    %243 = vector.broadcast %242 : vector<12x1xf32> to vector<12x12xf32>
    %244 = arith.mulf %239, %243 : vector<12x12xf32>
    %245 = arith.truncf %244 : vector<12x12xf32> to vector<12x12xbf16>
    %246 = vector.extract_strided_slice %208 {offsets = [0, 16], sizes = [12, 16], strides = [1, 1]} : vector<12x64xf32> to vector<12x16xf32>
    %247 = arith.truncf %246 : vector<12x16xf32> to vector<12x16xbf16>
    %cst_45 = arith.constant dense<0.000000e+00> : vector<12x16xf32>
    %248 = tpu.matmul %245, %247, %cst_45 {dimension_numbers = #tpu.dot_dimension_numbers<[1], [0], [0], [1], [0, 0, 1, 1], [], []>} : vector<12x12xbf16>, vector<12x16xbf16>, vector<12x16xf32> -> vector<12x16xf32>
    %249 = vector.extract_strided_slice %206 {offsets = [0, 32], sizes = [12, 16], strides = [1, 1]} : vector<12x64xf32> to vector<12x16xf32>
    %250 = arith.truncf %249 : vector<12x16xf32> to vector<12x16xbf16>
    %251 = vector.extract_strided_slice %207 {offsets = [0, 32], sizes = [12, 16], strides = [1, 1]} : vector<12x64xf32> to vector<12x16xf32>
    %252 = arith.truncf %251 : vector<12x16xf32> to vector<12x16xbf16>
    "tpu.trace_start"() <{level = 10 : i32, message = "nd,md->nm"}> : () -> ()
    %cst_46 = arith.constant dense<0.000000e+00> : vector<12x12xf32>
    %253 = tpu.matmul %250, %252, %cst_46 {dimension_numbers = #tpu.dot_dimension_numbers<[1], [1], [0], [0], [0, 0, 1, 0], [], []>} : vector<12x16xbf16>, vector<12x16xbf16>, vector<12x12xf32> -> vector<12x12xf32>
    "tpu.trace_stop"() : () -> ()
    %254 = arith.addf %253, %169 : vector<12x12xf32>
    %cst_47 = arith.constant dense<0xFF800000> : vector<12xf32>
    %255 = vector.multi_reduction <maximumf>, %254, %cst_47 [1] : vector<12x12xf32> to vector<12xf32>
    %256 = vector.shape_cast %255 : vector<12xf32> to vector<12x1xf32>
    %257 = vector.broadcast %256 : vector<12x1xf32> to vector<12x12xf32>
    %258 = arith.subf %254, %257 : vector<12x12xf32>
    %259 = math.exp %258 : vector<12x12xf32>
    %cst_48 = arith.constant dense<0.000000e+00> : vector<12xf32>
    %260 = vector.multi_reduction <add>, %259, %cst_48 [1] : vector<12x12xf32> to vector<12xf32>
    %261 = vector.shape_cast %260 : vector<12xf32> to vector<12x1xf32>
    %262 = tpu.reciprocal %261 {approx = true} : vector<12x1xf32> -> vector<12x1xf32>
    %263 = vector.broadcast %262 : vector<12x1xf32> to vector<12x12xf32>
    %264 = arith.mulf %259, %263 : vector<12x12xf32>
    %265 = arith.truncf %264 : vector<12x12xf32> to vector<12x12xbf16>
    %266 = vector.extract_strided_slice %208 {offsets = [0, 32], sizes = [12, 16], strides = [1, 1]} : vector<12x64xf32> to vector<12x16xf32>
    %267 = arith.truncf %266 : vector<12x16xf32> to vector<12x16xbf16>
    %cst_49 = arith.constant dense<0.000000e+00> : vector<12x16xf32>
    %268 = tpu.matmul %265, %267, %cst_49 {dimension_numbers = #tpu.dot_dimension_numbers<[1], [0], [0], [1], [0, 0, 1, 1], [], []>} : vector<12x12xbf16>, vector<12x16xbf16>, vector<12x16xf32> -> vector<12x16xf32>
    %269 = vector.extract_strided_slice %206 {offsets = [0, 48], sizes = [12, 16], strides = [1, 1]} : vector<12x64xf32> to vector<12x16xf32>
    %270 = arith.truncf %269 : vector<12x16xf32> to vector<12x16xbf16>
    %271 = vector.extract_strided_slice %207 {offsets = [0, 48], sizes = [12, 16], strides = [1, 1]} : vector<12x64xf32> to vector<12x16xf32>
    %272 = arith.truncf %271 : vector<12x16xf32> to vector<12x16xbf16>
    "tpu.trace_start"() <{level = 10 : i32, message = "nd,md->nm"}> : () -> ()
    %cst_50 = arith.constant dense<0.000000e+00> : vector<12x12xf32>
    %273 = tpu.matmul %270, %272, %cst_50 {dimension_numbers = #tpu.dot_dimension_numbers<[1], [1], [0], [0], [0, 0, 1, 0], [], []>} : vector<12x16xbf16>, vector<12x16xbf16>, vector<12x12xf32> -> vector<12x12xf32>
    "tpu.trace_stop"() : () -> ()
    %274 = arith.addf %273, %169 : vector<12x12xf32>
    %cst_51 = arith.constant dense<0xFF800000> : vector<12xf32>
    %275 = vector.multi_reduction <maximumf>, %274, %cst_51 [1] : vector<12x12xf32> to vector<12xf32>
    %276 = vector.shape_cast %275 : vector<12xf32> to vector<12x1xf32>
    %277 = vector.broadcast %276 : vector<12x1xf32> to vector<12x12xf32>
    %278 = arith.subf %274, %277 : vector<12x12xf32>
    %279 = math.exp %278 : vector<12x12xf32>
    %cst_52 = arith.constant dense<0.000000e+00> : vector<12xf32>
    %280 = vector.multi_reduction <add>, %279, %cst_52 [1] : vector<12x12xf32> to vector<12xf32>
    %281 = vector.shape_cast %280 : vector<12xf32> to vector<12x1xf32>
    %282 = tpu.reciprocal %281 {approx = true} : vector<12x1xf32> -> vector<12x1xf32>
    %283 = vector.broadcast %282 : vector<12x1xf32> to vector<12x12xf32>
    %284 = arith.mulf %279, %283 : vector<12x12xf32>
    %285 = arith.truncf %284 : vector<12x12xf32> to vector<12x12xbf16>
    %286 = vector.extract_strided_slice %208 {offsets = [0, 48], sizes = [12, 16], strides = [1, 1]} : vector<12x64xf32> to vector<12x16xf32>
    %287 = arith.truncf %286 : vector<12x16xf32> to vector<12x16xbf16>
    %cst_53 = arith.constant dense<0.000000e+00> : vector<12x16xf32>
    %288 = tpu.matmul %285, %287, %cst_53 {dimension_numbers = #tpu.dot_dimension_numbers<[1], [0], [0], [1], [0, 0, 1, 1], [], []>} : vector<12x12xbf16>, vector<12x16xbf16>, vector<12x16xf32> -> vector<12x16xf32>
    %289 = tpu.concatenate %228, %248, %268, %288 in 1 : vector<12x16xf32>, vector<12x16xf32>, vector<12x16xf32>, vector<12x16xf32> -> vector<12x64xf32>
    %290 = arith.truncf %289 : vector<12x64xf32> to vector<12x64xbf16>
    %c0_54 = arith.constant 0 : index
    %c0_55 = arith.constant 0 : index
    %c0_56 = arith.constant 0 : index
    %291 = vector.load %arg11[%c0_54, %c0_55, %c0_56] : memref<2x64x64xbf16, #tpu.memory_space<vmem>>, vector<1x64x64xbf16>
    %292 = vector.shape_cast %291 : vector<1x64x64xbf16> to vector<64x64xbf16>
    %cst_57 = arith.constant dense<0.000000e+00> : vector<12x64xf32>
    %293 = tpu.matmul %290, %292, %cst_57 {dimension_numbers = #tpu.dot_dimension_numbers<[1], [0], [0], [1], [0, 0, 1, 1], [], []>} : vector<12x64xbf16>, vector<64x64xbf16>, vector<12x64xf32> -> vector<12x64xf32>
    %294 = arith.addf %168, %293 : vector<12x64xf32>
    %c0_58 = arith.constant 0 : index
    %c0_59 = arith.constant 0 : index
    %c0_60 = arith.constant 0 : index
    %295 = vector.load %arg12[%c0_58, %c0_59, %c0_60] : memref<2x1x64xf32, #tpu.memory_space<vmem>>, vector<1x1x64xf32>
    %296 = vector.shape_cast %295 : vector<1x1x64xf32> to vector<1x64xf32>
    %297 = vector.broadcast %296 : vector<1x64xf32> to vector<12x64xf32>
    %298 = arith.addf %294, %297 : vector<12x64xf32>
    %c0_61 = arith.constant 0 : index
    %c0_62 = arith.constant 0 : index
    %c0_63 = arith.constant 0 : index
    %299 = vector.load %arg13[%c0_61, %c0_62, %c0_63] : memref<2x1x64xf32, #tpu.memory_space<vmem>>, vector<1x1x64xf32>
    %300 = vector.shape_cast %299 : vector<1x1x64xf32> to vector<1x64xf32>
    %c0_64 = arith.constant 0 : index
    %c0_65 = arith.constant 0 : index
    %c0_66 = arith.constant 0 : index
    %301 = vector.load %arg14[%c0_64, %c0_65, %c0_66] : memref<2x1x64xf32, #tpu.memory_space<vmem>>, vector<1x1x64xf32>
    %302 = vector.shape_cast %301 : vector<1x1x64xf32> to vector<1x64xf32>
    %cst_67 = arith.constant dense<0.000000e+00> : vector<12xf32>
    %303 = vector.multi_reduction <add>, %298, %cst_67 [1] : vector<12x64xf32> to vector<12xf32>
    %304 = vector.shape_cast %303 : vector<12xf32> to vector<12x1xf32>
    %cst_68 = arith.constant 6.400000e+01 : f32
    %305 = vector.broadcast %cst_68 : f32 to vector<12x1xf32>
    %306 = arith.divf %304, %305 : vector<12x1xf32>
    %307 = vector.broadcast %306 : vector<12x1xf32> to vector<12x64xf32>
    %308 = arith.subf %298, %307 : vector<12x64xf32>
    %309 = arith.mulf %308, %308 : vector<12x64xf32>
    %cst_69 = arith.constant dense<0.000000e+00> : vector<12xf32>
    %310 = vector.multi_reduction <add>, %309, %cst_69 [1] : vector<12x64xf32> to vector<12xf32>
    %311 = vector.shape_cast %310 : vector<12xf32> to vector<12x1xf32>
    %cst_70 = arith.constant 6.400000e+01 : f32
    %312 = vector.broadcast %cst_70 : f32 to vector<12x1xf32>
    %313 = arith.divf %311, %312 : vector<12x1xf32>
    %314 = vector.broadcast %306 : vector<12x1xf32> to vector<12x64xf32>
    %315 = arith.subf %298, %314 : vector<12x64xf32>
    %cst_71 = arith.constant 9.99999997E-7 : f32
    %316 = vector.broadcast %cst_71 : f32 to vector<12x1xf32>
    %317 = arith.addf %313, %316 : vector<12x1xf32>
    %318 = math.rsqrt %317 : vector<12x1xf32>
    %319 = vector.broadcast %318 : vector<12x1xf32> to vector<12x64xf32>
    %320 = arith.mulf %315, %319 : vector<12x64xf32>
    %321 = vector.broadcast %300 : vector<1x64xf32> to vector<12x64xf32>
    %322 = arith.mulf %320, %321 : vector<12x64xf32>
    %323 = vector.broadcast %302 : vector<1x64xf32> to vector<12x64xf32>
    %324 = arith.addf %322, %323 : vector<12x64xf32>
    %325 = arith.truncf %324 : vector<12x64xf32> to vector<12x64xbf16>
    %c0_72 = arith.constant 0 : index
    %c0_73 = arith.constant 0 : index
    %c0_74 = arith.constant 0 : index
    %326 = vector.load %arg15[%c0_72, %c0_73, %c0_74] : memref<2x64x256xbf16, #tpu.memory_space<vmem>>, vector<1x64x256xbf16>
    %327 = vector.shape_cast %326 : vector<1x64x256xbf16> to vector<64x256xbf16>
    %cst_75 = arith.constant dense<0.000000e+00> : vector<12x256xf32>
    %328 = tpu.matmul %325, %327, %cst_75 {dimension_numbers = #tpu.dot_dimension_numbers<[1], [0], [0], [1], [0, 0, 1, 1], [], []>} : vector<12x64xbf16>, vector<64x256xbf16>, vector<12x256xf32> -> vector<12x256xf32>
    %c0_76 = arith.constant 0 : index
    %c0_77 = arith.constant 0 : index
    %c0_78 = arith.constant 0 : index
    %329 = vector.load %arg16[%c0_76, %c0_77, %c0_78] : memref<2x1x256xf32, #tpu.memory_space<vmem>>, vector<1x1x256xf32>
    %330 = vector.shape_cast %329 : vector<1x1x256xf32> to vector<1x256xf32>
    %331 = vector.broadcast %330 : vector<1x256xf32> to vector<12x256xf32>
    %332 = arith.addf %328, %331 : vector<12x256xf32>
    %333 = arith.mulf %332, %332 : vector<12x256xf32>
    %334 = arith.mulf %332, %333 : vector<12x256xf32>
    %cst_79 = arith.constant 4.471500e-02 : f32
    %335 = vector.broadcast %cst_79 : f32 to vector<12x256xf32>
    %336 = arith.mulf %335, %334 : vector<12x256xf32>
    %337 = arith.addf %332, %336 : vector<12x256xf32>
    %cst_80 = arith.constant 0.797884583 : f32
    %338 = vector.broadcast %cst_80 : f32 to vector<12x256xf32>
    %339 = arith.mulf %338, %337 : vector<12x256xf32>
    %340 = math.tanh %339 : vector<12x256xf32>
    %cst_81 = arith.constant 1.000000e+00 : f32
    %341 = vector.broadcast %cst_81 : f32 to vector<12x256xf32>
    %342 = arith.addf %341, %340 : vector<12x256xf32>
    %cst_82 = arith.constant 5.000000e-01 : f32
    %343 = vector.broadcast %cst_82 : f32 to vector<12x256xf32>
    %344 = arith.mulf %343, %342 : vector<12x256xf32>
    %345 = arith.mulf %332, %344 : vector<12x256xf32>
    %346 = arith.truncf %345 : vector<12x256xf32> to vector<12x256xbf16>
    %c0_83 = arith.constant 0 : index
    %c0_84 = arith.constant 0 : index
    %c0_85 = arith.constant 0 : index
    %347 = vector.load %arg17[%c0_83, %c0_84, %c0_85] : memref<2x256x64xbf16, #tpu.memory_space<vmem>>, vector<1x256x64xbf16>
    %348 = vector.shape_cast %347 : vector<1x256x64xbf16> to vector<256x64xbf16>
    %cst_86 = arith.constant dense<0.000000e+00> : vector<12x64xf32>
    %349 = tpu.matmul %346, %348, %cst_86 {dimension_numbers = #tpu.dot_dimension_numbers<[1], [0], [0], [1], [0, 0, 1, 1], [], []>} : vector<12x256xbf16>, vector<256x64xbf16>, vector<12x64xf32> -> vector<12x64xf32>
    %c0_87 = arith.constant 0 : index
    %c0_88 = arith.constant 0 : index
    %c0_89 = arith.constant 0 : index
    %350 = vector.load %arg18[%c0_87, %c0_88, %c0_89] : memref<2x1x64xf32, #tpu.memory_space<vmem>>, vector<1x1x64xf32>
    %351 = vector.shape_cast %350 : vector<1x1x64xf32> to vector<1x64xf32>
    %352 = vector.broadcast %351 : vector<1x64xf32> to vector<12x64xf32>
    %353 = arith.addf %349, %352 : vector<12x64xf32>
    %354 = arith.addf %298, %353 : vector<12x64xf32>
    %c1 = arith.constant 1 : index
    %c0_90 = arith.constant 0 : index
    %c0_91 = arith.constant 0 : index
    %355 = vector.load %arg7[%c1, %c0_90, %c0_91] : memref<2x1x64xf32, #tpu.memory_space<vmem>>, vector<1x1x64xf32>
    %356 = vector.shape_cast %355 : vector<1x1x64xf32> to vector<1x64xf32>
    %c1_92 = arith.constant 1 : index
    %c0_93 = arith.constant 0 : index
    %c0_94 = arith.constant 0 : index
    %357 = vector.load %arg8[%c1_92, %c0_93, %c0_94] : memref<2x1x64xf32, #tpu.memory_space<vmem>>, vector<1x1x64xf32>
    %358 = vector.shape_cast %357 : vector<1x1x64xf32> to vector<1x64xf32>
    %cst_95 = arith.constant dense<0.000000e+00> : vector<12xf32>
    %359 = vector.multi_reduction <add>, %354, %cst_95 [1] : vector<12x64xf32> to vector<12xf32>
    %360 = vector.shape_cast %359 : vector<12xf32> to vector<12x1xf32>
    %cst_96 = arith.constant 6.400000e+01 : f32
    %361 = vector.broadcast %cst_96 : f32 to vector<12x1xf32>
    %362 = arith.divf %360, %361 : vector<12x1xf32>
    %363 = vector.broadcast %362 : vector<12x1xf32> to vector<12x64xf32>
    %364 = arith.subf %354, %363 : vector<12x64xf32>
    %365 = arith.mulf %364, %364 : vector<12x64xf32>
    %cst_97 = arith.constant dense<0.000000e+00> : vector<12xf32>
    %366 = vector.multi_reduction <add>, %365, %cst_97 [1] : vector<12x64xf32> to vector<12xf32>
    %367 = vector.shape_cast %366 : vector<12xf32> to vector<12x1xf32>
    %cst_98 = arith.constant 6.400000e+01 : f32
    %368 = vector.broadcast %cst_98 : f32 to vector<12x1xf32>
    %369 = arith.divf %367, %368 : vector<12x1xf32>
    %370 = vector.broadcast %362 : vector<12x1xf32> to vector<12x64xf32>
    %371 = arith.subf %354, %370 : vector<12x64xf32>
    %cst_99 = arith.constant 9.99999997E-7 : f32
    %372 = vector.broadcast %cst_99 : f32 to vector<12x1xf32>
    %373 = arith.addf %369, %372 : vector<12x1xf32>
    %374 = math.rsqrt %373 : vector<12x1xf32>
    %375 = vector.broadcast %374 : vector<12x1xf32> to vector<12x64xf32>
    %376 = arith.mulf %371, %375 : vector<12x64xf32>
    %377 = vector.broadcast %356 : vector<1x64xf32> to vector<12x64xf32>
    %378 = arith.mulf %376, %377 : vector<12x64xf32>
    %379 = vector.broadcast %358 : vector<1x64xf32> to vector<12x64xf32>
    %380 = arith.addf %378, %379 : vector<12x64xf32>
    %381 = arith.truncf %380 : vector<12x64xf32> to vector<12x64xbf16>
    %c1_100 = arith.constant 1 : index
    %c0_101 = arith.constant 0 : index
    %c0_102 = arith.constant 0 : index
    %382 = vector.load %arg9[%c1_100, %c0_101, %c0_102] : memref<2x64x192xbf16, #tpu.memory_space<vmem>>, vector<1x64x192xbf16>
    %383 = vector.shape_cast %382 : vector<1x64x192xbf16> to vector<64x192xbf16>
    %cst_103 = arith.constant dense<0.000000e+00> : vector<12x192xf32>
    %384 = tpu.matmul %381, %383, %cst_103 {dimension_numbers = #tpu.dot_dimension_numbers<[1], [0], [0], [1], [0, 0, 1, 1], [], []>} : vector<12x64xbf16>, vector<64x192xbf16>, vector<12x192xf32> -> vector<12x192xf32>
    %c1_104 = arith.constant 1 : index
    %c0_105 = arith.constant 0 : index
    %c0_106 = arith.constant 0 : index
    %385 = vector.load %arg10[%c1_104, %c0_105, %c0_106] : memref<2x1x192xf32, #tpu.memory_space<vmem>>, vector<1x1x192xf32>
    %386 = vector.shape_cast %385 : vector<1x1x192xf32> to vector<1x192xf32>
    %387 = vector.broadcast %386 : vector<1x192xf32> to vector<12x192xf32>
    %388 = arith.addf %384, %387 : vector<12x192xf32>
    %389 = vector.extract_strided_slice %388 {offsets = [0, 0], sizes = [12, 64], strides = [1, 1]} : vector<12x192xf32> to vector<12x64xf32>
    %cst_107 = arith.constant 2.500000e-01 : f32
    %390 = vector.broadcast %cst_107 : f32 to vector<12x64xf32>
    %391 = arith.mulf %389, %390 : vector<12x64xf32>
    %392 = vector.extract_strided_slice %388 {offsets = [0, 64], sizes = [12, 64], strides = [1, 1]} : vector<12x192xf32> to vector<12x64xf32>
    %393 = vector.extract_strided_slice %388 {offsets = [0, 128], sizes = [12, 64], strides = [1, 1]} : vector<12x192xf32> to vector<12x64xf32>
    %394 = vector.extract_strided_slice %391 {offsets = [0, 0], sizes = [12, 16], strides = [1, 1]} : vector<12x64xf32> to vector<12x16xf32>
    %395 = arith.truncf %394 : vector<12x16xf32> to vector<12x16xbf16>
    %396 = vector.extract_strided_slice %392 {offsets = [0, 0], sizes = [12, 16], strides = [1, 1]} : vector<12x64xf32> to vector<12x16xf32>
    %397 = arith.truncf %396 : vector<12x16xf32> to vector<12x16xbf16>
    "tpu.trace_start"() <{level = 10 : i32, message = "nd,md->nm"}> : () -> ()
    %cst_108 = arith.constant dense<0.000000e+00> : vector<12x12xf32>
    %398 = tpu.matmul %395, %397, %cst_108 {dimension_numbers = #tpu.dot_dimension_numbers<[1], [1], [0], [0], [0, 0, 1, 0], [], []>} : vector<12x16xbf16>, vector<12x16xbf16>, vector<12x12xf32> -> vector<12x12xf32>
    "tpu.trace_stop"() : () -> ()
    %399 = arith.addf %398, %169 : vector<12x12xf32>
    %cst_109 = arith.constant dense<0xFF800000> : vector<12xf32>
    %400 = vector.multi_reduction <maximumf>, %399, %cst_109 [1] : vector<12x12xf32> to vector<12xf32>
    %401 = vector.shape_cast %400 : vector<12xf32> to vector<12x1xf32>
    %402 = vector.broadcast %401 : vector<12x1xf32> to vector<12x12xf32>
    %403 = arith.subf %399, %402 : vector<12x12xf32>
    %404 = math.exp %403 : vector<12x12xf32>
    %cst_110 = arith.constant dense<0.000000e+00> : vector<12xf32>
    %405 = vector.multi_reduction <add>, %404, %cst_110 [1] : vector<12x12xf32> to vector<12xf32>
    %406 = vector.shape_cast %405 : vector<12xf32> to vector<12x1xf32>
    %407 = tpu.reciprocal %406 {approx = true} : vector<12x1xf32> -> vector<12x1xf32>
    %408 = vector.broadcast %407 : vector<12x1xf32> to vector<12x12xf32>
    %409 = arith.mulf %404, %408 : vector<12x12xf32>
    %410 = arith.truncf %409 : vector<12x12xf32> to vector<12x12xbf16>
    %411 = vector.extract_strided_slice %393 {offsets = [0, 0], sizes = [12, 16], strides = [1, 1]} : vector<12x64xf32> to vector<12x16xf32>
    %412 = arith.truncf %411 : vector<12x16xf32> to vector<12x16xbf16>
    %cst_111 = arith.constant dense<0.000000e+00> : vector<12x16xf32>
    %413 = tpu.matmul %410, %412, %cst_111 {dimension_numbers = #tpu.dot_dimension_numbers<[1], [0], [0], [1], [0, 0, 1, 1], [], []>} : vector<12x12xbf16>, vector<12x16xbf16>, vector<12x16xf32> -> vector<12x16xf32>
    %414 = vector.extract_strided_slice %391 {offsets = [0, 16], sizes = [12, 16], strides = [1, 1]} : vector<12x64xf32> to vector<12x16xf32>
    %415 = arith.truncf %414 : vector<12x16xf32> to vector<12x16xbf16>
    %416 = vector.extract_strided_slice %392 {offsets = [0, 16], sizes = [12, 16], strides = [1, 1]} : vector<12x64xf32> to vector<12x16xf32>
    %417 = arith.truncf %416 : vector<12x16xf32> to vector<12x16xbf16>
    "tpu.trace_start"() <{level = 10 : i32, message = "nd,md->nm"}> : () -> ()
    %cst_112 = arith.constant dense<0.000000e+00> : vector<12x12xf32>
    %418 = tpu.matmul %415, %417, %cst_112 {dimension_numbers = #tpu.dot_dimension_numbers<[1], [1], [0], [0], [0, 0, 1, 0], [], []>} : vector<12x16xbf16>, vector<12x16xbf16>, vector<12x12xf32> -> vector<12x12xf32>
    "tpu.trace_stop"() : () -> ()
    %419 = arith.addf %418, %169 : vector<12x12xf32>
    %cst_113 = arith.constant dense<0xFF800000> : vector<12xf32>
    %420 = vector.multi_reduction <maximumf>, %419, %cst_113 [1] : vector<12x12xf32> to vector<12xf32>
    %421 = vector.shape_cast %420 : vector<12xf32> to vector<12x1xf32>
    %422 = vector.broadcast %421 : vector<12x1xf32> to vector<12x12xf32>
    %423 = arith.subf %419, %422 : vector<12x12xf32>
    %424 = math.exp %423 : vector<12x12xf32>
    %cst_114 = arith.constant dense<0.000000e+00> : vector<12xf32>
    %425 = vector.multi_reduction <add>, %424, %cst_114 [1] : vector<12x12xf32> to vector<12xf32>
    %426 = vector.shape_cast %425 : vector<12xf32> to vector<12x1xf32>
    %427 = tpu.reciprocal %426 {approx = true} : vector<12x1xf32> -> vector<12x1xf32>
    %428 = vector.broadcast %427 : vector<12x1xf32> to vector<12x12xf32>
    %429 = arith.mulf %424, %428 : vector<12x12xf32>
    %430 = arith.truncf %429 : vector<12x12xf32> to vector<12x12xbf16>
    %431 = vector.extract_strided_slice %393 {offsets = [0, 16], sizes = [12, 16], strides = [1, 1]} : vector<12x64xf32> to vector<12x16xf32>
    %432 = arith.truncf %431 : vector<12x16xf32> to vector<12x16xbf16>
    %cst_115 = arith.constant dense<0.000000e+00> : vector<12x16xf32>
    %433 = tpu.matmul %430, %432, %cst_115 {dimension_numbers = #tpu.dot_dimension_numbers<[1], [0], [0], [1], [0, 0, 1, 1], [], []>} : vector<12x12xbf16>, vector<12x16xbf16>, vector<12x16xf32> -> vector<12x16xf32>
    %434 = vector.extract_strided_slice %391 {offsets = [0, 32], sizes = [12, 16], strides = [1, 1]} : vector<12x64xf32> to vector<12x16xf32>
    %435 = arith.truncf %434 : vector<12x16xf32> to vector<12x16xbf16>
    %436 = vector.extract_strided_slice %392 {offsets = [0, 32], sizes = [12, 16], strides = [1, 1]} : vector<12x64xf32> to vector<12x16xf32>
    %437 = arith.truncf %436 : vector<12x16xf32> to vector<12x16xbf16>
    "tpu.trace_start"() <{level = 10 : i32, message = "nd,md->nm"}> : () -> ()
    %cst_116 = arith.constant dense<0.000000e+00> : vector<12x12xf32>
    %438 = tpu.matmul %435, %437, %cst_116 {dimension_numbers = #tpu.dot_dimension_numbers<[1], [1], [0], [0], [0, 0, 1, 0], [], []>} : vector<12x16xbf16>, vector<12x16xbf16>, vector<12x12xf32> -> vector<12x12xf32>
    "tpu.trace_stop"() : () -> ()
    %439 = arith.addf %438, %169 : vector<12x12xf32>
    %cst_117 = arith.constant dense<0xFF800000> : vector<12xf32>
    %440 = vector.multi_reduction <maximumf>, %439, %cst_117 [1] : vector<12x12xf32> to vector<12xf32>
    %441 = vector.shape_cast %440 : vector<12xf32> to vector<12x1xf32>
    %442 = vector.broadcast %441 : vector<12x1xf32> to vector<12x12xf32>
    %443 = arith.subf %439, %442 : vector<12x12xf32>
    %444 = math.exp %443 : vector<12x12xf32>
    %cst_118 = arith.constant dense<0.000000e+00> : vector<12xf32>
    %445 = vector.multi_reduction <add>, %444, %cst_118 [1] : vector<12x12xf32> to vector<12xf32>
    %446 = vector.shape_cast %445 : vector<12xf32> to vector<12x1xf32>
    %447 = tpu.reciprocal %446 {approx = true} : vector<12x1xf32> -> vector<12x1xf32>
    %448 = vector.broadcast %447 : vector<12x1xf32> to vector<12x12xf32>
    %449 = arith.mulf %444, %448 : vector<12x12xf32>
    %450 = arith.truncf %449 : vector<12x12xf32> to vector<12x12xbf16>
    %451 = vector.extract_strided_slice %393 {offsets = [0, 32], sizes = [12, 16], strides = [1, 1]} : vector<12x64xf32> to vector<12x16xf32>
    %452 = arith.truncf %451 : vector<12x16xf32> to vector<12x16xbf16>
    %cst_119 = arith.constant dense<0.000000e+00> : vector<12x16xf32>
    %453 = tpu.matmul %450, %452, %cst_119 {dimension_numbers = #tpu.dot_dimension_numbers<[1], [0], [0], [1], [0, 0, 1, 1], [], []>} : vector<12x12xbf16>, vector<12x16xbf16>, vector<12x16xf32> -> vector<12x16xf32>
    %454 = vector.extract_strided_slice %391 {offsets = [0, 48], sizes = [12, 16], strides = [1, 1]} : vector<12x64xf32> to vector<12x16xf32>
    %455 = arith.truncf %454 : vector<12x16xf32> to vector<12x16xbf16>
    %456 = vector.extract_strided_slice %392 {offsets = [0, 48], sizes = [12, 16], strides = [1, 1]} : vector<12x64xf32> to vector<12x16xf32>
    %457 = arith.truncf %456 : vector<12x16xf32> to vector<12x16xbf16>
    "tpu.trace_start"() <{level = 10 : i32, message = "nd,md->nm"}> : () -> ()
    %cst_120 = arith.constant dense<0.000000e+00> : vector<12x12xf32>
    %458 = tpu.matmul %455, %457, %cst_120 {dimension_numbers = #tpu.dot_dimension_numbers<[1], [1], [0], [0], [0, 0, 1, 0], [], []>} : vector<12x16xbf16>, vector<12x16xbf16>, vector<12x12xf32> -> vector<12x12xf32>
    "tpu.trace_stop"() : () -> ()
    %459 = arith.addf %458, %169 : vector<12x12xf32>
    %cst_121 = arith.constant dense<0xFF800000> : vector<12xf32>
    %460 = vector.multi_reduction <maximumf>, %459, %cst_121 [1] : vector<12x12xf32> to vector<12xf32>
    %461 = vector.shape_cast %460 : vector<12xf32> to vector<12x1xf32>
    %462 = vector.broadcast %461 : vector<12x1xf32> to vector<12x12xf32>
    %463 = arith.subf %459, %462 : vector<12x12xf32>
    %464 = math.exp %463 : vector<12x12xf32>
    %cst_122 = arith.constant dense<0.000000e+00> : vector<12xf32>
    %465 = vector.multi_reduction <add>, %464, %cst_122 [1] : vector<12x12xf32> to vector<12xf32>
    %466 = vector.shape_cast %465 : vector<12xf32> to vector<12x1xf32>
    %467 = tpu.reciprocal %466 {approx = true} : vector<12x1xf32> -> vector<12x1xf32>
    %468 = vector.broadcast %467 : vector<12x1xf32> to vector<12x12xf32>
    %469 = arith.mulf %464, %468 : vector<12x12xf32>
    %470 = arith.truncf %469 : vector<12x12xf32> to vector<12x12xbf16>
    %471 = vector.extract_strided_slice %393 {offsets = [0, 48], sizes = [12, 16], strides = [1, 1]} : vector<12x64xf32> to vector<12x16xf32>
    %472 = arith.truncf %471 : vector<12x16xf32> to vector<12x16xbf16>
    %cst_123 = arith.constant dense<0.000000e+00> : vector<12x16xf32>
    %473 = tpu.matmul %470, %472, %cst_123 {dimension_numbers = #tpu.dot_dimension_numbers<[1], [0], [0], [1], [0, 0, 1, 1], [], []>} : vector<12x12xbf16>, vector<12x16xbf16>, vector<12x16xf32> -> vector<12x16xf32>
    %474 = tpu.concatenate %413, %433, %453, %473 in 1 : vector<12x16xf32>, vector<12x16xf32>, vector<12x16xf32>, vector<12x16xf32> -> vector<12x64xf32>
    %475 = arith.truncf %474 : vector<12x64xf32> to vector<12x64xbf16>
    %c1_124 = arith.constant 1 : index
    %c0_125 = arith.constant 0 : index
    %c0_126 = arith.constant 0 : index
    %476 = vector.load %arg11[%c1_124, %c0_125, %c0_126] : memref<2x64x64xbf16, #tpu.memory_space<vmem>>, vector<1x64x64xbf16>
    %477 = vector.shape_cast %476 : vector<1x64x64xbf16> to vector<64x64xbf16>
    %cst_127 = arith.constant dense<0.000000e+00> : vector<12x64xf32>
    %478 = tpu.matmul %475, %477, %cst_127 {dimension_numbers = #tpu.dot_dimension_numbers<[1], [0], [0], [1], [0, 0, 1, 1], [], []>} : vector<12x64xbf16>, vector<64x64xbf16>, vector<12x64xf32> -> vector<12x64xf32>
    %479 = arith.addf %354, %478 : vector<12x64xf32>
    %c1_128 = arith.constant 1 : index
    %c0_129 = arith.constant 0 : index
    %c0_130 = arith.constant 0 : index
    %480 = vector.load %arg12[%c1_128, %c0_129, %c0_130] : memref<2x1x64xf32, #tpu.memory_space<vmem>>, vector<1x1x64xf32>
    %481 = vector.shape_cast %480 : vector<1x1x64xf32> to vector<1x64xf32>
    %482 = vector.broadcast %481 : vector<1x64xf32> to vector<12x64xf32>
    %483 = arith.addf %479, %482 : vector<12x64xf32>
    %c1_131 = arith.constant 1 : index
    %c0_132 = arith.constant 0 : index
    %c0_133 = arith.constant 0 : index
    %484 = vector.load %arg13[%c1_131, %c0_132, %c0_133] : memref<2x1x64xf32, #tpu.memory_space<vmem>>, vector<1x1x64xf32>
    %485 = vector.shape_cast %484 : vector<1x1x64xf32> to vector<1x64xf32>
    %c1_134 = arith.constant 1 : index
    %c0_135 = arith.constant 0 : index
    %c0_136 = arith.constant 0 : index
    %486 = vector.load %arg14[%c1_134, %c0_135, %c0_136] : memref<2x1x64xf32, #tpu.memory_space<vmem>>, vector<1x1x64xf32>
    %487 = vector.shape_cast %486 : vector<1x1x64xf32> to vector<1x64xf32>
    %cst_137 = arith.constant dense<0.000000e+00> : vector<12xf32>
    %488 = vector.multi_reduction <add>, %483, %cst_137 [1] : vector<12x64xf32> to vector<12xf32>
    %489 = vector.shape_cast %488 : vector<12xf32> to vector<12x1xf32>
    %cst_138 = arith.constant 6.400000e+01 : f32
    %490 = vector.broadcast %cst_138 : f32 to vector<12x1xf32>
    %491 = arith.divf %489, %490 : vector<12x1xf32>
    %492 = vector.broadcast %491 : vector<12x1xf32> to vector<12x64xf32>
    %493 = arith.subf %483, %492 : vector<12x64xf32>
    %494 = arith.mulf %493, %493 : vector<12x64xf32>
    %cst_139 = arith.constant dense<0.000000e+00> : vector<12xf32>
    %495 = vector.multi_reduction <add>, %494, %cst_139 [1] : vector<12x64xf32> to vector<12xf32>
    %496 = vector.shape_cast %495 : vector<12xf32> to vector<12x1xf32>
    %cst_140 = arith.constant 6.400000e+01 : f32
    %497 = vector.broadcast %cst_140 : f32 to vector<12x1xf32>
    %498 = arith.divf %496, %497 : vector<12x1xf32>
    %499 = vector.broadcast %491 : vector<12x1xf32> to vector<12x64xf32>
    %500 = arith.subf %483, %499 : vector<12x64xf32>
    %cst_141 = arith.constant 9.99999997E-7 : f32
    %501 = vector.broadcast %cst_141 : f32 to vector<12x1xf32>
    %502 = arith.addf %498, %501 : vector<12x1xf32>
    %503 = math.rsqrt %502 : vector<12x1xf32>
    %504 = vector.broadcast %503 : vector<12x1xf32> to vector<12x64xf32>
    %505 = arith.mulf %500, %504 : vector<12x64xf32>
    %506 = vector.broadcast %485 : vector<1x64xf32> to vector<12x64xf32>
    %507 = arith.mulf %505, %506 : vector<12x64xf32>
    %508 = vector.broadcast %487 : vector<1x64xf32> to vector<12x64xf32>
    %509 = arith.addf %507, %508 : vector<12x64xf32>
    %510 = arith.truncf %509 : vector<12x64xf32> to vector<12x64xbf16>
    %c1_142 = arith.constant 1 : index
    %c0_143 = arith.constant 0 : index
    %c0_144 = arith.constant 0 : index
    %511 = vector.load %arg15[%c1_142, %c0_143, %c0_144] : memref<2x64x256xbf16, #tpu.memory_space<vmem>>, vector<1x64x256xbf16>
    %512 = vector.shape_cast %511 : vector<1x64x256xbf16> to vector<64x256xbf16>
    %cst_145 = arith.constant dense<0.000000e+00> : vector<12x256xf32>
    %513 = tpu.matmul %510, %512, %cst_145 {dimension_numbers = #tpu.dot_dimension_numbers<[1], [0], [0], [1], [0, 0, 1, 1], [], []>} : vector<12x64xbf16>, vector<64x256xbf16>, vector<12x256xf32> -> vector<12x256xf32>
    %c1_146 = arith.constant 1 : index
    %c0_147 = arith.constant 0 : index
    %c0_148 = arith.constant 0 : index
    %514 = vector.load %arg16[%c1_146, %c0_147, %c0_148] : memref<2x1x256xf32, #tpu.memory_space<vmem>>, vector<1x1x256xf32>
    %515 = vector.shape_cast %514 : vector<1x1x256xf32> to vector<1x256xf32>
    %516 = vector.broadcast %515 : vector<1x256xf32> to vector<12x256xf32>
    %517 = arith.addf %513, %516 : vector<12x256xf32>
    %518 = arith.mulf %517, %517 : vector<12x256xf32>
    %519 = arith.mulf %517, %518 : vector<12x256xf32>
    %cst_149 = arith.constant 4.471500e-02 : f32
    %520 = vector.broadcast %cst_149 : f32 to vector<12x256xf32>
    %521 = arith.mulf %520, %519 : vector<12x256xf32>
    %522 = arith.addf %517, %521 : vector<12x256xf32>
    %cst_150 = arith.constant 0.797884583 : f32
    %523 = vector.broadcast %cst_150 : f32 to vector<12x256xf32>
    %524 = arith.mulf %523, %522 : vector<12x256xf32>
    %525 = math.tanh %524 : vector<12x256xf32>
    %cst_151 = arith.constant 1.000000e+00 : f32
    %526 = vector.broadcast %cst_151 : f32 to vector<12x256xf32>
    %527 = arith.addf %526, %525 : vector<12x256xf32>
    %cst_152 = arith.constant 5.000000e-01 : f32
    %528 = vector.broadcast %cst_152 : f32 to vector<12x256xf32>
    %529 = arith.mulf %528, %527 : vector<12x256xf32>
    %530 = arith.mulf %517, %529 : vector<12x256xf32>
    %531 = arith.truncf %530 : vector<12x256xf32> to vector<12x256xbf16>
    %c1_153 = arith.constant 1 : index
    %c0_154 = arith.constant 0 : index
    %c0_155 = arith.constant 0 : index
    %532 = vector.load %arg17[%c1_153, %c0_154, %c0_155] : memref<2x256x64xbf16, #tpu.memory_space<vmem>>, vector<1x256x64xbf16>
    %533 = vector.shape_cast %532 : vector<1x256x64xbf16> to vector<256x64xbf16>
    %cst_156 = arith.constant dense<0.000000e+00> : vector<12x64xf32>
    %534 = tpu.matmul %531, %533, %cst_156 {dimension_numbers = #tpu.dot_dimension_numbers<[1], [0], [0], [1], [0, 0, 1, 1], [], []>} : vector<12x256xbf16>, vector<256x64xbf16>, vector<12x64xf32> -> vector<12x64xf32>
    %c1_157 = arith.constant 1 : index
    %c0_158 = arith.constant 0 : index
    %c0_159 = arith.constant 0 : index
    %535 = vector.load %arg18[%c1_157, %c0_158, %c0_159] : memref<2x1x64xf32, #tpu.memory_space<vmem>>, vector<1x1x64xf32>
    %536 = vector.shape_cast %535 : vector<1x1x64xf32> to vector<1x64xf32>
    %537 = vector.broadcast %536 : vector<1x64xf32> to vector<12x64xf32>
    %538 = arith.addf %534, %537 : vector<12x64xf32>
    %539 = arith.addf %483, %538 : vector<12x64xf32>
    %c0_160 = arith.constant 0 : index
    %c0_161 = arith.constant 0 : index
    %540 = vector.load %arg19[%c0_160, %c0_161] : memref<1x64xf32, #tpu.memory_space<vmem>>, vector<1x64xf32>
    %c0_162 = arith.constant 0 : index
    %c0_163 = arith.constant 0 : index
    %541 = vector.load %arg20[%c0_162, %c0_163] : memref<1x64xf32, #tpu.memory_space<vmem>>, vector<1x64xf32>
    %cst_164 = arith.constant dense<0.000000e+00> : vector<12xf32>
    %542 = vector.multi_reduction <add>, %539, %cst_164 [1] : vector<12x64xf32> to vector<12xf32>
    %543 = vector.shape_cast %542 : vector<12xf32> to vector<12x1xf32>
    %cst_165 = arith.constant 6.400000e+01 : f32
    %544 = vector.broadcast %cst_165 : f32 to vector<12x1xf32>
    %545 = arith.divf %543, %544 : vector<12x1xf32>
    %546 = vector.broadcast %545 : vector<12x1xf32> to vector<12x64xf32>
    %547 = arith.subf %539, %546 : vector<12x64xf32>
    %548 = arith.mulf %547, %547 : vector<12x64xf32>
    %cst_166 = arith.constant dense<0.000000e+00> : vector<12xf32>
    %549 = vector.multi_reduction <add>, %548, %cst_166 [1] : vector<12x64xf32> to vector<12xf32>
    %550 = vector.shape_cast %549 : vector<12xf32> to vector<12x1xf32>
    %cst_167 = arith.constant 6.400000e+01 : f32
    %551 = vector.broadcast %cst_167 : f32 to vector<12x1xf32>
    %552 = arith.divf %550, %551 : vector<12x1xf32>
    %553 = vector.broadcast %545 : vector<12x1xf32> to vector<12x64xf32>
    %554 = arith.subf %539, %553 : vector<12x64xf32>
    %cst_168 = arith.constant 9.99999997E-7 : f32
    %555 = vector.broadcast %cst_168 : f32 to vector<12x1xf32>
    %556 = arith.addf %552, %555 : vector<12x1xf32>
    %557 = math.rsqrt %556 : vector<12x1xf32>
    %558 = vector.broadcast %557 : vector<12x1xf32> to vector<12x64xf32>
    %559 = arith.mulf %554, %558 : vector<12x64xf32>
    %560 = vector.broadcast %540 : vector<1x64xf32> to vector<12x64xf32>
    %561 = arith.mulf %559, %560 : vector<12x64xf32>
    %562 = vector.broadcast %541 : vector<1x64xf32> to vector<12x64xf32>
    %563 = arith.addf %561, %562 : vector<12x64xf32>
    %564 = vector.extract_strided_slice %563 {offsets = [0, 0], sizes = [1, 64], strides = [1, 1]} : vector<12x64xf32> to vector<1x64xf32>
    %565 = vector.extract_strided_slice %563 {offsets = [6, 0], sizes = [1, 64], strides = [1, 1]} : vector<12x64xf32> to vector<1x64xf32>
    %566 = tpu.concatenate %564, %565 in 0 : vector<1x64xf32>, vector<1x64xf32> -> vector<2x64xf32>
    %567 = vector.extract_strided_slice %563 {offsets = [1, 0], sizes = [1, 64], strides = [1, 1]} : vector<12x64xf32> to vector<1x64xf32>
    %568 = vector.extract_strided_slice %563 {offsets = [7, 0], sizes = [1, 64], strides = [1, 1]} : vector<12x64xf32> to vector<1x64xf32>
    %569 = tpu.concatenate %567, %568 in 0 : vector<1x64xf32>, vector<1x64xf32> -> vector<2x64xf32>
    %570 = arith.addf %566, %569 : vector<2x64xf32>
    %cst_169 = arith.constant 5.000000e-01 : f32
    %571 = vector.broadcast %cst_169 : f32 to vector<2x64xf32>
    %572 = arith.mulf %571, %570 : vector<2x64xf32>
    %c0_170 = arith.constant 0 : index
    %c0_171 = arith.constant 0 : index
    %573 = vector.load %arg21[%c0_170, %c0_171] : memref<2x64xf32, #tpu.memory_space<vmem>>, vector<2x64xf32>
    tpu.vector_store %arg21[%c0_170, %c0_171], %572 {strides = array<i32>} : memref<2x64xf32, #tpu.memory_space<vmem>>, vector<2x64xf32>,
    return
  }
  func.func @transform_0(%arg0: i32) -> (i32, i32) {
    %c0_i32 = arith.constant 0 : i32
    %c0_i32_0 = arith.constant 0 : i32
    %c0_i32_1 = arith.constant 0 : i32
    return %c0_i32, %c0_i32_0 : i32, i32
  }
  func.func @transform_1(%arg0: i32) -> (i32, i32) {
    %c0_i32 = arith.constant 0 : i32
    %c0_i32_0 = arith.constant 0 : i32
    %c0_i32_1 = arith.constant 0 : i32
    return %c0_i32, %c0_i32_0 : i32, i32
  }
  func.func @transform_2(%arg0: i32) -> (i32, i32) {
    %c0_i32 = arith.constant 0 : i32
    %c0_i32_0 = arith.constant 0 : i32
    %c0_i32_1 = arith.constant 0 : i32
    return %c0_i32, %c0_i32_0 : i32, i32
  }
  func.func @transform_3(%arg0: i32) -> (i32, i32) {
    %c0_i32 = arith.constant 0 : i32
    %c0_i32_0 = arith.constant 0 : i32
    %c0_i32_1 = arith.constant 0 : i32
    return %c0_i32, %c0_i32_0 : i32, i32
  }
  func.func @transform_4(%arg0: i32) -> (i32, i32) {
    %c0_i32 = arith.constant 0 : i32
    %c0_i32_0 = arith.constant 0 : i32
    %c0_i32_1 = arith.constant 0 : i32
    return %c0_i32, %c0_i32_0 : i32, i32
  }
  func.func @transform_5(%arg0: i32) -> (i32, i32) {
    %c0_i32 = arith.constant 0 : i32
    %c0_i32_0 = arith.constant 0 : i32
    %c0_i32_1 = arith.constant 0 : i32
    return %c0_i32, %c0_i32_0 : i32, i32
  }
  func.func @transform_6(%arg0: i32) -> (i32, i32, i32) {
    %c0_i32 = arith.constant 0 : i32
    %c0_i32_0 = arith.constant 0 : i32
    %c0_i32_1 = arith.constant 0 : i32
    %c0_i32_2 = arith.constant 0 : i32
    return %c0_i32, %c0_i32_0, %c0_i32_1 : i32, i32, i32
  }
  func.func @transform_7(%arg0: i32) -> (i32, i32, i32) {
    %c0_i32 = arith.constant 0 : i32
    %c0_i32_0 = arith.constant 0 : i32
    %c0_i32_1 = arith.constant 0 : i32
    %c0_i32_2 = arith.constant 0 : i32
    return %c0_i32, %c0_i32_0, %c0_i32_1 : i32, i32, i32
  }
  func.func @transform_8(%arg0: i32) -> (i32, i32, i32) {
    %c0_i32 = arith.constant 0 : i32
    %c0_i32_0 = arith.constant 0 : i32
    %c0_i32_1 = arith.constant 0 : i32
    %c0_i32_2 = arith.constant 0 : i32
    return %c0_i32, %c0_i32_0, %c0_i32_1 : i32, i32, i32
  }
  func.func @transform_9(%arg0: i32) -> (i32, i32, i32) {
    %c0_i32 = arith.constant 0 : i32
    %c0_i32_0 = arith.constant 0 : i32
    %c0_i32_1 = arith.constant 0 : i32
    %c0_i32_2 = arith.constant 0 : i32
    return %c0_i32, %c0_i32_0, %c0_i32_1 : i32, i32, i32
  }
  func.func @transform_10(%arg0: i32) -> (i32, i32, i32) {
    %c0_i32 = arith.constant 0 : i32
    %c0_i32_0 = arith.constant 0 : i32
    %c0_i32_1 = arith.constant 0 : i32
    %c0_i32_2 = arith.constant 0 : i32
    return %c0_i32, %c0_i32_0, %c0_i32_1 : i32, i32, i32
  }
  func.func @transform_11(%arg0: i32) -> (i32, i32, i32) {
    %c0_i32 = arith.constant 0 : i32
    %c0_i32_0 = arith.constant 0 : i32
    %c0_i32_1 = arith.constant 0 : i32
    %c0_i32_2 = arith.constant 0 : i32
    return %c0_i32, %c0_i32_0, %c0_i32_1 : i32, i32, i32
  }
  func.func @transform_12(%arg0: i32) -> (i32, i32, i32) {
    %c0_i32 = arith.constant 0 : i32
    %c0_i32_0 = arith.constant 0 : i32
    %c0_i32_1 = arith.constant 0 : i32
    %c0_i32_2 = arith.constant 0 : i32
    return %c0_i32, %c0_i32_0, %c0_i32_1 : i32, i32, i32
  }
  func.func @transform_13(%arg0: i32) -> (i32, i32, i32) {
    %c0_i32 = arith.constant 0 : i32
    %c0_i32_0 = arith.constant 0 : i32
    %c0_i32_1 = arith.constant 0 : i32
    %c0_i32_2 = arith.constant 0 : i32
    return %c0_i32, %c0_i32_0, %c0_i32_1 : i32, i32, i32
  }
  func.func @transform_14(%arg0: i32) -> (i32, i32, i32) {
    %c0_i32 = arith.constant 0 : i32
    %c0_i32_0 = arith.constant 0 : i32
    %c0_i32_1 = arith.constant 0 : i32
    %c0_i32_2 = arith.constant 0 : i32
    return %c0_i32, %c0_i32_0, %c0_i32_1 : i32, i32, i32
  }
  func.func @transform_15(%arg0: i32) -> (i32, i32, i32) {
    %c0_i32 = arith.constant 0 : i32
    %c0_i32_0 = arith.constant 0 : i32
    %c0_i32_1 = arith.constant 0 : i32
    %c0_i32_2 = arith.constant 0 : i32
    return %c0_i32, %c0_i32_0, %c0_i32_1 : i32, i32, i32
  }
  func.func @transform_16(%arg0: i32) -> (i32, i32, i32) {
    %c0_i32 = arith.constant 0 : i32
    %c0_i32_0 = arith.constant 0 : i32
    %c0_i32_1 = arith.constant 0 : i32
    %c0_i32_2 = arith.constant 0 : i32
    return %c0_i32, %c0_i32_0, %c0_i32_1 : i32, i32, i32
  }
  func.func @transform_17(%arg0: i32) -> (i32, i32, i32) {
    %c0_i32 = arith.constant 0 : i32
    %c0_i32_0 = arith.constant 0 : i32
    %c0_i32_1 = arith.constant 0 : i32
    %c0_i32_2 = arith.constant 0 : i32
    return %c0_i32, %c0_i32_0, %c0_i32_1 : i32, i32, i32
  }
  func.func @transform_18(%arg0: i32) -> (i32, i32) {
    %c0_i32 = arith.constant 0 : i32
    %c0_i32_0 = arith.constant 0 : i32
    %c0_i32_1 = arith.constant 0 : i32
    return %c0_i32, %c0_i32_0 : i32, i32
  }
  func.func @transform_19(%arg0: i32) -> (i32, i32) {
    %c0_i32 = arith.constant 0 : i32
    %c0_i32_0 = arith.constant 0 : i32
    %c0_i32_1 = arith.constant 0 : i32
    return %c0_i32, %c0_i32_0 : i32, i32
  }
  func.func @transform_20(%arg0: i32) -> (i32, i32) {
    %c0_i32 = arith.constant 0 : i32
    %c0_i32_0 = arith.constant 0 : i32
    %c0_i32_1 = arith.constant 0 : i32
    return %c0_i32, %c0_i32_0 : i32, i32
  }
}

</mosaic_0001>

<bundles_post_ra>
// kernel: _lambda_.1
= control target key start
LH: loop header
LB: loop body
LE: loop exit
PB: predicated region body
PF: predicated region fallthrough
CT: control target
= control target key end

     0   :  { %s5539_s0 = inlined_call_operand.vmem [shape: f32[66,64], index: 0, kind: input, shape index: {}]   ;;  %s5540_s1 = inlined_call_operand.vmem [shape: f32[128,256], index: 1, kind: input, shape index: {}]   ;;  %s5541_s2 = inlined_call_operand.hbm [shape: f32[128,32], index: 2, kind: input, shape index: {}]   ;;  %s5542_s3 = inlined_call_operand.hbm [shape: bf16[256,64], index: 3, kind: input, shape index: {}]   ;;  %s5543_s4 = inlined_call_operand.vmem [shape: f32[12,64], index: 4, kind: input, shape index: {}]   ;;  %s5544_s5 = inlined_call_operand.vmem [shape: f32[12,12], index: 5, kind: input, shape index: {}]   ;;  %s5545_s6 = inlined_call_operand.vmem [shape: f32[2,1,64], index: 6, kind: input, shape index: {}, may-alias: {6,12}]   ;;  %s5546_s7 = inlined_call_operand.vmem [shape: f32[2,1,64], index: 7, kind: input, shape index: {}, may-alias: {7,11,13,17}]   ;;  %s5547_s8 = inlined_call_operand.hbm [shape: bf16[2,64,192], index: 8, kind: input, shape index: {}]   ;;  %s5548_s9 = inlined_call_operand.vmem [shape: f32[2,1,192], index: 9, kind: input, shape index: {}]   ;;  %s5549_s10 = inlined_call_operand.hbm [shape: bf16[2,64,64], index: 10, kind: input, shape index: {}]   ;;  %s5550_s11 = inlined_call_operand.vmem [shape: f32[2,1,64], index: 11, kind: input, shape index: {}, may-alias: {7,11,13,17}]   ;;  %s5551_s12 = inlined_call_operand.vmem [shape: f32[2,1,64], index: 12, kind: input, shape index: {}, may-alias: {6,12}]   ;;  %s5552_s13 = inlined_call_operand.vmem [shape: f32[2,1,64], index: 13, kind: input, shape index: {}, may-alias: {7,11,13,17}]   ;;  %s5553_s14 = inlined_call_operand.hbm [shape: bf16[2,64,256], index: 14, kind: input, shape index: {}]   ;;  %s5554_s15 = inlined_call_operand.vmem [shape: f32[2,1,256], index: 15, kind: input, shape index: {}]   ;;  %s5555_s16 = inlined_call_operand.hbm [shape: bf16[2,256,64], index: 16, kind: input, shape index: {}]   ;;  %s5556_s17 = inlined_call_operand.vmem [shape: f32[2,1,64], index: 17, kind: input, shape index: {}, may-alias: {7,11,13,17}]   ;;  %s5557_s18 = inlined_call_operand.vmem [shape: f32[1,64], index: 18, kind: input, shape index: {}]   ;;  %s5558_s19 = inlined_call_operand.vmem [shape: f32[1,64], index: 19, kind: input, shape index: {}]   ;;  %s5559_s20 = inlined_call_operand.hbm [shape: f32[2,64], index: 20, kind: output, shape index: {}]  }
   0x1   :  { %5565 = sst [smem:[#allocation19_spill]] %s5539_s0 }
   0x2   :  { %5566 = sst [smem:[#allocation20_spill]] %s5540_s1 }
   0x3   :  { %5567 = sst [smem:[#allocation21_spill]] %s5541_s2 }
   0x4   :  { %5568 = sst [smem:[#allocation22_spill]] %s5542_s3 }
   0x5   :  { %5569 = sst [smem:[#allocation23_spill]] %s5543_s4 }
   0x6   :  { %5570 = sst [smem:[#allocation24_spill]] %s5559_s20 }
   0x7   :  { %25 = vsyncpa [#allocation3], 0 }
   0x8   :  { %26 = vsyncpa [#allocation6], 0 }
   0x9   :  { %27 = vsyncpa [#allocation9], 0 }
   0xa   :  { %28 = vsyncpa [#allocation12], 0  ;;  %s5571_s23 = sld [smem:[#allocation22_spill]] }
  0x10   :  { %s51_s24 = sshll.u32 %s5571_s23, 4  ;;  %s52_s24 = int_to_ptr.hbm [resolvable:$true] %s51_s24 }
  0x11   :  { %29 = vsyncpa [#allocation4], 0  ;;  %s4267_s2 = smov [#allocation5]   ;;  %s87_s27 = sshll.u32 %s5549_s10, 4  ;;  %s88_s27 = int_to_ptr.hbm [resolvable:$true] %s87_s27 }
  0x12   :  { %s53_s25 = sshll.u32 %s4267_s2, 4  ;;  %s5563_s28 = smov 64   ;;  %s54_s25 = int_to_ptr.vmem [resolvable:$true] %s53_s25 }
  0x13   :  { %s4269_s4 = smov 4   ;;  %s4270_s29 = smov [#allocation8]  }
  0x14   :  { %59 = dma.hbm_to_vmem [thread:$0]  %s52_s24, 2048, %s54_s25, [#allocation6], %s5563_s28, %s5563_s28, %s4269_s4  }
  0x15   :  { %s89_s30 = sshll.u32 %s4270_s29, 4  ;;  %s5572_s1 = sld [smem:[#allocation21_spill]]  ;;  %s90_s30 = int_to_ptr.vmem [resolvable:$true] %s89_s30 }
  0x16   :  { %95 = dma.hbm_to_vmem [thread:$0]  %s88_s27, 1024, %s90_s30, [#allocation9], %s5563_s28, %s5563_s28, %s4269_s4  }
  0x17   :  { %s4271_s10 = smov [#allocation2]   ;;  %s72_s24 = sshll.u32 %s5547_s8, 4  ;;  %s73_s24 = int_to_ptr.hbm [resolvable:$true] %s72_s24 }
  0x18   :  { %s40_s23 = sshll.u32 %s4271_s10, 4  ;;  %s4272_s25 = smov 128   ;;  %s41_s23 = int_to_ptr.vmem [resolvable:$true] %s40_s23 }
  0x19   :  { %s4273_s26 = smov 8   ;;  %s4274_s29 = smov [#allocation7]  }
  0x1a   :  { %s74_s0 = sshll.u32 %s4274_s29, 4  ;;  %s106_s20 = sshll.u32 %s5553_s14, 4  ;;  %s75_s0 = int_to_ptr.vmem [resolvable:$true] %s74_s0  ;;  %s107_s20 = int_to_ptr.hbm [resolvable:$true] %s106_s20 }
  0x1b   :  { %s38_s22 = sshll.u32 %s5572_s1, 4  ;;  %s121_s10 = sshll.u32 %s5555_s16, 4  ;;  %s39_s22 = int_to_ptr.hbm [resolvable:$true] %s38_s22  ;;  %s122_s10 = int_to_ptr.hbm [resolvable:$true] %s121_s10 }
  0x1c   :  { %46 = dma.hbm_to_vmem [thread:$0]  %s39_s22, 2048, %s41_s23, [#allocation3], %s4272_s25, %s4272_s25, %s4273_s26  }
  0x1d   :  { %80 = dma.hbm_to_vmem [thread:$0]  %s73_s24, 2048, %s75_s0, [#allocation6], %s4272_s25, %s4272_s25, %s4273_s26  }
  0x1e   :  { %s4275_s28 = smov [#allocation10]   ;;  %s4276_s8 = smov [#allocation11]  }
  0x1f   :  { %s108_s2 = sshll.u32 %s4275_s28, 4  ;;  %s123_s22 = sshll.u32 %s4276_s8, 4  ;;  %s109_s2 = int_to_ptr.vmem [resolvable:$true] %s108_s2  ;;  %s124_s22 = int_to_ptr.vmem [resolvable:$true] %s123_s22 }
  0x20   :  { %114 = dma.hbm_to_vmem [thread:$0]  %s107_s20, 2048, %s109_s2, [#allocation9], %s4272_s25, %s4272_s25, %s4273_s26  }
  0x21   :  { %s5573_s23 = smov 64  }
  0x22   :  { %129 = dma.hbm_to_vmem [thread:$0]  %s122_s10, 4096, %s124_s22, [#allocation12], %s5573_s23, %s5573_s23, %s4269_s4  }
  0x23   :  { %4257 = dma.done.wait [#allocation3], 2048  }
  0x24   :  { %4258 = vsyncadd [#allocation3], 4294965248 }
  0x25   :  { %4259 = dma.done.wait [#allocation6], 4096  }
  0x26   :  { %4260 = vsyncadd [#allocation6], 4294963200 }
  0x27   :  { %4261 = dma.done.wait [#allocation9], 3072  }
  0x28   :  { %4262 = vsyncadd [#allocation9], 4294964224 }
  0x29   :  { %4263 = dma.done.wait [#allocation12], 4096  }
  0x2a   :  { %4264 = vsyncadd [#allocation12], 4294963200  ;;  %s5574_s28 = sld [smem:[#allocation20_spill]]  ;;  %vm197_vm0 = vcmask 1045504   ;;  %vm239_vm1 = vcmask 523264   ;;  %vm175_vm2 = vcmask 1046528  }
  0x2b   :  { %s5575_s24 = sld [smem:[#allocation19_spill]]  ;;  %v475_v61 = vld [vmem:[#allocation2 + $0x78] sm:$0xff]  ;;  %v474_v62 = vld [vmem:[#allocation2 + $0x70] sm:$0xff]  ;;  %s4279_s30 = smov 16   ;;  %vm616_vm4 = vcmask 261120   ;;  %vm614_vm5 = vcmask 130048  }
  0x2c   :  { %s4280_s10 = smov 48   ;;  %s4281_s2 = smov 32   ;;  %vm618_vm6 = vcmask 392192   ;;  %vm621_vm7 = vcmask 654336   ;;  %vm623_vm8 = vcmask 785408   ;;  %vm625_vm9 = vcmask 916480  }
  0x2d   :  { %s4282_s8 = smov 96   ;;  %s4283_s22 = smov 80   ;;  %vm1124_vm10 = vcmask 1041408   ;;  %vm1127_vm11 = vcmask 1042432   ;;  %vm1140_vm12 = vcmask 1040384   ;;  %vm1130_vm13 = vcmask 1043456  }
  0x2e   :  { %vm1133_vm14 = vcmask 1044480   ;;  %vm4284_vm15 = vmmov 1   ;;  %s5578_s20 = sld [smem:[#allocation23_spill]]  ;;  %s4286_s29 = smov [#allocation13]  }
  0x2f   :  { %s3082_s0 = sshll.u32 %s4286_s29, 4  ;;  %s5579_s1 = sld [smem:[#allocation24_spill]]  ;;  %s3083_s0 = int_to_ptr.vmem [resolvable:$true] %s3082_s0 }
  0x30   :  { %v237_v0 = vld [vmem:[%s5574_s28 + $0xf0] sm:$0xff]  ;;  %v238_v1 = vld [vmem:[%s5574_s28 + $0xf8] sm:$0xff]  ;;  %v235_v2 = vld [vmem:[%s5574_s28 + $0xe0] sm:$0xff] }
  0x31   :  { %3609 = vmatpush.msra.mxu2 %v237_v0  ;;  %3617 = vmatpush.msra.mxu3 %v238_v1  ;;  %v236_v3 = vld [vmem:[%s5574_s28 + $0xe8] sm:$0xff]  ;;  %v233_v4 = vld [vmem:[%s5574_s28 + $0xd0] sm:$0xff]  ;;  %v234_v5 = vld [vmem:[%s5574_s28 + $0xd8] sm:$0xff] }
  0x32   :  { %264 = vmatpush.msra.mxu0 %v237_v0  ;;  %305 = vmatpush.msra.mxu1 %v238_v1  ;;  %v231_v6 = vld [vmem:[%s5574_s28 + $0xc0] sm:$0xff]  ;;  %v232_v7 = vld [vmem:[%s5574_s28 + $0xc8] sm:$0xff]  ;;  %v229_v8 = vld [vmem:[%s5574_s28 + $0xb0] sm:$0xff] }
  0x33   :  { %3610 = vmatpush.msra.mxu2 %v235_v2  ;;  %3618 = vmatpush.msra.mxu3 %v236_v3  ;;  %v230_v9 = vld [vmem:[%s5574_s28 + $0xb8] sm:$0xff]  ;;  %v4452_v10 = vld [vmem:[%s5575_s24 + $0x30] sm:$0xff]  ;;  %v227_v12 = vld [vmem:[%s5574_s28 + $0xa0] sm:$0xff] }
  0x34   :  { %265 = vmatpush.msra.mxu0 %v235_v2  ;;  %306 = vmatpush.msra.mxu1 %v236_v3  ;;  %v4457_v11 = vld [vmem:[%s5575_s24 + $0x38] sm:$0xff]  ;;  %v228_v13 = vld [vmem:[%s5574_s28 + $0xa8] sm:$0xff]  ;;  %v201_v14 = vrot.slane %v4452_v10, 2  ;;  %v225_v16 = vld [vmem:[%s5574_s28 + $0x90] sm:$0xff] }
  0x35   :  { %3611 = vmatpush.msra.mxu2 %v233_v4  ;;  %3619 = vmatpush.msra.mxu3 %v234_v5  ;;  %v203_v15 = vrot.slane %v4457_v11, 2  ;;  %v226_v17 = vld [vmem:[%s5574_s28 + $0x98] sm:$0xff]  ;;  %v223_v18 = vld [vmem:[%s5574_s28 + $0x80] sm:$0xff]  ;;  %v224_v19 = vld [vmem:[%s5574_s28 + $0x88] sm:$0xff]  ;;  %v181_v57 = vrot.slane %v4457_v11, 1 }
  0x36   :  { %266 = vmatpush.msra.mxu0 %v233_v4  ;;  %307 = vmatpush.msra.mxu1 %v234_v5  ;;  %v221_v20 = vld [vmem:[%s5574_s28 + $0x70] sm:$0xff]  ;;  %v222_v21 = vld [vmem:[%s5574_s28 + $0x78] sm:$0xff]  ;;  %v4488_v22 = vld [vmem:[%s5575_s24 + $0x40] sm:$0x3]  ;;  %v179_v4 = vrot.slane %v4452_v10, 1 }
  0x37   :  { %3612 = vmatpush.msra.mxu2 %v231_v6  ;;  %3620 = vmatpush.msra.mxu3 %v232_v7  ;;  %v4493_v23 = vld [vmem:[%s5575_s24] sm:$0xff]  ;;  %v4498_v24 = vld [vmem:[%s5575_s24 + $0x8] sm:$0xff]  ;;  %v204_v25 = vsel %vm197_vm0, %v201_v14, %v203_v15  ;;  %v217_v30 = vld [vmem:[%s5574_s28 + $0x50] sm:$0xff]  ;;  %v205_v31 = vrot.slane %v4488_v22, 2  ;;  %v183_v58 = vrot.slane %v4488_v22, 1 }
  0x38   :  { %267 = vmatpush.msra.mxu0 %v231_v6  ;;  %308 = vmatpush.msra.mxu1 %v232_v7  ;;  %v189_v26 = vrot.slane %v4493_v23, 1  ;;  %v190_v27 = vrot.slane %v4498_v24, 1  ;;  %v219_v28 = vld [vmem:[%s5574_s28 + $0x60] sm:$0xff]  ;;  %v220_v29 = vld [vmem:[%s5574_s28 + $0x68] sm:$0xff]  ;;  %v218_v33 = vld [vmem:[%s5574_s28 + $0x58] sm:$0xff]  ;;  %v182_v6 = vsel %vm175_vm2, %v179_v4, %v181_v57 }
  0x39   :  { %3613 = vmatpush.msra.mxu2 %v229_v8  ;;  %3621 = vmatpush.msra.mxu3 %v230_v9  ;;  %v163_v34 = vld [vmem:[%s5575_s24 + $0x10] sm:$0xff]  ;;  %v215_v35 = vld [vmem:[%s5574_s28 + $0x40] sm:$0xff]  ;;  %v216_v36 = vld [vmem:[%s5574_s28 + $0x48] sm:$0xff]  ;;  %v206_v37 = vsel %vm197_vm0, %v203_v15, %v205_v31  ;;  %v184_v60 = vsel %vm175_vm2, %v181_v57, %v183_v58 }
  0x3a   :  { %268 = vmatpush.msra.mxu0 %v229_v8  ;;  %309 = vmatpush.msra.mxu1 %v230_v9  ;;  %v191_v32 = vsel %vm175_vm2, %v189_v26, %v190_v27  ;;  %v192_v38 = vrot.slane %v163_v34, 1  ;;  %v213_v39 = vld [vmem:[%s5574_s28 + $0x30] sm:$0xff]  ;;  %v214_v40 = vld [vmem:[%s5574_s28 + $0x38] sm:$0xff]  ;;  %v211_v41 = vld [vmem:[%s5574_s28 + $0x20] sm:$0xff] }
  0x3b   :  { %3614 = vmatpush.msra.mxu2 %v227_v12  ;;  %3622 = vmatpush.msra.mxu3 %v228_v13  ;;  %v212_v42 = vld [vmem:[%s5574_s28 + $0x28] sm:$0xff]  ;;  %v209_v44 = vld [vmem:[%s5574_s28 + $0x10] sm:$0xff]  ;;  %v210_v45 = vld [vmem:[%s5574_s28 + $0x18] sm:$0xff] }
  0x3c   :  { %269 = vmatpush.msra.mxu0 %v227_v12  ;;  %310 = vmatpush.msra.mxu1 %v228_v13  ;;  %v193_v43 = vsel %vm175_vm2, %v190_v27, %v192_v38  ;;  %v164_v46 = vld [vmem:[%s5575_s24 + $0x18] sm:$0xff]  ;;  %v207_v47 = vld [vmem:[%s5574_s28] sm:$0xff]  ;;  %v208_v48 = vld [vmem:[%s5574_s28 + $0x8] sm:$0xff]  ;;  %s3084_s28 = sshll.u32 %s5579_s1, 4  ;;  %s3085_s28 = int_to_ptr.hbm [resolvable:$true] %s3084_s28 }
  0x3d   :  { %3615 = vmatpush.msra.mxu2 %v225_v16  ;;  %3623 = vmatpush.msra.mxu3 %v226_v17  ;;  %v194_v49 = vrot.slane %v164_v46, 1  ;;  %v165_v51 = vld [vmem:[%s5575_s24 + $0x20] sm:$0xff]  ;;  %v166_v54 = vld [vmem:[%s5575_s24 + $0x28] sm:$0xff]  ;;  %v471_v7 = vld [vmem:[#allocation2 + $0x58] sm:$0xff]  ;;  %s4278_s24 = smov 112  }
  0x3e   :  { %270 = vmatpush.msra.mxu0 %v225_v16  ;;  %311 = vmatpush.msra.mxu1 %v226_v17  ;;  %v176_v52 = vrot.slane %v165_v51, 1  ;;  %v198_v55 = vrot.slane %v165_v51, 2  ;;  %v199_v56 = vrot.slane %v166_v54, 2  ;;  %v177_v63 = vrot.slane %v166_v54, 1  ;;  %v473_v1 = vld [vmem:[#allocation2 + $0x68] sm:$0xff]  ;;  %v472_v2 = vld [vmem:[#allocation2 + $0x60] sm:$0xff] }
  0x3f   :  { %3616 = vmatpush.msra.mxu2 %v223_v18  ;;  %3624 = vmatpush.msra.mxu3 %v224_v19  ;;  %v195_v50 = vsel %vm175_vm2, %v192_v38, %v194_v49  ;;  %v470_v8 = vld [vmem:[#allocation2 + $0x50] sm:$0xff]  ;;  %v469_v9 = vld [vmem:[#allocation2 + $0x48] sm:$0xff]  ;;  %v468_v10 = vld [vmem:[#allocation2 + $0x40] sm:$0xff] }
  0x40   :  { %3103 = vmatmul.msk.f32.vlgmr.msra.gmra.mxu2 %vm239_vm1, %v204_v25  ;;  %3111 = vmatmul.msk.f32.vlgmr.msra.gmra.mxu3 %vm239_vm1, %v204_v25  ;;  %v196_v53 = vsel %vm175_vm2, %v194_v49, %v176_v52  ;;  %v200_v59 = vsel %vm197_vm0, %v198_v55, %v199_v56  ;;  %v202_v0 = vsel %vm197_vm0, %v199_v56, %v201_v14  ;;  %v467_v11 = vld [vmem:[#allocation2 + $0x38] sm:$0xff]  ;;  %v466_v12 = vld [vmem:[#allocation2 + $0x30] sm:$0xff]  ;;  %v465_v13 = vld [vmem:[#allocation2 + $0x28] sm:$0xff] }
  0x41   :  { %362 = vmatpush.msrb.mxu2 %v221_v20  ;;  %403 = vmatpush.msrb.mxu3 %v222_v21  ;;  %v178_v3 = vsel %vm175_vm2, %v176_v52, %v177_v63  ;;  %v180_v5 = vsel %vm175_vm2, %v177_v63, %v179_v4  ;;  %v464_v14 = vld [vmem:[#allocation2 + $0x20] sm:$0xff]  ;;  %v463_v15 = vld [vmem:[#allocation2 + $0x18] sm:$0xff]  ;;  %v462_v16 = vld [vmem:[#allocation2 + $0x10] sm:$0xff] }
  0x42   :  { %271 = vmatpush.msra.mxu0 %v223_v18  ;;  %312 = vmatpush.msra.mxu1 %v224_v19  ;;  %v461_v17 = vld [vmem:[#allocation2 + $0x8] sm:$0xff]  ;;  %v460_v18 = vld [vmem:[#allocation2] sm:$0xff] }
  0x43   :  { %363 = vmatpush.msrb.mxu2 %v219_v28  ;;  %404 = vmatpush.msrb.mxu3 %v220_v29 }
  0x44   :  { %3097 = vmatmul.msk.f32.vlgmr.msra.gmra.mxu0 %vm239_vm1, %v191_v32  ;;  %3105 = vmatmul.msk.f32.vlgmr.msra.gmra.mxu1 %vm239_vm1, %v191_v32 }
  0x45   :  { %364 = vmatpush.msrb.mxu2 %v217_v30  ;;  %405 = vmatpush.msrb.mxu3 %v218_v33 }
  0x46   :  { %476 = vmatpush.msrb.mxu0 %v475_v61 }
  0x47   :  { %365 = vmatpush.msrb.mxu2 %v215_v35  ;;  %406 = vmatpush.msrb.mxu3 %v216_v36 }
  0x48   :  { %3104 = vmatmul.msk.f32.gmra.mxu2 %vm239_vm1, %v206_v37  ;;  %3112 = vmatmul.msk.f32.gmra.mxu3 %vm239_vm1, %v206_v37 }
  0x49   :  { %366 = vmatpush.msrb.mxu2 %v213_v39  ;;  %407 = vmatpush.msrb.mxu3 %v214_v40 }
  0x4a   :  { %477 = vmatpush.msrb.mxu0 %v474_v62 }
  0x4b   :  { %367 = vmatpush.msrb.mxu2 %v211_v41  ;;  %408 = vmatpush.msrb.mxu3 %v212_v42 }
  0x4c   :  { %3098 = vmatmul.msk.f32.gmra.mxu0 %vm239_vm1, %v193_v43  ;;  %3106 = vmatmul.msk.f32.gmra.mxu1 %vm239_vm1, %v193_v43 }
  0x4d   :  { %368 = vmatpush.msrb.mxu2 %v209_v44  ;;  %409 = vmatpush.msrb.mxu3 %v210_v45 }
  0x4e   :  { %478 = vmatpush.msrb.mxu0 %v473_v1 }
  0x4f   :  { %369 = vmatpush.msrb.mxu2 %v207_v47  ;;  %410 = vmatpush.msrb.mxu3 %v208_v48 }
  0x50   :  { %3113 = vmatmul.msk.f32.vlgmr.msrb.gmra.mxu2 %vm239_vm1, %v4493_v23  ;;  %3121 = vmatmul.msk.f32.vlgmr.msrb.gmra.mxu3 %vm239_vm1, %v4493_v23 }
  0x51   :  { %479 = vmatpush.msrb.mxu0 %v472_v2 }
  0x53   :  { %480 = vmatpush.msrb.mxu0 %v471_v7 }
  0x54   :  { %3099 = vmatmul.msk.f32.gmra.mxu0 %vm239_vm1, %v195_v50  ;;  %3107 = vmatmul.msk.f32.gmra.mxu1 %vm239_vm1, %v195_v50 }
  0x55   :  { %481 = vmatpush.msrb.mxu0 %v470_v8 }
  0x57   :  { %482 = vmatpush.msrb.mxu0 %v469_v9 }
  0x58   :  { %3114 = vmatmul.msk.f32.gmra.mxu2 %vm239_vm1, %v4498_v24  ;;  %3122 = vmatmul.msk.f32.gmra.mxu3 %vm239_vm1, %v4498_v24 }
  0x59   :  { %483 = vmatpush.msrb.mxu0 %v468_v10 }
  0x5b   :  { %484 = vmatpush.msrb.mxu0 %v467_v11 }
  0x5c   :  { %3100 = vmatmul.msk.f32.gmra.mxu0 %vm239_vm1, %v196_v53  ;;  %3108 = vmatmul.msk.f32.gmra.mxu1 %vm239_vm1, %v196_v53 }
  0x5d   :  { %485 = vmatpush.msrb.mxu0 %v466_v12 }
  0x5f   :  { %486 = vmatpush.msrb.mxu0 %v465_v13 }
  0x60   :  { %3115 = vmatmul.msk.f32.gmra.mxu2 %vm239_vm1, %v163_v34  ;;  %3123 = vmatmul.msk.f32.gmra.mxu3 %vm239_vm1, %v163_v34 }
  0x61   :  { %487 = vmatpush.msrb.mxu0 %v464_v14 }
  0x63   :  { %488 = vmatpush.msrb.mxu0 %v463_v15 }
  0x64   :  { %3101 = vmatmul.msk.f32.gmra.mxu0 %vm239_vm1, %v200_v59  ;;  %3109 = vmatmul.msk.f32.gmra.mxu1 %vm239_vm1, %v200_v59 }
  0x65   :  { %489 = vmatpush.msrb.mxu0 %v462_v16 }
  0x67   :  { %490 = vmatpush.msrb.mxu0 %v461_v17 }
  0x68   :  { %3116 = vmatmul.msk.f32.gmra.mxu2 %vm239_vm1, %v164_v46  ;;  %3124 = vmatmul.msk.f32.gmra.mxu3 %vm239_vm1, %v164_v46 }
  0x69   :  { %491 = vmatpush.msrb.mxu0 %v460_v18 }
  0x6c   :  { %3102 = vmatmul.msk.f32.gmra.mxu0 %vm239_vm1, %v202_v0  ;;  %3110 = vmatmul.msk.f32.gmra.mxu1 %vm239_vm1, %v202_v0 }
  0x70   :  { %3117 = vmatmul.msk.f32.gmra.mxu2 %vm239_vm1, %v178_v3  ;;  %3125 = vmatmul.msk.f32.gmra.mxu3 %vm239_vm1, %v178_v3 }
  0x78   :  { %3118 = vmatmul.msk.f32.gmra.mxu2 %vm239_vm1, %v180_v5  ;;  %3126 = vmatmul.msk.f32.gmra.mxu3 %vm239_vm1, %v180_v5 }
  0x80   :  { %3119 = vmatmul.msk.f32.gmra.mxu2 %vm239_vm1, %v182_v6  ;;  %3127 = vmatmul.msk.f32.gmra.mxu3 %vm239_vm1, %v182_v6 }
  0x88   :  { %3120 = vmatmul.msk.f32.gmra.mxu2 %vm239_vm1, %v184_v60  ;;  %3128 = vmatmul.msk.f32.gmra.mxu3 %vm239_vm1, %v184_v60 }
  0xc1   :  { %v273_v21 = vpop.f32.mrf.mxu0  ;;  %v314_v22 = vpop.f32.mrf.mxu1 }
  0xc3   :  { %v4612_v19 = vpop.f32.mrf.mxu2  ;;  %v4614_v20 = vpop.f32.mrf.mxu3 }
  0xc9   :  { %v276_v25 = vpop.f32.mrf.mxu0  ;;  %v317_v26 = vpop.f32.mrf.mxu1 }
  0xcb   :  { %v4616_v23 = vpop.f32.mrf.mxu2  ;;  %v4618_v24 = vpop.f32.mrf.mxu3 }
  0xd1   :  { %v279_v34 = vpop.f32.mrf.mxu0  ;;  %v320_v35 = vpop.f32.mrf.mxu1 }
  0xd3   :  { %v371_v27 = vpop.f32.mrf.mxu2  ;;  %v412_v28 = vpop.f32.mrf.mxu3 }
  0xd4   :  { %v372_v29 = vadd.f32 %v371_v27, %v273_v21  ;;  %v413_v30 = vadd.f32 %v412_v28, %v314_v22 }
  0xd6   :  { %v436_v31 = vmul.f32 %v372_v29, %v372_v29  ;;  %v444_v32 = vmul.f32 %v413_v30, %v413_v30 }
  0xd8   :  { %v452_v33 = vadd.f32 %v444_v32, %v436_v31  ;;  %v4277_v31 = vmov 5.0  }
  0xd9   :  { %v282_v47 = vpop.f32.mrf.mxu0  ;;  %v323_v48 = vpop.f32.mrf.mxu1  ;;  %3969 = vrcp.f32 %v4277_v31 }
  0xda   :  { %492 = vmatmul.f32.vlgmr.msrb.gmra.mxu0 %v452_v33 }
  0xdb   :  { %v374_v36 = vpop.f32.mrf.mxu2  ;;  %v415_v37 = vpop.f32.mrf.mxu3 }
  0xdc   :  { %v375_v38 = vadd.f32 %v374_v36, %v276_v25  ;;  %v416_v39 = vadd.f32 %v415_v37, %v317_v26 }
  0xde   :  { %v437_v40 = vmul.f32 %v375_v38, %v375_v38  ;;  %v445_v41 = vmul.f32 %v416_v39, %v416_v39 }
  0xe0   :  { %v453_v42 = vadd.f32 %v445_v41, %v437_v40 }
  0xe1   :  { %v285_v58 = vpop.f32.mrf.mxu0  ;;  %v326_v59 = vpop.f32.mrf.mxu1 }
  0xe2   :  { %495 = vmatmul.f32.gmra.mxu0 %v453_v42 }
  0xe3   :  { %v377_v43 = vpop.f32.mrf.mxu2  ;;  %v418_v44 = vpop.f32.mrf.mxu3 }
  0xe4   :  { %v378_v45 = vadd.f32 %v377_v43, %v279_v34  ;;  %v419_v46 = vadd.f32 %v418_v44, %v320_v35 }
  0xe6   :  { %v438_v49 = vmul.f32 %v378_v45, %v378_v45  ;;  %v446_v50 = vmul.f32 %v419_v46, %v419_v46 }
  0xe8   :  { %v454_v51 = vadd.f32 %v446_v50, %v438_v49 }
  0xe9   :  { %v288_v4 = vpop.f32.mrf.mxu0  ;;  %v329_v5 = vpop.f32.mrf.mxu1 }
  0xea   :  { %498 = vmatmul.f32.gmra.mxu0 %v454_v51 }
  0xeb   :  { %v380_v52 = vpop.f32.mrf.mxu2  ;;  %v421_v53 = vpop.f32.mrf.mxu3 }
  0xec   :  { %v381_v54 = vadd.f32 %v380_v52, %v282_v47  ;;  %v422_v55 = vadd.f32 %v421_v53, %v323_v48 }
  0xee   :  { %v439_v56 = vmul.f32 %v381_v54, %v381_v54  ;;  %v447_v57 = vmul.f32 %v422_v55, %v422_v55 }
  0xf0   :  { %v455_v60 = vadd.f32 %v447_v57, %v439_v56 }
  0xf2   :  { %501 = vmatmul.f32.gmra.mxu0 %v455_v60 }
  0xf3   :  { %v383_v61 = vpop.f32.mrf.mxu2  ;;  %v424_v62 = vpop.f32.mrf.mxu3 }
  0xf4   :  { %v384_v63 = vadd.f32 %v383_v61, %v285_v58  ;;  %v425_v0 = vadd.f32 %v424_v62, %v326_v59 }
  0xf6   :  { %v440_v1 = vmul.f32 %v384_v63, %v384_v63  ;;  %v448_v2 = vmul.f32 %v425_v0, %v425_v0 }
  0xf8   :  { %v456_v3 = vadd.f32 %v448_v2, %v440_v1 }
  0xfa   :  { %504 = vmatmul.f32.gmra.mxu0 %v456_v3 }
  0xfb   :  { %v386_v6 = vpop.f32.mrf.mxu2  ;;  %v427_v7 = vpop.f32.mrf.mxu3 }
  0xfc   :  { %v387_v8 = vadd.f32 %v386_v6, %v288_v4  ;;  %v428_v9 = vadd.f32 %v427_v7, %v329_v5 }
  0xfe   :  { %v441_v10 = vmul.f32 %v387_v8, %v387_v8  ;;  %v449_v11 = vmul.f32 %v428_v9, %v428_v9 }
 0x100   :  { %v457_v12 = vadd.f32 %v449_v11, %v441_v10 }
 0x102   :  { %507 = vmatmul.f32.gmra.mxu0 %v457_v12 }
 0x103   :  { %v389_v13 = vpop.f32.mrf.mxu2  ;;  %v430_v14 = vpop.f32.mrf.mxu3 }
 0x104   :  { %v390_v15 = vadd.f32 %v389_v13, %v4612_v19  ;;  %v431_v16 = vadd.f32 %v430_v14, %v4614_v20  ;;  %v3970_v19 = vpop.eup %3969 }
 0x105   :  { %v542_v20 = vmul.f32 5.0, %v3970_v19  ;;  %vm546_vm3 = vweird.f32 %v3970_v19 }
 0x106   :  { %v442_v17 = vmul.f32 %v390_v15, %v390_v15  ;;  %v450_v18 = vmul.f32 %v431_v16, %v431_v16 }
 0x107   :  { %v543_v35 = vsub.f32 1.0, %v542_v20 }
 0x108   :  { %v458_v21 = vadd.f32 %v450_v18, %v442_v17 }
 0x109   :  { %v544_v38 = vmul.f32 %v3970_v19, %v543_v35 }
 0x10a   :  { %510 = vmatmul.f32.gmra.mxu0 %v458_v21 }
 0x10b   :  { %v392_v22 = vpop.f32.mrf.mxu2  ;;  %v433_v25 = vpop.f32.mrf.mxu3  ;;  %v545_v40 = vadd.f32 %v3970_v19, %v544_v38 }
 0x10c   :  { %v393_v26 = vadd.f32 %v392_v22, %v4616_v23  ;;  %v434_v27 = vadd.f32 %v433_v25, %v4618_v24 }
 0x10d   :  { %v4624_v44 = vsel %vm546_vm3, %v3970_v19, %v545_v40  ;;  %vm5169_vm3 = vmpackc.low %vm4284_vm15, %vm175_vm2  ;;  %vm1314_vm2 = vcmask 519168   ;;  %vm1486_vm15 = vcmask 97280  }
 0x10e   :  { %v443_v28 = vmul.f32 %v393_v26, %v393_v26  ;;  %v451_v29 = vmul.f32 %v434_v27, %v434_v27 }
 0x110   :  { %v459_v30 = vadd.f32 %v451_v29, %v443_v28 }
 0x112   :  { %513 = vmatmul.f32.gmra.mxu0 %v459_v30 }
 0x157   :  { %v493_v32 = vpop.f32.mrf.mxu0 }
 0x158   :  { %v494_v33 = vadd.f32 1e-05, %v493_v32 }
 0x15a   :  { %3971 = vlog2.f32 %v494_v33 }
 0x15f   :  { %v496_v34 = vpop.f32.mrf.mxu0 }
 0x160   :  { %v497_v36 = vadd.f32 1e-05, %v496_v34  ;;  %v3972_v37 = vpop.eup %3971 }
 0x161   :  { %v518_v23 = vmul.f32 0.6931472, %v3972_v37 }
 0x162   :  { %3973 = vlog2.f32 %v497_v36 }
 0x163   :  { %v533_v42 = vadd.f32 4.5, %v518_v23 }
 0x165   :  { %v4630_v46 = vmul.f32 %v4624_v44, %v533_v42 }
 0x167   :  { %v499_v39 = vpop.f32.mrf.mxu0  ;;  %v557_v8 = vrot.slane %v4630_v46, 1  ;;  %v565_v26 = vrot.slane %v4630_v46, 3  ;;  %v561_v23 = vrot.slane %v4630_v46, 2 }
 0x168   :  { %v3974_v24 = vpop.eup %3973  ;;  %v500_v62 = vadd.f32 1e-05, %v499_v39  ;;  %v569_v39 = vrot.slane %v4630_v46, 4 }
 0x169   :  { %v520_v41 = vmul.f32 0.6931472, %v3974_v24 }
 0x16b   :  { %v534_v43 = vadd.f32 4.5, %v520_v41 }
 0x16d   :  { %v4627_v45 = vmul.f32 %v4624_v44, %v534_v43 }
 0x16f   :  { %v502_v47 = vpop.f32.mrf.mxu0  ;;  %v610_v48 = vrot.slane %v4627_v45, 7  ;;  %v598_v56 = vrot.slane %v4627_v45, 4  ;;  %v586_v60 = vrot.slane %v4627_v45, 1  ;;  %v594_v3 = vrot.slane %v4627_v45, 3 }
 0x170   :  { %v503_v49 = vadd.f32 1e-05, %v502_v47  ;;  %v590_v7 = vrot.slane %v4627_v45, 2  ;;  %v606_v17 = vrot.slane %v4627_v45, 6  ;;  %v602_v25 = vrot.slane %v4627_v45, 5 }
 0x171   :  { %v3645_v50 = vpack.i.bf16 %v4630_v46, %v610_v48 }
 0x172   :  { %3975 = vlog2.f32 %v503_v49  ;;  %v577_v49 = vrot.slane %v4630_v46, 6 }
 0x173   :  { %3646 = vrot.lane.b32.xlu0 %v3645_v50, %s4278_s24  ;;  %3977 = vlog2.f32 %v500_v62 }
 0x177   :  { %v505_v51 = vpop.f32.mrf.mxu0 }
 0x178   :  { %v3976_v52 = vpop.eup %3975  ;;  %v506_v63 = vadd.f32 1e-05, %v505_v51 }
 0x179   :  { %v524_v53 = vmul.f32 0.6931472, %v3976_v52  ;;  %v3978_v12 = vpop.eup %3977 }
 0x17a   :  { %3979 = vlog2.f32 %v506_v63  ;;  %v522_v16 = vmul.f32 0.6931472, %v3978_v12 }
 0x17b   :  { %v536_v54 = vadd.f32 4.5, %v524_v53  ;;  %v573_v53 = vrot.slane %v4630_v46, 5 }
 0x17c   :  { %v535_v28 = vadd.f32 4.5, %v522_v16 }
 0x17d   :  { %v4638_v55 = vmul.f32 %v4624_v44, %v536_v54 }
 0x17e   :  { %v4685_v34 = vmul.f32 %v4624_v44, %v535_v28 }
 0x17f   :  { %v508_v57 = vpop.f32.mrf.mxu0  ;;  %v3650_v58 = vpack.i.bf16 %v4638_v55, %v4627_v45  ;;  %v676_v59 = vrot.slane %v4638_v55, 4  ;;  %v664_v61 = vrot.slane %v4638_v55, 1  ;;  %v672_v2 = vrot.slane %v4638_v55, 3 }
 0x180   :  { %v668_v4 = vrot.slane %v4638_v55, 2  ;;  %v509_v13 = vadd.f32 1e-05, %v508_v57  ;;  %v3980_v14 = vpop.eup %3979  ;;  %v684_v15 = vrot.slane %v4638_v55, 6  ;;  %v680_v18 = vrot.slane %v4638_v55, 5 }
 0x181   :  { %3651 = vrot.lane.b32.xlu1 %v3650_v58, %s4278_s24  ;;  %v3670_v0 = vpack.i.bf16 %v676_v59, %v598_v56  ;;  %v3655_v1 = vpack.i.bf16 %v664_v61, %v586_v60  ;;  %v3665_v6 = vpack.i.bf16 %v672_v2, %v594_v3  ;;  %v526_v21 = vmul.f32 0.6931472, %v3980_v14 }
 0x182   :  { %v3660_v10 = vpack.i.bf16 %v668_v4, %v590_v7  ;;  %v3675_v11 = vpack.i.bf16 %v668_v4, %v557_v8  ;;  %v3690_v22 = vpack.i.bf16 %v684_v15, %v606_v17  ;;  %v3680_v30 = vpack.i.bf16 %v680_v18, %v602_v25 }
 0x183   :  { %3671 = vrot.lane.b32.xlu2 %v3670_v0, %s5573_s23  ;;  %3656 = vrot.lane.b32.xlu0 %v3655_v1, %s4279_s30  ;;  %v3695_v31 = vpack.i.bf16 %v676_v59, %v565_v26  ;;  %v537_v32 = vadd.f32 4.5, %v526_v21  ;;  %v688_v33 = vrot.slane %v4638_v55, 7  ;;  %v3685_v41 = vpack.i.bf16 %v672_v2, %v561_v23 }
 0x184   :  { %v3700_v42 = vpack.i.bf16 %v680_v18, %v569_v39  ;;  %v639_v54 = vrot.slane %v4685_v34, 2  ;;  %v3710_v57 = vpack.i.bf16 %v684_v15, %v573_v53  ;;  %v643_v2 = vrot.slane %v4685_v34, 3 }
 0x185   :  { %v4691_v36 = vmul.f32 %v4624_v44, %v537_v32  ;;  %v3705_v38 = vpack.i.bf16 %v4685_v34, %v688_v33  ;;  %v3715_v52 = vpack.i.bf16 %v688_v33, %v577_v49  ;;  %v647_v4 = vrot.slane %v4685_v34, 4 }
 0x186   :  { %v651_v15 = vrot.slane %v4685_v34, 5 }
 0x187   :  { %v511_v5 = vpop.f32.mrf.mxu0  ;;  %v847_v24 = vrot.slane %v4691_v36, 7  ;;  %v823_v50 = vrot.slane %v4691_v36, 1  ;;  %v827_v0 = vrot.slane %v4691_v36, 2  ;;  %v831_v1 = vrot.slane %v4691_v36, 3 }
 0x188   :  { %v512_v9 = vadd.f32 1e-05, %v511_v5 }
 0x189   :  { %3666 = vrot.lane.b32.xlu1 %v3665_v6, %s4280_s10  ;;  %v3720_v58 = vpack.i.bf16 %v823_v50, %v639_v54  ;;  %v3725_v5 = vpack.i.bf16 %v827_v0, %v643_v2  ;;  %v3730_v6 = vpack.i.bf16 %v831_v1, %v647_v4 }
 0x18a   :  { %3981 = vlog2.f32 %v512_v9 }
 0x18b   :  { %3661 = vrot.lane.b32.xlu0 %v3660_v10, %s4281_s2  ;;  %3676 = vrot.lane.b32.xlu2 %v3675_v11, %s4279_s30  ;;  %3983 = vlog2.f32 %v509_v13  ;;  %v835_v11 = vrot.slane %v4691_v36, 4 }
 0x18d   :  { %v3735_v16 = vpack.i.bf16 %v835_v11, %v651_v15 }
 0x18f   :  { %v514_v32 = vpop.f32.mrf.mxu0 }
 0x190   :  { %v3982_v27 = vpop.eup %3981 }
 0x191   :  { %v530_v29 = vmul.f32 0.6931472, %v3982_v27  ;;  %3691 = vrot.lane.b32.xlu1 %v3690_v22, %s4282_s8  ;;  %v3984_v20 = vpop.eup %3983  ;;  %v839_v22 = vrot.slane %v4691_v36, 5 }
 0x192   :  { %v528_v37 = vmul.f32 0.6931472, %v3984_v20  ;;  %v515_v20 = vadd.f32 1e-05, %v514_v32 }
 0x193   :  { %v539_v19 = vadd.f32 4.5, %v530_v29  ;;  %3681 = vrot.lane.b32.xlu0 %v3680_v30, %s4283_s22  ;;  %3696 = vrot.lane.b32.xlu2 %v3695_v31, %s4280_s10  ;;  %v655_v29 = vrot.slane %v4685_v34, 6 }
 0x194   :  { %v538_v43 = vadd.f32 4.5, %v528_v37  ;;  %3985 = vlog2.f32 %v515_v20 }
 0x195   :  { %v4688_v35 = vmul.f32 %v4624_v44, %v539_v19  ;;  %v3740_v30 = vpack.i.bf16 %v839_v22, %v655_v29 }
 0x196   :  { %v4712_v51 = vmul.f32 %v4624_v44, %v538_v43 }
 0x197   :  { %v919_v40 = vrot.slane %v4688_v35, 7  ;;  %v903_v21 = vrot.slane %v4688_v35, 3  ;;  %v911_v19 = vrot.slane %v4688_v35, 5  ;;  %v899_v33 = vrot.slane %v4688_v35, 2 }
 0x198   :  { %v852_v59 = vrot.slane %v4712_v51, 1  ;;  %v856_v62 = vrot.slane %v4712_v51, 2  ;;  %v872_v9 = vrot.slane %v4712_v51, 6  ;;  %v876_v10 = vrot.slane %v4712_v51, 7 }
 0x199   :  { %3706 = vrot.lane.b32.xlu1 %v3705_v38, %s4278_s24  ;;  %v4707_v47 = vpack.i.bf16 %v919_v40, %v847_v24  ;;  %v860_v12 = vrot.slane %v4712_v51, 3  ;;  %v864_v13 = vrot.slane %v4712_v51, 4  ;;  %v868_v27 = vrot.slane %v4712_v51, 5 }
 0x19a   :  { %v3745_v63 = vpack.i.bf16 %v856_v62, %v852_v59  ;;  %v3770_v14 = vpack.i.bf16 %v876_v10, %v872_v9  ;;  %v3795_v28 = vpack.i.bf16 %v569_v39, %v903_v21  ;;  %v3815_v37 = vpack.i.bf16 %v577_v49, %v911_v19 }
 0x19b   :  { %3686 = vrot.lane.b32.xlu0 %v3685_v41, %s4281_s2  ;;  %3701 = vrot.lane.b32.xlu2 %v3700_v42, %s5573_s23  ;;  %v3755_v18 = vpack.i.bf16 %v864_v13, %v860_v12  ;;  %v3760_v31 = vpack.i.bf16 %v868_v27, %v864_v13  ;;  %v3800_v38 = vpack.i.bf16 %v899_v33, %v827_v0  ;;  %v915_v41 = vrot.slane %v4688_v35, 6 }
 0x19c   :  { %v3750_v39 = vpack.i.bf16 %v860_v12, %v856_v62  ;;  %v581_v42 = vrot.slane %v4630_v46, 7  ;;  %v907_v43 = vrot.slane %v4688_v35, 4  ;;  %v3835_v0 = vpack.i.bf16 %v847_v24, %v919_v40 }
 0x19d   :  { %v3830_v24 = vpack.i.bf16 %v911_v19, %v839_v22  ;;  %v895_v13 = vrot.slane %v4688_v35, 1  ;;  %v3810_v19 = vpack.i.bf16 %v903_v21, %v831_v1 }
 0x19e   :  { %v3805_v49 = vpack.i.bf16 %v573_v53, %v907_v43  ;;  %v3780_v40 = vpack.i.bf16 %v581_v42, %v4688_v35 }
 0x1a1   :  { %3716 = vrot.lane.b32.xlu1 %v3715_v52, %s4282_s8  ;;  %v3825_v52 = vpack.i.bf16 %v581_v42, %v915_v41 }
 0x1a3   :  { %3711 = vrot.lane.b32.xlu0 %v3710_v57, %s4283_s22  ;;  %3721 = vrot.lane.b32.xlu2 %v3720_v58, %s4279_s30  ;;  %v3986_v57 = vpop.eup %3985  ;;  %v3765_v58 = vpack.i.bf16 %v872_v9, %v868_v27 }
 0x1a4   :  { %v532_v62 = vmul.f32 0.6931472, %v3986_v57 }
 0x1a9   :  { %3746 = vrot.lane.b32.xlu1 %v3745_v63, %s4279_s30  ;;  %v540_v63 = vadd.f32 4.5, %v532_v62 }
 0x1ab   :  { %3726 = vrot.lane.b32.xlu0 %v3725_v5, %s4281_s2  ;;  %3731 = vrot.lane.b32.xlu2 %v3730_v6, %s4280_s10  ;;  %v659_v5 = vrot.slane %v4685_v34, 7  ;;  %v3820_v6 = vpack.i.bf16 %v907_v43, %v835_v11  ;;  %v4784_v9 = vmul.f32 %v4624_v44, %v540_v63 }
 0x1ad   :  { %v3775_v53 = vpack.i.bf16 %v659_v5, %v876_v10  ;;  %v3840_v12 = vpack.i.bf16 %v4784_v9, %v4712_v51  ;;  %v936_v10 = vrot.slane %v4784_v9, 4  ;;  %v924_v11 = vrot.slane %v4784_v9, 1 }
 0x1ae   :  { %v932_v22 = vrot.slane %v4784_v9, 3  ;;  %v948_v42 = vrot.slane %v4784_v9, 7 }
 0x1b1   :  { %3771 = vrot.lane.b32.xlu1 %v3770_v14, %s4282_s8  ;;  %v3865_v14 = vpack.i.bf16 %v602_v25, %v936_v10  ;;  %v3870_v25 = vpack.i.bf16 %v932_v22, %v639_v54  ;;  %v928_v54 = vrot.slane %v4784_v9, 2 }
 0x1b3   :  { %3736 = vrot.lane.b32.xlu0 %v3735_v16, %s5573_s23  ;;  %3756 = vrot.lane.b32.xlu2 %v3755_v18, %s4280_s10  ;;  %v3845_v16 = vpack.i.bf16 %v590_v7, %v924_v11  ;;  %v3785_v18 = vpack.i.bf16 %v561_v23, %v895_v13  ;;  %v3855_v7 = vpack.i.bf16 %v598_v56, %v932_v22  ;;  %v940_v23 = vrot.slane %v4784_v9, 5 }
 0x1b4   :  { %v635_v56 = vrot.slane %v4685_v34, 1  ;;  %v3850_v57 = vpack.i.bf16 %v594_v3, %v928_v54 }
 0x1b5   :  { %v3875_v32 = vpack.i.bf16 %v606_v17, %v940_v23  ;;  %v944_v17 = vrot.slane %v4784_v9, 6 }
 0x1b7   :  { %v3885_v21 = vpack.i.bf16 %v610_v48, %v944_v17 }
 0x1b9   :  { %3796 = vrot.lane.b32.xlu1 %v3795_v28, %s4280_s10  ;;  %v3790_v28 = vpack.i.bf16 %v565_v26, %v899_v33  ;;  %v3860_v26 = vpack.i.bf16 %v928_v54, %v635_v56  ;;  %v843_v54 = vrot.slane %v4691_v36, 6 }
 0x1bb   :  { %3741 = vrot.lane.b32.xlu0 %v3740_v30, %s4283_s22  ;;  %3761 = vrot.lane.b32.xlu2 %v3760_v31, %s5573_s23 }
 0x1c1   :  { %3816 = vrot.lane.b32.xlu1 %v3815_v37, %s4283_s22 }
 0x1c3   :  { %3801 = vrot.lane.b32.xlu2 %v3800_v38, %s4279_s30  ;;  %3751 = vrot.lane.b32.xlu0 %v3750_v39, %s4281_s2 }
 0x1c9   :  { %3826 = vrot.lane.b32.xlu1 %v3825_v52, %s4282_s8  ;;  %v3890_v52 = vpack.i.bf16 %v948_v42, %v4691_v36 }
 0x1cb   :  { %3806 = vrot.lane.b32.xlu2 %v3805_v49, %s5573_s23  ;;  %3766 = vrot.lane.b32.xlu0 %v3765_v58, %s4283_s22 }
 0x1d1   :  { %3836 = vrot.lane.b32.xlu1 %v3835_v0, %s4278_s24 }
 0x1d3   :  { %3821 = vrot.lane.b32.xlu2 %v3820_v6, %s4280_s10  ;;  %3776 = vrot.lane.b32.xlu0 %v3775_v53, %s4278_s24  ;;  %v3895_v6 = vpack.i.bf16 %v940_v23, %v647_v4 }
 0x1d9   :  { %3841 = vrot.lane.b32.xlu1 %v3840_v12, %s4278_s24 }
 0x1db   :  { %3831 = vrot.lane.b32.xlu2 %v3830_v24, %s5573_s23  ;;  %3781 = vrot.lane.b32.xlu0 %v3780_v40, %s4278_s24 }
 0x1dd   :  { %v4795_v44 = vpop.permute.xlu2 %3671 }
 0x1de   :  { %v3674_v40 = vunpack.i.h.bf16 %v4795_v44 }
 0x1e1   :  { %3866 = vrot.lane.b32.xlu1 %v3865_v14, %s5573_s23  ;;  %v3673_v14 = vunpack.i.l.bf16 %v4795_v44 }
 0x1e3   :  { %3846 = vrot.lane.b32.xlu2 %v3845_v16, %s4279_s30  ;;  %3786 = vrot.lane.b32.xlu0 %v3785_v18, %s4279_s30 }
 0x1e5   :  { %v4815_v27 = vpop.permute.xlu2 %3676  ;;  %v4827_v30 = vpop.permute.xlu0 %3646 }
 0x1e6   :  { %v3679_v37 = vunpack.i.h.bf16 %v4815_v27 }
 0x1e9   :  { %3871 = vrot.lane.b32.xlu1 %v3870_v25, %s4281_s2  ;;  %v3880_v25 = vpack.i.bf16 %v936_v10, %v643_v2  ;;  %v3915_v2 = vpack.i.bf16 %v948_v42, %v655_v29  ;;  %v3648_v10 = vunpack.i.l.bf16 %v4827_v30  ;;  %v3910_v29 = vpack.i.bf16 %v843_v54, %v659_v5 }
 0x1eb   :  { %3856 = vrot.lane.b32.xlu2 %v3855_v7, %s4280_s10  ;;  %3791 = vrot.lane.b32.xlu0 %v3790_v28, %s4281_s2 }
 0x1ed   :  { %v4829_v31 = vpop.permute.xlu2 %3696 }
 0x1f1   :  { %3876 = vrot.lane.b32.xlu1 %v3875_v32, %s4283_s22 }
 0x1f3   :  { %v4842_v33 = vpop.permute.xlu1 %3651  ;;  %3861 = vrot.lane.b32.xlu2 %v3860_v26, %s4279_s30  ;;  %3811 = vrot.lane.b32.xlu0 %v3810_v19, %s4281_s2 }
 0x1f4   :  { %v3654_v20 = vunpack.i.h.bf16 %v4842_v33 }
 0x1f5   :  { %v3657_v38 = vpop.permute.xlu0 %3656  ;;  %v4849_v39 = vpop.permute.xlu2 %3701 }
 0x1f6   :  { %v815_v1 = vsel %vm614_vm5, %v3654_v20, %v664_v61  ;;  %v3659_v49 = vunpack.i.h.bf16 %v3657_v38  ;;  %v3658_v58 = vunpack.i.l.bf16 %v3657_v38 }
 0x1f7   :  { %v4858_v43 = vsel %vm616_vm4, %v815_v1, %v3679_v37 }
 0x1f8   :  { %v699_v53 = vsel %vm614_vm5, %v4638_v55, %v3659_v49  ;;  %v627_v3 = vsel %vm614_vm5, %v4627_v45, %v3658_v58  ;;  %v3900_v55 = vpack.i.bf16 %v944_v17, %v651_v15  ;;  %v3678_v17 = vunpack.i.l.bf16 %v4815_v27 }
 0x1f9   :  { %3886 = vrot.lane.b32.xlu1 %v3885_v21, %s4282_s8 }
 0x1fb   :  { %v3667_v62 = vpop.permute.xlu1 %3666  ;;  %3891 = vrot.lane.b32.xlu2 %v3890_v52, %s4278_s24  ;;  %3851 = vrot.lane.b32.xlu0 %v3850_v57, %s4281_s2  ;;  %v3905_v52 = vpack.i.bf16 %v915_v41, %v843_v54  ;;  %v615_v57 = vsel %vm614_vm5, %v4630_v46, %v3678_v17 }
 0x1fc   :  { %v3669_v12 = vunpack.i.h.bf16 %v3667_v62  ;;  %v3668_v24 = vunpack.i.l.bf16 %v3667_v62 }
 0x1fd   :  { %v3662_v61 = vpop.permute.xlu0 %3661  ;;  %v4866_v0 = vpop.permute.xlu2 %3721 }
 0x1fe   :  { %v3664_v48 = vunpack.i.h.bf16 %v3662_v61  ;;  %v3663_v63 = vunpack.i.l.bf16 %v3662_v61  ;;  %v3699_v61 = vunpack.i.h.bf16 %v4829_v31  ;;  %v3723_v41 = vunpack.i.l.bf16 %v4866_v0 }
 0x200   :  { %v628_v16 = vsel %vm616_vm4, %v627_v3, %v3663_v63  ;;  %v700_v18 = vsel %vm616_vm4, %v699_v53, %v3664_v48  ;;  %v3698_v3 = vunpack.i.l.bf16 %v4829_v31 }
 0x201   :  { %v629_v22 = vsel %vm618_vm6, %v628_v16, %v3668_v24  ;;  %v701_v4 = vsel %vm618_vm6, %v700_v18, %v3669_v12  ;;  %3896 = vrot.lane.b32.xlu1 %v3895_v6, %s5573_s23  ;;  %v3704_v12 = vunpack.i.h.bf16 %v4849_v39 }
 0x202   :  { %v630_v44 = vsel %vm239_vm1, %v629_v22, %v3673_v14  ;;  %v702_v7 = vsel %vm239_vm1, %v701_v4, %v3674_v40  ;;  %v3703_v14 = vunpack.i.l.bf16 %v4849_v39 }
 0x203   :  { %v3692_v28 = vpop.permute.xlu1 %3691  ;;  %3901 = vrot.lane.b32.xlu2 %v3900_v55, %s4283_s22  ;;  %3881 = vrot.lane.b32.xlu0 %v3880_v25, %s4280_s10 }
 0x204   :  { %v3694_v26 = vunpack.i.h.bf16 %v3692_v28  ;;  %v3693_v19 = vunpack.i.l.bf16 %v3692_v28 }
 0x205   :  { %v3682_v23 = vpop.permute.xlu0 %3681  ;;  %v3732_v38 = vpop.permute.xlu2 %3731 }
 0x206   :  { %v3684_v15 = vunpack.i.h.bf16 %v3682_v23  ;;  %v3683_v32 = vunpack.i.l.bf16 %v3682_v23 }
 0x208   :  { %v631_v20 = vsel %vm621_vm7, %v630_v44, %v3683_v32  ;;  %v703_v37 = vsel %vm621_vm7, %v702_v7, %v3684_v15 }
 0x209   :  { %v632_v1 = vsel %vm623_vm8, %v631_v20, %v3693_v19  ;;  %3916 = vrot.lane.b32.xlu1 %v3915_v2, %s4282_s8  ;;  %v704_v21 = vsel %vm623_vm8, %v703_v37, %v3694_v26  ;;  %v3724_v19 = vunpack.i.h.bf16 %v4866_v0 }
 0x20a   :  { %v633_v42 = vsel %vm625_vm9, %v632_v1, %v3648_v10 }
 0x20b   :  { %v3707_v27 = vpop.permute.xlu1 %3706  ;;  %3906 = vrot.lane.b32.xlu2 %v3905_v52, %s4283_s22  ;;  %3911 = vrot.lane.b32.xlu0 %v3910_v29, %s4282_s8  ;;  %v1085_v49 = vrot.slane %v633_v42, 6  ;;  %v880_v1 = vsel %vm614_vm5, %v4691_v36, %v3724_v19  ;;  %v3733_v52 = vunpack.i.l.bf16 %v3732_v38 }
 0x20c   :  { %v3709_v58 = vunpack.i.h.bf16 %v3707_v27  ;;  %v3708_v62 = vunpack.i.l.bf16 %v3707_v27 }
 0x20d   :  { %v3687_v5 = vpop.permute.xlu0 %3686  ;;  %v1126_v16 = vsel %vm1124_vm10, 0.0, %v1085_v49  ;;  %v4931_v55 = vpop.permute.xlu2 %3756 }
 0x20e   :  { %v808_v48 = vsel %vm614_vm5, %v3709_v58, %v635_v56  ;;  %v705_v63 = vsel %vm625_vm9, %v704_v21, %v3708_v62  ;;  %v3689_v6 = vunpack.i.h.bf16 %v3687_v5  ;;  %v3688_v53 = vunpack.i.l.bf16 %v3687_v5 }
 0x20f   :  { %v1091_v24 = vrot.slane %v705_v63, 5  ;;  %v809_v40 = vsel %vm616_vm4, %v808_v48, %v3723_v41  ;;  %v3734_v21 = vunpack.i.h.bf16 %v3732_v38 }
 0x210   :  { %v617_v18 = vsel %vm616_vm4, %v615_v57, %v3688_v53  ;;  %v817_v56 = vsel %vm618_vm6, %v4858_v43, %v3689_v6 }
 0x211   :  { %v4925_v22 = vsel %vm1127_vm11, %v1126_v16, %v1091_v24  ;;  %v619_v4 = vsel %vm618_vm6, %v617_v18, %v3698_v3  ;;  %v818_v31 = vsel %vm239_vm1, %v817_v56, %v3699_v61  ;;  %3921 = vrot.lane.b32.xlu1 %v4707_v47, %s4282_s8  ;;  %v3758_v18 = vunpack.i.l.bf16 %v4931_v55 }
 0x212   :  { %v620_v39 = vsel %vm239_vm1, %v619_v4, %v3703_v14  ;;  %v819_v25 = vsel %vm621_vm7, %v818_v31, %v3704_v12 }
 0x213   :  { %v3717_v44 = vpop.permute.xlu1 %3716 }
 0x214   :  { %v3719_v23 = vunpack.i.h.bf16 %v3717_v44  ;;  %v3718_v54 = vunpack.i.l.bf16 %v3717_v44 }
 0x215   :  { %v3712_v7 = vpop.permute.xlu0 %3711  ;;  %v4946_v10 = vpop.permute.xlu2 %3761 }
 0x216   :  { %v3714_v28 = vunpack.i.h.bf16 %v3712_v7  ;;  %v3713_v43 = vunpack.i.l.bf16 %v3712_v7  ;;  %v3763_v4 = vunpack.i.l.bf16 %v4946_v10 }
 0x218   :  { %v622_v15 = vsel %vm621_vm7, %v620_v39, %v3713_v43  ;;  %v820_v32 = vsel %vm623_vm8, %v819_v25, %v3714_v28  ;;  %v3536_v39 = vld [vmem:[#allocation5 + $0x78] sm:$0xff] }
 0x219   :  { %v4938_v26 = vsel %vm625_vm9, %v820_v32, %v3719_v23  ;;  %v4941_v47 = vsel %vm623_vm8, %v622_v15, %v3718_v54  ;;  %1293 = vmatpush.bf16.msra.mxu2 %v3536_v39  ;;  %v3649_v39 = vunpack.i.h.bf16 %v4827_v30 }
 0x21b   :  { %v4944_v2 = vpop.permute.xlu1 %3746 }
 0x21c   :  { %v3748_v24 = vunpack.i.l.bf16 %v4944_v2 }
 0x21d   :  { %v3727_v17 = vpop.permute.xlu0 %3726  ;;  %v4956_v58 = vpop.permute.xlu2 %3801 }
 0x21e   :  { %v3729_v20 = vunpack.i.h.bf16 %v3727_v17  ;;  %v3728_v37 = vunpack.i.l.bf16 %v3727_v17  ;;  %v887_v56 = vsel %vm614_vm5, %v4712_v51, %v3748_v24 }
 0x220   :  { %v810_v29 = vsel %vm618_vm6, %v809_v40, %v3728_v37  ;;  %v881_v42 = vsel %vm616_vm4, %v880_v1, %v3729_v20  ;;  %v3535_v37 = vld [vmem:[#allocation5 + $0x70] sm:$0xff]  ;;  %v3534_v1 = vld [vmem:[#allocation5 + $0x68] sm:$0xff] }
 0x221   :  { %v811_v27 = vsel %vm239_vm1, %v810_v29, %v3733_v52  ;;  %v882_v0 = vsel %vm618_vm6, %v881_v42, %v3734_v21  ;;  %1294 = vmatpush.bf16.msra.mxu2 %v3535_v37  ;;  %v3528_v21 = vld [vmem:[#allocation5 + $0x38] sm:$0xff]  ;;  %v3749_v42 = vunpack.i.h.bf16 %v4944_v2 }
 0x222   :  { %1279 = vmatpush.bf16.msrb.mxu1 %v3528_v21 }
 0x223   :  { %v4954_v57 = vpop.permute.xlu1 %3771 }
 0x224   :  { %v3773_v54 = vunpack.i.l.bf16 %v4954_v57 }
 0x225   :  { %v3737_v49 = vpop.permute.xlu0 %3736  ;;  %v4962_v53 = vpop.permute.xlu2 %3806  ;;  %1295 = vmatpush.bf16.msra.mxu2 %v3534_v1  ;;  %v3530_v1 = vld [vmem:[#allocation5 + $0x48] sm:$0xff] }
 0x226   :  { %v3739_v62 = vunpack.i.h.bf16 %v3737_v49  ;;  %v3738_v61 = vunpack.i.l.bf16 %v3737_v49 }
 0x228   :  { %v812_v41 = vsel %vm621_vm7, %v811_v27, %v3738_v61  ;;  %v883_v5 = vsel %vm239_vm1, %v882_v0, %v3739_v62  ;;  %v3759_v61 = vunpack.i.h.bf16 %v4931_v55 }
 0x22b   :  { %v4960_v38 = vpop.permute.xlu1 %3796 }
 0x22c   :  { %v3799_v21 = vunpack.i.h.bf16 %v4960_v38 }
 0x22d   :  { %v3742_v48 = vpop.permute.xlu0 %3741  ;;  %v4979_v44 = vpop.permute.xlu2 %3821 }
 0x22e   :  { %v3744_v63 = vunpack.i.h.bf16 %v3742_v48  ;;  %v3743_v6 = vunpack.i.l.bf16 %v3742_v48  ;;  %v3823_v45 = vunpack.i.l.bf16 %v4979_v44 }
 0x230   :  { %v4965_v3 = vsel %vm623_vm8, %v812_v41, %v3743_v6  ;;  %v4968_v12 = vsel %vm621_vm7, %v883_v5, %v3744_v63  ;;  %v3764_v5 = vunpack.i.h.bf16 %v4946_v10  ;;  %v3774_v6 = vunpack.i.h.bf16 %v4954_v57  ;;  %v3532_v10 = vld [vmem:[#allocation5 + $0x58] sm:$0xff]  ;;  %v3531_v57 = vld [vmem:[#allocation5 + $0x50] sm:$0xff] }
 0x233   :  { %v4971_v40 = vpop.permute.xlu1 %3816 }
 0x235   :  { %v3752_v14 = vpop.permute.xlu0 %3751  ;;  %v4991_v17 = vpop.permute.xlu2 %3831 }
 0x236   :  { %v3753_v16 = vunpack.i.l.bf16 %v3752_v14  ;;  %v3754_v0 = vunpack.i.h.bf16 %v3752_v14 }
 0x238   :  { %v888_v31 = vsel %vm616_vm4, %v887_v56, %v3753_v16  ;;  %v3527_v16 = vld [vmem:[#allocation5 + $0x30] sm:$0xff] }
 0x239   :  { %v889_v25 = vsel %vm618_vm6, %v888_v31, %v3758_v18  ;;  %1280 = vmatpush.bf16.msrb.mxu1 %v3527_v16  ;;  %v3525_v31 = vld [vmem:[#allocation5 + $0x20] sm:$0xff] }
 0x23a   :  { %v890_v7 = vsel %vm239_vm1, %v889_v25, %v3763_v4  ;;  %v3526_v4 = vld [vmem:[#allocation5 + $0x28] sm:$0xff] }
 0x23b   :  { %v4982_v28 = vpop.permute.xlu1 %3826 }
 0x23d   :  { %v3767_v43 = vpop.permute.xlu0 %3766  ;;  %v5001_v49 = vpop.permute.xlu2 %3846  ;;  %1281 = vmatpush.bf16.msrb.mxu1 %v3526_v4 }
 0x23e   :  { %v3768_v23 = vunpack.i.l.bf16 %v3767_v43  ;;  %v3769_v63 = vunpack.i.h.bf16 %v3767_v43 }
 0x240   :  { %v891_v15 = vsel %vm621_vm7, %v890_v7, %v3768_v23 }
 0x241   :  { %v4987_v32 = vsel %vm623_vm8, %v891_v15, %v3773_v54  ;;  %1282 = vmatpush.bf16.msrb.mxu1 %v3525_v31  ;;  %v750_v54 = vsel %vm614_vm5, %v3649_v39, %v557_v8  ;;  %v3849_v39 = vunpack.i.h.bf16 %v5001_v49 }
 0x243   :  { %v4989_v19 = vpop.permute.xlu1 %3836 }
 0x245   :  { %v4993_v20 = vpop.permute.xlu0 %3776  ;;  %v5019_v56 = vpop.permute.xlu2 %3856 }
 0x24b   :  { %v4995_v52 = vpop.permute.xlu1 %3841 }
 0x24c   :  { %v3843_v29 = vunpack.i.l.bf16 %v4995_v52 }
 0x24d   :  { %v4999_v27 = vpop.permute.xlu0 %3781 }
 0x24e   :  { %v1017_v62 = vsel %vm614_vm5, %v3843_v29, %v852_v59  ;;  %v3533_v59 = vld [vmem:[#allocation5 + $0x60] sm:$0xff]  ;;  %v3798_v29 = vunpack.i.l.bf16 %v4960_v38  ;;  %v3862_v38 = vpop.permute.xlu2 %3861 }
 0x24f   :  { %v1018_v41 = vsel %vm616_vm4, %v1017_v62, %v3749_v42  ;;  %1296 = vmatpush.bf16.msra.mxu2 %v3533_v59  ;;  %v3809_v62 = vunpack.i.h.bf16 %v4962_v53 }
 0x250   :  { %v1019_v48 = vsel %vm618_vm6, %v1018_v41, %v3754_v0  ;;  %v3524_v0 = vld [vmem:[#allocation5 + $0x18] sm:$0xff]  ;;  %v3819_v41 = vunpack.i.h.bf16 %v4971_v40 }
 0x251   :  { %v1020_v2 = vsel %vm239_vm1, %v1019_v48, %v3759_v61  ;;  %v3808_v61 = vunpack.i.l.bf16 %v4962_v53  ;;  %1283 = vmatpush.bf16.msrb.mxu1 %v3524_v0  ;;  %v3828_v53 = vunpack.i.l.bf16 %v4982_v28  ;;  %v3833_v0 = vunpack.i.l.bf16 %v4991_v17 }
 0x252   :  { %v1021_v24 = vsel %vm621_vm7, %v1020_v2, %v3764_v5  ;;  %v3818_v5 = vunpack.i.l.bf16 %v4971_v40  ;;  %v3529_v2 = vld [vmem:[#allocation5 + $0x40] sm:$0xff]  ;;  %v3653_v40 = vunpack.i.l.bf16 %v4842_v33  ;;  %v3784_v33 = vunpack.i.h.bf16 %v4999_v27 }
 0x253   :  { %v1022_v14 = vsel %vm623_vm8, %v1021_v24, %v3769_v63  ;;  %v5014_v51 = vpop.permute.xlu1 %3866  ;;  %1297 = vmatpush.bf16.msra.mxu2 %v3532_v10  ;;  %v3829_v24 = vunpack.i.h.bf16 %v4982_v28  ;;  %v3844_v28 = vunpack.i.h.bf16 %v4995_v52  ;;  %v3863_v52 = vunpack.i.l.bf16 %v3862_v38 }
 0x254   :  { %v5017_v55 = vsel %vm625_vm9, %v1022_v14, %v3774_v6  ;;  %v3523_v6 = vld [vmem:[#allocation5 + $0x10] sm:$0xff] }
 0x255   :  { %v3787_v18 = vpop.permute.xlu0 %3786  ;;  %1284 = vmatpush.bf16.msrb.mxu1 %v3523_v6  ;;  %v3869_v6 = vunpack.i.h.bf16 %v5014_v51 }
 0x256   :  { %v3789_v7 = vunpack.i.h.bf16 %v3787_v18  ;;  %v3788_v43 = vunpack.i.l.bf16 %v3787_v18 }
 0x257   :  { %1298 = vmatpush.bf16.msra.mxu2 %v3531_v57 }
 0x258   :  { %v751_v30 = vsel %vm616_vm4, %v750_v54, %v3789_v7  ;;  %v952_v42 = vsel %vm614_vm5, %v4688_v35, %v3788_v43  ;;  %v3522_v7 = vld [vmem:[#allocation5 + $0x8] sm:$0xff]  ;;  %v757_v43 = vsel %vm614_vm5, %v3653_v40, %v586_v60  ;;  %v3804_v54 = vunpack.i.h.bf16 %v4956_v58 }
 0x259   :  { %v1075_v60 = vsel %vm614_vm5, %v3844_v28, %v924_v11  ;;  %1285 = vmatpush.bf16.msrb.mxu1 %v3522_v7  ;;  %v3859_v11 = vunpack.i.h.bf16 %v5019_v56 }
 0x25b   :  { %v5022_v25 = vpop.permute.xlu1 %3871  ;;  %1299 = vmatpush.bf16.msra.mxu2 %v3530_v1  ;;  %v3864_v1 = vunpack.i.h.bf16 %v3862_v38 }
 0x25c   :  { %v3873_v35 = vunpack.i.l.bf16 %v5022_v25 }
 0x25d   :  { %v3792_v23 = vpop.permute.xlu0 %3791 }
 0x25e   :  { %v3794_v15 = vunpack.i.h.bf16 %v3792_v23  ;;  %v3793_v37 = vunpack.i.l.bf16 %v3792_v23  ;;  %v1103_v23 = vrot.slane %v4938_v26, 3 }
 0x25f   :  { %1300 = vmatpush.bf16.msra.mxu2 %v3529_v2 }
 0x260   :  { %v752_v46 = vsel %vm618_vm6, %v751_v30, %v3794_v15  ;;  %v953_v8 = vsel %vm616_vm4, %v952_v42, %v3793_v37  ;;  %v3848_v15 = vunpack.i.l.bf16 %v5001_v49  ;;  %v3778_v37 = vunpack.i.l.bf16 %v4993_v20  ;;  %v3521_v42 = vld [vmem:[#allocation5] sm:$0xff] }
 0x261   :  { %v753_v48 = vsel %vm239_vm1, %v752_v46, %v3799_v21  ;;  %v954_v63 = vsel %vm618_vm6, %v953_v8, %v3798_v29  ;;  %v3783_v21 = vunpack.i.l.bf16 %v4999_v27  ;;  %v3803_v29 = vunpack.i.l.bf16 %v4956_v58  ;;  %1286 = vmatpush.bf16.msrb.mxu1 %v3521_v42 }
 0x262   :  { %v754_v14 = vsel %vm621_vm7, %v753_v48, %v3809_v62  ;;  %v955_v59 = vsel %vm239_vm1, %v954_v63, %v3808_v61  ;;  %v3824_v30 = vunpack.i.h.bf16 %v4979_v44  ;;  %v3834_v49 = vunpack.i.h.bf16 %v4991_v17 }
 0x263   :  { %v5044_v16 = vpop.permute.xlu1 %3876  ;;  %v755_v18 = vsel %vm623_vm8, %v754_v14, %v3819_v41  ;;  %v956_v10 = vsel %vm621_vm7, %v955_v59, %v3818_v5  ;;  %v758_v62 = vsel %vm616_vm4, %v757_v43, %v3849_v39  ;;  %v5079_v27 = vsel %vm625_vm9, %v4941_v47, %v3784_v33  ;;  %v3892_v5 = vpop.permute.xlu2 %3891 }
 0x264   :  { %v5050_v4 = vsel %vm625_vm9, %v755_v18, %v3829_v24  ;;  %v5053_v57 = vsel %vm623_vm8, %v956_v10, %v3828_v53  ;;  %v959_v46 = vsel %vm614_vm5, %v4784_v9, %v3848_v15  ;;  %v3839_v8 = vunpack.i.h.bf16 %v4989_v19 }
 0x265   :  { %v5055_v31 = vpop.permute.xlu0 %3811  ;;  %v3858_v41 = vunpack.i.l.bf16 %v5019_v56  ;;  %v893_v38 = vsel %vm625_vm9, %v4987_v32, %v3778_v37  ;;  %v692_v48 = vsel %vm614_vm5, %v4685_v34, %v3863_v52  ;;  %v1076_v47 = vsel %vm616_vm4, %v1075_v60, %v3864_v1 }
 0x266   :  { %v1068_v63 = vsel %vm614_vm5, %v3783_v21, %v895_v13  ;;  %v1084_v2 = vrot.slane %v5079_v27, 6  ;;  %v3868_v53 = vunpack.i.l.bf16 %v5014_v51  ;;  %v3894_v32 = vunpack.i.h.bf16 %v3892_v5 }
 0x267   :  { %v3893_v14 = vunpack.i.l.bf16 %v3892_v5  ;;  %v1115_v34 = vrot.slane %v5017_v55, 6  ;;  %v3874_v59 = vunpack.i.h.bf16 %v5022_v25  ;;  %v3879_v18 = vunpack.i.h.bf16 %v5044_v16 }
 0x268   :  { %v3878_v10 = vunpack.i.l.bf16 %v5044_v16  ;;  %v693_v52 = vsel %vm616_vm4, %v692_v48, %v3873_v35  ;;  %v1096_v35 = vrot.slane %v5050_v4, 4 }
 0x269   :  { %v1010_v25 = vsel %vm614_vm5, %v3893_v14, %v823_v50  ;;  %v1077_v21 = vsel %vm618_vm6, %v1076_v47, %v3874_v59 }
 0x26b   :  { %v3887_v61 = vpop.permute.xlu1 %3886  ;;  %v3902_v42 = vpop.permute.xlu2 %3901 }
 0x26c   :  { %v3889_v39 = vunpack.i.h.bf16 %v3887_v61  ;;  %v3888_v33 = vunpack.i.l.bf16 %v3887_v61  ;;  %v3904_v59 = vunpack.i.h.bf16 %v3902_v42 }
 0x26d   :  { %v3852_v9 = vpop.permute.xlu0 %3851 }
 0x26e   :  { %v3854_v24 = vunpack.i.h.bf16 %v3852_v9  ;;  %v3853_v56 = vunpack.i.l.bf16 %v3852_v9 }
 0x270   :  { %v759_v13 = vsel %vm618_vm6, %v758_v62, %v3854_v24  ;;  %v960_v40 = vsel %vm616_vm4, %v959_v46, %v3853_v56  ;;  %v3814_v62 = vunpack.i.h.bf16 %v5055_v31  ;;  %v3838_v56 = vunpack.i.l.bf16 %v4989_v19 }
 0x271   :  { %v760_v28 = vsel %vm239_vm1, %v759_v13, %v3859_v11  ;;  %v961_v51 = vsel %vm618_vm6, %v960_v40, %v3858_v41  ;;  %v3813_v11 = vunpack.i.l.bf16 %v5055_v31  ;;  %v1069_v31 = vsel %vm616_vm4, %v1068_v63, %v3804_v54 }
 0x272   :  { %v761_v55 = vsel %vm621_vm7, %v760_v28, %v3869_v6  ;;  %v962_v7 = vsel %vm239_vm1, %v961_v51, %v3868_v53  ;;  %v3779_v53 = vunpack.i.h.bf16 %v4993_v20  ;;  %v1070_v14 = vsel %vm618_vm6, %v1069_v31, %v3814_v62  ;;  %v1182_v31 = vld [vmem:[%s5578_s20 + $0x8] sm:$0xf] }
 0x273   :  { %v762_v43 = vsel %vm623_vm8, %v761_v55, %v3879_v18  ;;  %v963_v15 = vsel %vm621_vm7, %v962_v7, %v3878_v10  ;;  %v3897_v37 = vpop.permute.xlu1 %3896  ;;  %v1011_v20 = vsel %vm616_vm4, %v1010_v25, %v3803_v29  ;;  %v1071_v40 = vsel %vm239_vm1, %v1070_v14, %v3824_v30  ;;  %v3907_v30 = vpop.permute.xlu2 %3906 }
 0x274   :  { %v763_v16 = vsel %vm625_vm9, %v762_v43, %v3889_v39  ;;  %v964_v1 = vsel %vm623_vm8, %v963_v15, %v3888_v33  ;;  %v3899_v41 = vunpack.i.h.bf16 %v3897_v37  ;;  %v3898_v5 = vunpack.i.l.bf16 %v3897_v37 }
 0x275   :  { %v965_v36 = vsel %vm625_vm9, %v964_v1, %v3894_v32  ;;  %v1097_v60 = vrot.slane %v763_v16, 4  ;;  %v3882_v50 = vpop.permute.xlu0 %3881  ;;  %v1125_v32 = vsel %vm1124_vm10, 0.0, %v1084_v2  ;;  %v1012_v54 = vsel %vm618_vm6, %v1011_v20, %v3813_v11  ;;  %v3225_v20 = vld [vmem:[#allocation7 + $0x30] sm:$0xf] }
 0x276   :  { %v1109_v27 = vrot.slane %v965_v36, 7  ;;  %v3884_v61 = vunpack.i.h.bf16 %v3882_v50  ;;  %v3883_v46 = vunpack.i.l.bf16 %v3882_v50  ;;  %v958_v2 = vsel %vm625_vm9, %v5053_v57, %v3838_v56 }
 0x277   :  { %v1132_v9 = vsel %vm1130_vm13, %v4925_v22, %v1097_v60  ;;  %v1013_v39 = vsel %vm239_vm1, %v1012_v54, %v3823_v45  ;;  %v1108_v55 = vrot.slane %v958_v2, 7  ;;  %v1072_v15 = vsel %vm621_vm7, %v1071_v40, %v3834_v49 }
 0x278   :  { %v694_v48 = vsel %vm618_vm6, %v693_v52, %v3883_v46  ;;  %v1078_v47 = vsel %vm239_vm1, %v1077_v21, %v3884_v61  ;;  %v1142_v6 = vsel %vm1140_vm12, %v893_v38, %v1109_v27  ;;  %v1135_v24 = vsel %vm1133_vm14, %v1132_v9, %v1103_v23 }
 0x279   :  { %v1144_v22 = vsel %vm1124_vm10, %v1142_v6, %v1115_v34  ;;  %v695_v38 = vsel %vm239_vm1, %v694_v48, %v3898_v5  ;;  %v1079_v26 = vsel %vm621_vm7, %v1078_v47, %v3899_v41  ;;  %v3903_v23 = vunpack.i.l.bf16 %v3902_v42  ;;  %v1181_v48 = vld [vmem:[%s5578_s20] sm:$0xff] }
 0x27a   :  { %v1080_v4 = vsel %vm623_vm8, %v1079_v26, %v3904_v59  ;;  %v1137_v16 = vsel %vm197_vm0, %v1135_v24, 0.0  ;;  %v1014_v49 = vsel %vm621_vm7, %v1013_v39, %v3833_v0  ;;  %v3909_v52 = vunpack.i.h.bf16 %v3907_v30 }
 0x27b   :  { %v3917_v13 = vpop.permute.xlu1 %3916  ;;  %v696_v18 = vsel %vm621_vm7, %v695_v38, %v3903_v23  ;;  %v4285_v59 = vmov 64.0  }
 0x27c   :  { %v3919_v63 = vunpack.i.h.bf16 %v3917_v13  ;;  %v3918_v34 = vunpack.i.l.bf16 %v3917_v13  ;;  %v1073_v27 = vsel %vm623_vm8, %v1072_v15, %v3909_v52  ;;  %3987 = vrcp.f32 %v4285_v59  ;;  %v3544_v13 = vld [vmem:[#allocation7 + $0x34] sm:$0xf0]  ;;  %v3211_v52 = vld [vmem:[#allocation7 + $0x18] sm:$0xf0] }
 0x27d   :  { %v3912_v10 = vpop.permute.xlu0 %3911  ;;  %v3226_v54 = vor.u32 %v3544_v13, %v3225_v20 }
 0x27e   :  { %v697_v58 = vsel %vm623_vm8, %v696_v18, %v3918_v34  ;;  %v1081_v29 = vsel %vm625_vm9, %v1080_v4, %v3919_v63  ;;  %v3914_v28 = vunpack.i.h.bf16 %v3912_v10  ;;  %v3913_v51 = vunpack.i.l.bf16 %v3912_v10 }
 0x27f   :  { %v698_v57 = vsel %vm625_vm9, %v697_v58, %v3779_v53  ;;  %v1121_v33 = vrot.slane %v1081_v29, 5  ;;  %1435 = vmatpush.bf16.msra.mxu3 %v3226_v54 }
 0x280   :  { %v1090_v7 = vrot.slane %v698_v57, 5  ;;  %v885_v25 = vsel %vm623_vm8, %v4968_v12, %v3914_v28  ;;  %v814_v43 = vsel %vm625_vm9, %v4965_v3, %v3913_v51 }
 0x281   :  { %v1146_v44 = vsel %vm1127_vm11, %v1144_v22, %v1121_v33  ;;  %v886_v45 = vsel %vm625_vm9, %v885_v25, %v3839_v8  ;;  %v1102_v37 = vrot.slane %v814_v43, 3  ;;  %v3908_v8 = vunpack.i.l.bf16 %v3907_v30  ;;  %v3227_v30 = vld [vmem:[#allocation7 + $0x38] sm:$0xf0]  ;;  %v3217_v25 = vld [vmem:[#allocation7 + $0x20] sm:$0xf] }
 0x282   :  { %v1128_v3 = vsel %vm1127_vm11, %v1125_v32, %v1090_v7  ;;  %v1141_v1 = vsel %vm1140_vm12, %v886_v45, %v1108_v55  ;;  %v3197_v19 = vpack.c.bf16 %v1146_v44, %v1137_v16  ;;  %v3988_v23 = vpop.eup %3987  ;;  %v3543_v55 = vld [vmem:[#allocation7 + $0x34] sm:$0xf]  ;;  %v3542_v43 = vld [vmem:[#allocation7 + $0x24] sm:$0xf0]  ;;  %v3541_v44 = vld [vmem:[#allocation7 + $0x24] sm:$0xf] }
 0x283   :  { %v3922_v21 = vpop.permute.xlu1 %3921  ;;  %v1131_v36 = vsel %vm1130_vm13, %v1128_v3, %v1096_v35  ;;  %v1015_v62 = vsel %vm623_vm8, %v1014_v49, %v3908_v8  ;;  %v1319_v35 = vmul.f32 64.0, %v3988_v23  ;;  %vm1323_vm7 = vweird.f32 %v3988_v23  ;;  %v3219_v45 = vld [vmem:[#allocation7 + $0x28] sm:$0xf0]  ;;  %v3209_v3 = vld [vmem:[#allocation7 + $0x10] sm:$0xf] }
 0x284   :  { %v3924_v60 = vunpack.i.h.bf16 %v3922_v21  ;;  %v3923_v50 = vunpack.i.l.bf16 %v3922_v21  ;;  %3198 = vmatmul.msk.bf16.vlgmr.msra.gmra.mxu2 %vm5169_vm3, %v3197_v19  ;;  %v1134_v42 = vsel %vm1133_vm14, %v1131_v36, %v1102_v37  ;;  %v3230_v7 = vor.u32 %v3543_v55, %v3227_v30  ;;  %v3539_v49 = vld [vmem:[#allocation7 + $0x14] sm:$0xf]  ;;  %v3201_v36 = vld [vmem:[#allocation7] sm:$0xf] }
 0x285   :  { %v1136_v41 = vsel %vm197_vm0, %v1134_v42, 0.0  ;;  %v1320_v63 = vsub.f32 1.0, %v1319_v35  ;;  %v3218_v15 = vor.u32 %v3542_v43, %v3217_v25  ;;  %v3222_v37 = vor.u32 %v3541_v44, %v3219_v45  ;;  %v3537_v42 = vld [vmem:[#allocation7 + $0x4] sm:$0xf] }
 0x286   :  { %v1074_v17 = vsel %vm625_vm9, %v1073_v27, %v3924_v60  ;;  %v1016_v0 = vsel %vm625_vm9, %v1015_v62, %v3923_v50  ;;  %1449 = vmatpush.bf16.msra.mxu1 %v3230_v7  ;;  %v3214_v21 = vor.u32 %v3539_v49, %v3211_v52  ;;  %v3538_v60 = vld [vmem:[#allocation7 + $0x4] sm:$0xf0]  ;;  %v3203_v62 = vld [vmem:[#allocation7 + $0x8] sm:$0xf0] }
 0x287   :  { %v1120_v61 = vrot.slane %v1074_v17, 5  ;;  %v1114_v46 = vrot.slane %v1016_v0, 6  ;;  %v1321_v34 = vmul.f32 %v3988_v23, %v1320_v63  ;;  %1436 = vmatpush.bf16.msra.mxu3 %v3218_v15  ;;  %v3202_v50 = vor.u32 %v3538_v60, %v3201_v36  ;;  %v5267_v36 = vld [vmem:[%s5544_s5 + $0x8] sm:$0xf] }
 0x288   :  { %v3206_v27 = vor.u32 %v3537_v42, %v3203_v62 }
 0x289   :  { %v1143_v11 = vsel %vm1124_vm10, %v1141_v1, %v1114_v46  ;;  %v1322_v2 = vadd.f32 %v3988_v23, %v1321_v34  ;;  %v3540_v1 = vld [vmem:[#allocation7 + $0x14] sm:$0xf0] }
 0x28a   :  { %v1145_v5 = vsel %vm1127_vm11, %v1143_v11, %v1120_v61  ;;  %1450 = vmatpush.bf16.msra.mxu1 %v3222_v37  ;;  %v3210_v19 = vor.u32 %v3540_v1, %v3209_v3  ;;  %v5258_v3 = vld [vmem:[%s5544_s5] sm:$0xff] }
 0x28b   :  { %v3194_v9 = vpack.c.bf16 %v1145_v5, %v1136_v41  ;;  %v5205_v40 = vsel %vm1323_vm7, %v3988_v23, %v1322_v2  ;;  %v3956_v23 = vld [vmem:[%s5546_s7] ss:$0 sm:$0xff] }
 0x28c   :  { %1437 = vmatpush.bf16.msra.mxu3 %v3210_v19 }
 0x28d   :  { %3195 = vmatmul.msk.bf16.vlgmr.msrb.gmra.mxu1 %vm5169_vm3, %v3194_v9  ;;  %vm1490_vm3 = vcmask 93184  }
 0x28e   :  { %1451 = vmatpush.bf16.msra.mxu1 %v3214_v21 }
 0x290   :  { %1438 = vmatpush.bf16.msra.mxu3 %v3202_v50 }
 0x292   :  { %1452 = vmatpush.bf16.msra.mxu1 %v3206_v27 }
 0x307   :  { %v1302_v47 = vpop.f32.mrf.mxu2 }
 0x30a   :  { %v1288_v6 = vpop.f32.mrf.mxu1 }
 0x30b   :  { %v1289_v24 = vadd.f32 %v1288_v6, %v1181_v48 }
 0x30d   :  { %v5194_v56 = vadd.f32 %v1302_v47, %v1289_v24 }
 0x30f   :  { %v1311_v53 = vsel %vm239_vm1, %v5194_v56, 0.0  ;;  %v1304_v14 = vpop.f32.mrf.mxu2 }
 0x310   :  { %1312 = vadd.xlane.f32.xlu2 %v1311_v53 }
 0x312   :  { %v1290_v22 = vpop.f32.mrf.mxu1 }
 0x313   :  { %v1291_v32 = vadd.f32 %v1290_v22, %v1182_v31 }
 0x315   :  { %v5201_v38 = vadd.f32 %v1304_v14, %v1291_v32  ;;  %v3955_v32 = vld [vmem:[%s5545_s6] ss:$0 sm:$0xff] }
 0x317   :  { %v1315_v26 = vsel %vm1314_vm2, %v5201_v38, 0.0 }
 0x318   :  { %1316 = vadd.xlane.f32.xlu0 %v1315_v26 }
 0x383   :  { %v1313_v18 = vpop.xlane.xlu2 %1312 }
 0x384   :  { %v1325_v4 = vmul.f32 %v5205_v40, %v1313_v18  ;;  %v1382_v18 = vld [vmem:[%s5548_s9] sm:$0x3] }
 0x386   :  { %v5209_v10 = vsub.f32 %v5194_v56, %v1325_v4  ;;  %v1385_v4 = vperm.slane %v1382_v18, 1 }
 0x388   :  { %v1329_v58 = vmul.f32 %v5209_v10, %v5209_v10 }
 0x38a   :  { %v1331_v29 = vsel %vm239_vm1, %v1329_v58, 0.0 }
 0x38b   :  { %v1317_v28 = vpop.xlane.xlu0 %1316  ;;  %1332 = vadd.xlane.f32.xlu1 %v1331_v29 }
 0x38c   :  { %v1326_v51 = vmul.f32 %v5205_v40, %v1317_v28  ;;  %v1384_v28 = vperm.slane %v1382_v18, 0 }
 0x38e   :  { %v5216_v39 = vsub.f32 %v5201_v38, %v1326_v51 }
 0x390   :  { %v1330_v57 = vmul.f32 %v5216_v39, %v5216_v39 }
 0x392   :  { %v1334_v33 = vsel %vm1314_vm2, %v1330_v57, 0.0 }
 0x393   :  { %1335 = vadd.xlane.f32.xlu2 %v1334_v33 }
 0x3fe   :  { %v1333_v16 = vpop.xlane.xlu1 %1332 }
 0x3ff   :  { %v1337_v12 = vmul.f32 %v1333_v16, %v5205_v40 }
 0x401   :  { %v1339_v8 = vadd.f32 1e-06, %v1337_v12 }
 0x403   :  { %3989 = vrsqrt.f32 %v1339_v8  ;;  %vm1347_vm9 = vweird.f32 %v1339_v8 }
 0x406   :  { %v1336_v17 = vpop.xlane.xlu2 %1335 }
 0x407   :  { %v1338_v0 = vmul.f32 %v1336_v17, %v5205_v40 }
 0x409   :  { %v3990_v61 = vpop.eup %3989  ;;  %v1340_v46 = vadd.f32 1e-06, %v1338_v0 }
 0x40a   :  { %v1342_v11 = vmul.f32 %v3990_v61, %v1339_v8  ;;  %vm1348_vm8 = vweird.f32 %v3990_v61 }
 0x40b   :  { %3991 = vrsqrt.f32 %v1340_v46  ;;  %vm1349_vm10 = vmor %vm1347_vm9, %vm1348_vm8  ;;  %vm1357_vm13 = vweird.f32 %v1340_v46 }
 0x40c   :  { %v1343_v41 = vmul.f32 %v3990_v61, %v1342_v11 }
 0x40e   :  { %v1344_v5 = vmul.f32 0.5, %v1343_v41 }
 0x410   :  { %v1345_v9 = vsub.f32 1.5, %v1344_v5 }
 0x411   :  { %v3992_v48 = vpop.eup %3991 }
 0x412   :  { %v1346_v47 = vmul.f32 %v3990_v61, %v1345_v9  ;;  %v1352_v6 = vmul.f32 %v3992_v48, %v1340_v46  ;;  %vm1358_vm11 = vweird.f32 %v3992_v48 }
 0x413   :  { %vm1359_vm14 = vmor %vm1357_vm13, %vm1358_vm11 }
 0x414   :  { %v1353_v24 = vmul.f32 %v3992_v48, %v1352_v6  ;;  %v1350_v53 = vsel %vm1349_vm10, %v3990_v61, %v1346_v47 }
 0x415   :  { %v1361_v14 = vmul.f32 %v1350_v53, %v5209_v10 }
 0x416   :  { %v1354_v31 = vmul.f32 0.5, %v1353_v24 }
 0x417   :  { %v1366_v35 = vmul.f32 %v3955_v32, %v1361_v14 }
 0x418   :  { %v1355_v22 = vsub.f32 1.5, %v1354_v31 }
 0x419   :  { %v1371_v54 = vadd.f32 %v3956_v23, %v1366_v35 }
 0x41a   :  { %v1356_v26 = vmul.f32 %v3992_v48, %v1355_v22 }
 0x41c   :  { %v1360_v59 = vsel %vm1359_vm14, %v3992_v48, %v1356_v26 }
 0x41d   :  { %v1362_v20 = vmul.f32 %v1360_v59, %v5216_v39 }
 0x41f   :  { %v1367_v13 = vmul.f32 %v3955_v32, %v1362_v20 }
 0x421   :  { %v1372_v63 = vadd.f32 %v3956_v23, %v1367_v13 }
 0x423   :  { %v1373_v34 = vpack.c.bf16 %v1372_v63, %v1371_v54 }
 0x425   :  { %3231 = vmatmul.msk.bf16.vlgmr.msra.gmra.mxu3 %vm239_vm1, %v1373_v34  ;;  %3232 = vmatmul.msk.bf16.vlgmr.msra.gmra.mxu1 %vm239_vm1, %v1373_v34 }
 0x4a2   :  { %v1454_v2 = vpop.f32.mrf.mxu1 }
 0x4a3   :  { %v1455_v29 = vadd.f32 %v1454_v2, %v1385_v4 }
 0x4a8   :  { %v1440_v10 = vpop.f32.mrf.mxu3 }
 0x4a9   :  { %v1441_v57 = vadd.f32 %v1440_v10, %v1384_v28 }
 0x4aa   :  { %v1456_v58 = vpop.f32.mrf.mxu1 }
 0x4ab   :  { %v1457_v51 = vadd.f32 %v1456_v58, %v1385_v4  ;;  %v1459_v7 = vmul.f32 0.25, %v1441_v57 }
 0x4ad   :  { %v5236_v39 = vpack.c.bf16 %v1457_v51, %v1455_v29 }
 0x4af   :  { %v1516_v33 = vsel %vm197_vm0, %v5236_v39, 0 }
 0x4b0   :  { %v1442_v55 = vpop.f32.mrf.mxu3  ;;  %1525 = vmatpush.bf16.msrb.mxu3 %v1516_v33 }
 0x4b1   :  { %v1443_v30 = vadd.f32 %v1442_v55, %v1384_v28 }
 0x4b3   :  { %v1460_v25 = vmul.f32 0.25, %v1443_v30  ;;  %v5240_v43 = vpack.c.bf16 %v1443_v30, %v1441_v57 }
 0x4b5   :  { %v5242_v15 = vpack.c.bf16 %v1460_v25, %v1459_v7  ;;  %1535 = vrot.lane.b32.xlu0 %v5240_v43, %s4280_s10  ;;  %1464 = vrot.lane.b32.xlu2 %v5240_v43, %s5573_s23 }
 0x4b7   :  { %1533 = vrot.lane.b32.xlu1 %v5242_v15, %s4278_s24 }
 0x50f   :  { %v1465_v44 = vpop.permute.xlu2 %1464 }
 0x510   :  { %v1470_v45 = vsel %vm614_vm5, %v1465_v44, 0 }
 0x511   :  { %1479 = vmatpush.bf16.xpose.msrb.mxu2 %v1470_v45 }
 0x518   :  { %3233 = vmatmul.msk.bf16.vlgmr.msrb.gmra.mxu2 %vm614_vm5, %v5242_v15 }
 0x527   :  { %v1536_v37 = vpop.permute.xlu0 %1535 }
 0x528   :  { %v1541_v16 = vsel %vm614_vm5, %v1536_v37, 0 }
 0x529   :  { %1550 = vmatpush.bf16.xpose.msrb.mxu1 %v1541_v16  ;;  %v1534_v12 = vpop.permute.xlu1 %1533 }
 0x530   :  { %3235 = vmatmul.msk.bf16.vlgmr.msrb.gmra.mxu1 %vm614_vm5, %v1534_v12 }
 0x59b   :  { %v1481_v1 = vpop.f32.mrf.mxu2 }
 0x59c   :  { %v1482_v49 = vadd.f32 %v1481_v1, %v5258_v3 }
 0x59e   :  { %v1487_v19 = vsel %vm1486_vm15, %v1482_v49, -inf }
 0x59f   :  { %1488 = vmax.xlane.f32.xlu1 %v1487_v19 }
 0x5a3   :  { %v1483_v60 = vpop.f32.mrf.mxu2 }
 0x5a4   :  { %v1484_v50 = vadd.f32 %v1483_v60, %v5267_v36 }
 0x5a6   :  { %v1491_v17 = vsel %vm1490_vm3, %v1484_v50, -inf }
 0x5ad   :  { %v1552_v52 = vpop.f32.mrf.mxu1 }
 0x5ae   :  { %v1553_v8 = vadd.f32 %v1552_v52, %v5258_v3 }
 0x5b0   :  { %v1557_v21 = vsel %vm1486_vm15, %v1553_v8, -inf }
 0x5b1   :  { %1558 = vmax.xlane.f32.xlu0 %v1557_v21 }
 0x5b5   :  { %v1554_v42 = vpop.f32.mrf.mxu1 }
 0x5b6   :  { %v1555_v62 = vadd.f32 %v1554_v42, %v5267_v36 }
 0x5b8   :  { %1581 = vrot.lane.b32.xlu1 %v5236_v39, %s4278_s24  ;;  %v1560_v27 = vsel %vm1490_vm3, %v1555_v62, -inf }
 0x5b9   :  { %1561 = vmax.xlane.f32.xlu2 %v1560_v27  ;;  %1492 = vmax.xlane.f32.xlu0 %v1491_v17 }
 0x5cd   :  { %1674 = vrot.lane.b32.xlu0 %v5240_v43, %s4279_s30 }
 0x612   :  { %v1489_v0 = vpop.xlane.xlu1 %1488 }
 0x613   :  { %v1494_v61 = vsub.f32 %v1482_v49, %v1489_v0 }
 0x615   :  { %v1496_v46 = vmul.f32 1.442695, %v1494_v61 }
 0x617   :  { %3993 = vpow2.f32 %v1496_v46 }
 0x61d   :  { %v3994_v11 = vpop.eup %3993 }
 0x61e   :  { %v1500_v41 = vsel %vm1486_vm15, %v3994_v11, 0.0 }
 0x61f   :  { %1501 = vadd.xlane.f32.xlu0 %v1500_v41 }
 0x624   :  { %v1559_v5 = vpop.xlane.xlu0 %1558 }
 0x625   :  { %v1563_v9 = vsub.f32 %v1553_v8, %v1559_v5 }
 0x627   :  { %v1565_v48 = vmul.f32 1.442695, %v1563_v9 }
 0x629   :  { %3995 = vpow2.f32 %v1565_v48 }
 0x62a   :  { %v1582_v47 = vpop.permute.xlu1 %1581 }
 0x62b   :  { %v1587_v6 = vsel %vm197_vm0, %v1582_v47, 0 }
 0x62c   :  { %v1562_v24 = vpop.xlane.xlu2 %1561  ;;  %v1493_v53 = vpop.xlane.xlu0 %1492  ;;  %1596 = vmatpush.bf16.msra.mxu2 %v1587_v6 }
 0x62d   :  { %v1564_v31 = vsub.f32 %v1555_v62, %v1562_v24  ;;  %v1495_v22 = vsub.f32 %v1484_v50, %v1493_v53 }
 0x62f   :  { %v3996_v32 = vpop.eup %3995  ;;  %v1567_v14 = vmul.f32 1.442695, %v1564_v31  ;;  %v1498_v26 = vmul.f32 1.442695, %v1495_v22 }
 0x630   :  { %v1569_v59 = vsel %vm1486_vm15, %v3996_v32, 0.0 }
 0x631   :  { %3997 = vpow2.f32 %v1567_v14  ;;  %1570 = vadd.xlane.f32.xlu2 %v1569_v59 }
 0x632   :  { %3999 = vpow2.f32 %v1498_v26 }
 0x633   :  { %1672 = vrot.lane.b32.xlu0 %v5242_v15, %s4283_s22 }
 0x637   :  { %v3998_v23 = vpop.eup %3997 }
 0x638   :  { %v4000_v35 = vpop.eup %3999  ;;  %v1572_v20 = vsel %vm1490_vm3, %v3998_v23, 0.0 }
 0x639   :  { %v1503_v13 = vsel %vm1490_vm3, %v4000_v35, 0.0  ;;  %1573 = vadd.xlane.f32.xlu1 %v1572_v20 }
 0x63a   :  { %1504 = vadd.xlane.f32.xlu2 %v1503_v13 }
 0x63f   :  { %v1675_v54 = vpop.permute.xlu0 %1674 }
 0x640   :  { %v1680_v63 = vsel %vm614_vm5, %v1675_v54, 0 }
 0x641   :  { %1689 = vmatpush.bf16.xpose.msrb.mxu2 %v1680_v63 }
 0x652   :  { %1605 = vrot.lane.b32.xlu2 %v5240_v43, %s4281_s2  ;;  %1603 = vrot.lane.b32.xlu1 %v5242_v15, %s4282_s8 }
 0x692   :  { %v1502_v2 = vpop.xlane.xlu0 %1501 }
 0x6a4   :  { %v1571_v34 = vpop.xlane.xlu2 %1570 }
 0x6a5   :  { %4001 = vrcp.f32 %v1571_v34  ;;  %v1673_v15 = vpop.permute.xlu0 %1672 }
 0x6a6   :  { %4003 = vrcp.f32 %v1502_v2 }
 0x6ab   :  { %v4002_v10 = vpop.eup %4001 }
 0x6ac   :  { %v1574_v18 = vpop.xlane.xlu1 %1573  ;;  %v4004_v58 = vpop.eup %4003  ;;  %v1577_v51 = vmul.f32 %v4002_v10, %v3996_v32 }
 0x6ad   :  { %v1505_v4 = vpop.xlane.xlu2 %1504  ;;  %4005 = vrcp.f32 %v1574_v18  ;;  %v1508_v33 = vmul.f32 %v4004_v58, %v3994_v11 }
 0x6ae   :  { %4007 = vrcp.f32 %v1505_v4 }
 0x6b3   :  { %v4006_v29 = vpop.eup %4005 }
 0x6b4   :  { %v4008_v28 = vpop.eup %4007  ;;  %v1578_v57 = vmul.f32 %v4006_v29, %v3998_v23 }
 0x6b5   :  { %v1509_v55 = vmul.f32 %v4008_v28, %v4000_v35  ;;  %v1606_v30 = vpop.permute.xlu2 %1605 }
 0x6b6   :  { %v1579_v7 = vpack.c.bf16 %v1578_v57, %v1577_v51  ;;  %v1611_v25 = vsel %vm614_vm5, %v1606_v30, 0 }
 0x6b7   :  { %v1510_v43 = vpack.c.bf16 %v1509_v55, %v1508_v33  ;;  %1620 = vmatpush.bf16.xpose.msra.mxu3 %v1611_v25  ;;  %v3547_v25 = vld [vmem:[#allocation8 + $0x10] sm:$0xff] }
 0x6b8   :  { %3236 = vmatmul.msk.bf16.vlgmr.msra.gmra.mxu2 %vm1486_vm15, %v1579_v7  ;;  %v3548_v7 = vld [vmem:[#allocation8 + $0x18] sm:$0xff] }
 0x6b9   :  { %3234 = vmatmul.msk.bf16.vlgmr.msrb.gmra.mxu3 %vm1486_vm15, %v1510_v43  ;;  %1811 = vmatpush.bf16.msra.mxu0 %v3548_v7 }
 0x6bd   :  { %1812 = vmatpush.bf16.msra.mxu0 %v3547_v25 }
 0x6c4   :  { %v1604_v44 = vpop.permute.xlu1 %1603 }
 0x6c8   :  { %3239 = vmatmul.msk.bf16.vlgmr.msrb.gmra.mxu2 %vm614_vm5, %v1673_v15 }
 0x6c9   :  { %3237 = vmatmul.msk.bf16.vlgmr.msra.gmra.mxu3 %vm614_vm5, %v1604_v44 }
 0x73b   :  { %v1598_v45 = vpop.f32.mrf.mxu2 }
 0x73c   :  { %v5294_v37 = vpop.f32.mrf.mxu3 }
 0x743   :  { %v1600_v16 = vpop.f32.mrf.mxu2 }
 0x744   :  { %v5296_v12 = vpop.f32.mrf.mxu3  ;;  %v3925_v1 = vpack.i.bf16 %v1600_v16, %v1598_v45 }
 0x74b   :  { %v1691_v49 = vpop.f32.mrf.mxu2 }
 0x74c   :  { %v1622_v19 = vpop.f32.mrf.mxu3  ;;  %v1692_v52 = vadd.f32 %v1691_v49, %v5258_v3  ;;  %v3545_v49 = vld [vmem:[#allocation8] sm:$0xff] }
 0x74d   :  { %v1623_v8 = vadd.f32 %v1622_v19, %v5258_v3 }
 0x74e   :  { %v1696_v21 = vsel %vm1486_vm15, %v1692_v52, -inf }
 0x74f   :  { %1697 = vmax.xlane.f32.xlu2 %v1696_v21  ;;  %v1627_v60 = vsel %vm1486_vm15, %v1623_v8, -inf }
 0x750   :  { %1628 = vmax.xlane.f32.xlu1 %v1627_v60 }
 0x753   :  { %v1693_v50 = vpop.f32.mrf.mxu2 }
 0x754   :  { %v1624_v42 = vpop.f32.mrf.mxu3  ;;  %v1694_v62 = vadd.f32 %v1693_v50, %v5267_v36 }
 0x755   :  { %v1625_v27 = vadd.f32 %v1624_v42, %v5267_v36 }
 0x756   :  { %v1699_v17 = vsel %vm1490_vm3, %v1694_v62, -inf }
 0x757   :  { %1700 = vmax.xlane.f32.xlu0 %v1699_v17  ;;  %v1630_v0 = vsel %vm1490_vm3, %v1625_v27, -inf }
 0x758   :  { %1631 = vmax.xlane.f32.xlu2 %v1630_v0 }
 0x7c2   :  { %v1698_v61 = vpop.xlane.xlu2 %1697 }
 0x7c3   :  { %v1702_v3 = vsub.f32 %v1692_v52, %v1698_v61  ;;  %v1629_v46 = vpop.xlane.xlu1 %1628 }
 0x7c4   :  { %v1633_v11 = vsub.f32 %v1623_v8, %v1629_v46 }
 0x7c5   :  { %v1704_v41 = vmul.f32 1.442695, %v1702_v3 }
 0x7c6   :  { %v1635_v5 = vmul.f32 1.442695, %v1633_v11 }
 0x7c7   :  { %4009 = vpow2.f32 %v1704_v41 }
 0x7c8   :  { %4011 = vpow2.f32 %v1635_v5 }
 0x7ca   :  { %v1701_v9 = vpop.xlane.xlu0 %1700 }
 0x7cb   :  { %v1703_v48 = vsub.f32 %v1694_v62, %v1701_v9  ;;  %v1632_v47 = vpop.xlane.xlu2 %1631 }
 0x7cc   :  { %v1634_v6 = vsub.f32 %v1625_v27, %v1632_v47 }
 0x7cd   :  { %v4010_v24 = vpop.eup %4009  ;;  %v1706_v36 = vmul.f32 1.442695, %v1703_v48 }
 0x7ce   :  { %v4012_v53 = vpop.eup %4011  ;;  %v1637_v31 = vmul.f32 1.442695, %v1634_v6  ;;  %v1708_v22 = vsel %vm1486_vm15, %v4010_v24, 0.0 }
 0x7cf   :  { %4013 = vpow2.f32 %v1706_v36  ;;  %1709 = vadd.xlane.f32.xlu0 %v1708_v22  ;;  %v1639_v32 = vsel %vm1486_vm15, %v4012_v53, 0.0 }
 0x7d0   :  { %4015 = vpow2.f32 %v1637_v31  ;;  %1640 = vadd.xlane.f32.xlu2 %v1639_v32 }
 0x7d5   :  { %v4014_v14 = vpop.eup %4013 }
 0x7d6   :  { %v4016_v26 = vpop.eup %4015  ;;  %v1711_v59 = vsel %vm1490_vm3, %v4014_v14, 0.0 }
 0x7d7   :  { %v1642_v23 = vsel %vm1490_vm3, %v4016_v26, 0.0  ;;  %1712 = vadd.xlane.f32.xlu1 %v1711_v59 }
 0x7d8   :  { %1643 = vadd.xlane.f32.xlu0 %v1642_v23 }
 0x7e8   :  { %1650 = vrot.lane.b32.xlu2 %v5236_v39, %s4282_s8 }
 0x7ec   :  { %3926 = vrot.lane.b32.xlu0 %v3925_v1, %s4279_s30  ;;  %v3546_v1 = vld [vmem:[#allocation8 + $0x8] sm:$0xff] }
 0x7ed   :  { %1813 = vmatpush.bf16.msra.mxu0 %v3546_v1 }
 0x7f0   :  { %1719 = vrot.lane.b32.xlu1 %v5236_v39, %s4283_s22 }
 0x7f1   :  { %1814 = vmatpush.bf16.msra.mxu0 %v3545_v49 }
 0x842   :  { %v1710_v35 = vpop.xlane.xlu0 %1709 }
 0x843   :  { %v1641_v20 = vpop.xlane.xlu2 %1640 }
 0x844   :  { %4017 = vrcp.f32 %v1641_v20  ;;  %v3556_v20 = vld [vmem:[#allocation10 + $0x34] sm:$0xf0] }
 0x84a   :  { %v4018_v34 = vpop.eup %4017  ;;  %v1713_v58 = vpop.xlane.xlu1 %1712 }
 0x84b   :  { %v1644_v13 = vpop.xlane.xlu0 %1643  ;;  %v1651_v54 = vpop.permute.xlu2 %1650  ;;  %v1647_v18 = vmul.f32 %v4018_v34, %v4012_v53 }
 0x84c   :  { %4019 = vrcp.f32 %v1644_v13  ;;  %v1656_v63 = vsel %vm197_vm0, %v1651_v54, 0  ;;  %v3555_v13 = vld [vmem:[#allocation10 + $0x34] sm:$0xf] }
 0x84d   :  { %1665 = vmatpush.bf16.msra.mxu1 %v1656_v63  ;;  %4021 = vrcp.f32 %v1713_v58  ;;  %v3286_v63 = vld [vmem:[#allocation10 + $0x38] sm:$0xf0]  ;;  %v3278_v58 = vld [vmem:[#allocation10 + $0x28] sm:$0xf0] }
 0x84e   :  { %4023 = vrcp.f32 %v1710_v35  ;;  %v3284_v35 = vld [vmem:[#allocation10 + $0x30] sm:$0xf]  ;;  %v3289_v34 = vor.u32 %v3555_v13, %v3286_v63  ;;  %v3568_v63 = vld [vmem:[#allocation11 + $0x58] sm:$0xff] }
 0x84f   :  { %v3285_v54 = vor.u32 %v3556_v20, %v3284_v35  ;;  %v3569_v35 = vld [vmem:[#allocation11 + $0x60] sm:$0xff]  ;;  %v3559_v13 = vld [vmem:[#allocation11 + $0x10] sm:$0xff] }
 0x850   :  { %1961 = vmatpush.bf16.msra.mxu2 %v3289_v34  ;;  %v1894_v20 = vld [vmem:[%s5554_s15] sm:$0x3]  ;;  %v3558_v34 = vld [vmem:[#allocation11 + $0x8] sm:$0xff] }
 0x851   :  { %1947 = vmatpush.bf16.msrb.mxu1 %v3285_v54  ;;  %v1896_v54 = vperm.slane %v1894_v20, 0 }
 0x852   :  { %v4020_v2 = vpop.eup %4019 }
 0x853   :  { %v1648_v4 = vmul.f32 %v4020_v2, %v4016_v26  ;;  %v4022_v39 = vpop.eup %4021  ;;  %v3276_v2 = vld [vmem:[#allocation10 + $0x20] sm:$0xf] }
 0x854   :  { %v4024_v29 = vpop.eup %4023  ;;  %v1717_v28 = vmul.f32 %v4022_v39, %v4014_v14 }
 0x855   :  { %v1649_v10 = vpack.c.bf16 %v1648_v4, %v1647_v18  ;;  %v1716_v57 = vmul.f32 %v4024_v29, %v4010_v24  ;;  %v3554_v18 = vld [vmem:[#allocation10 + $0x24] sm:$0xf0]  ;;  %v3553_v4 = vld [vmem:[#allocation10 + $0x24] sm:$0xf] }
 0x856   :  { %v3281_v39 = vor.u32 %v3553_v4, %v3278_v58  ;;  %v3567_v4 = vld [vmem:[#allocation11 + $0x50] sm:$0xff]  ;;  %v1897_v58 = vperm.slane %v1894_v20, 1 }
 0x857   :  { %3238 = vmatmul.msk.bf16.vlgmr.msra.gmra.mxu1 %vm1486_vm15, %v1649_v10  ;;  %v1718_v55 = vpack.c.bf16 %v1717_v28, %v1716_v57  ;;  %v3277_v10 = vor.u32 %v3554_v18, %v3276_v2  ;;  %v3552_v57 = vld [vmem:[#allocation10 + $0x14] sm:$0xf0] }
 0x858   :  { %1962 = vmatpush.bf16.msra.mxu2 %v3281_v39  ;;  %v3557_v39 = vld [vmem:[#allocation11] sm:$0xff] }
 0x859   :  { %1948 = vmatpush.bf16.msrb.mxu1 %v3277_v10 }
 0x85e   :  { %v3927_v19 = vpop.permute.xlu0 %3926 }
 0x85f   :  { %v3929_v8 = vunpack.i.h.bf16 %v3927_v19  ;;  %v3928_v21 = vunpack.i.l.bf16 %v3927_v19 }
 0x861   :  { %v1766_v62 = vsel %vm614_vm5, %v5296_v12, %v3929_v8  ;;  %v1765_v27 = vsel %vm614_vm5, %v5294_v37, %v3928_v21  ;;  %v3957_v12 = vld [vmem:[%s5550_s11] ss:$0 sm:$0xff] }
 0x862   :  { %v1720_v51 = vpop.permute.xlu1 %1719 }
 0x863   :  { %v1725_v33 = vsel %vm197_vm0, %v1720_v51, 0  ;;  %v3268_v51 = vld [vmem:[#allocation10 + $0x10] sm:$0xf] }
 0x864   :  { %1734 = vmatpush.bf16.msrb.mxu3 %v1725_v33  ;;  %v3551_v33 = vld [vmem:[#allocation10 + $0x14] sm:$0xf] }
 0x867   :  { %3240 = vmatmul.msk.bf16.vlgmr.msrb.gmra.mxu3 %vm1486_vm15, %v1718_v55  ;;  %v3269_v55 = vor.u32 %v3552_v57, %v3268_v51 }
 0x869   :  { %1949 = vmatpush.bf16.msrb.mxu1 %v3269_v55  ;;  %v3565_v55 = vld [vmem:[#allocation11 + $0x40] sm:$0xff] }
 0x8d4   :  { %v1667_v30 = vpop.f32.mrf.mxu1 }
 0x8dc   :  { %v1669_v43 = vpop.f32.mrf.mxu1 }
 0x8dd   :  { %v3930_v15 = vpack.i.bf16 %v1669_v43, %v1667_v30  ;;  %v3270_v30 = vld [vmem:[#allocation10 + $0x18] sm:$0xf0]  ;;  %v3260_v43 = vld [vmem:[#allocation10] sm:$0xf] }
 0x8de   :  { %v3273_v25 = vor.u32 %v3551_v33, %v3270_v30 }
 0x8df   :  { %3931 = vrot.lane.b32.xlu1 %v3930_v15, %s4281_s2  ;;  %v3550_v15 = vld [vmem:[#allocation10 + $0x4] sm:$0xf0] }
 0x8e0   :  { %1963 = vmatpush.bf16.msra.mxu2 %v3273_v25 }
 0x8ea   :  { %v1736_v44 = vpop.f32.mrf.mxu3 }
 0x8f2   :  { %v1738_v45 = vpop.f32.mrf.mxu3 }
 0x8f3   :  { %v3935_v16 = vpack.i.bf16 %v1738_v45, %v1736_v44  ;;  %v3261_v44 = vor.u32 %v3550_v15, %v3260_v43  ;;  %v3549_v45 = vld [vmem:[#allocation10 + $0x4] sm:$0xf] }
 0x8f5   :  { %3936 = vrot.lane.b32.xlu0 %v3935_v16, %s4280_s10  ;;  %v3262_v16 = vld [vmem:[#allocation10 + $0x8] sm:$0xf0]  ;;  %1950 = vmatpush.bf16.msrb.mxu1 %v3261_v44 }
 0x8f6   :  { %v3265_v1 = vor.u32 %v3549_v45, %v3262_v16 }
 0x8f8   :  { %1964 = vmatpush.bf16.msra.mxu2 %v3265_v1 }
 0x951   :  { %v3932_v52 = vpop.permute.xlu1 %3931 }
 0x952   :  { %v3934_v60 = vunpack.i.h.bf16 %v3932_v52  ;;  %v3933_v50 = vunpack.i.l.bf16 %v3932_v52 }
 0x954   :  { %v1768_v61 = vsel %vm616_vm4, %v1766_v62, %v3934_v60  ;;  %v1767_v3 = vsel %vm616_vm4, %v1765_v27, %v3933_v50 }
 0x967   :  { %v3937_v42 = vpop.permute.xlu0 %3936 }
 0x968   :  { %v3939_v17 = vunpack.i.h.bf16 %v3937_v42  ;;  %v3938_v0 = vunpack.i.l.bf16 %v3937_v42 }
 0x96a   :  { %v1769_v46 = vsel %vm618_vm6, %v1767_v3, %v3938_v0  ;;  %v1770_v11 = vsel %vm618_vm6, %v1768_v61, %v3939_v17 }
 0x96b   :  { %v1771_v41 = vpack.c.bf16 %v1770_v11, %v1769_v46  ;;  %v3958_v11 = vld [vmem:[%s5551_s12] ss:$0 sm:$0xff] }
 0x96d   :  { %3257 = vmatmul.msk.bf16.vlgmr.msra.gmra.mxu0 %vm239_vm1, %v1771_v41 }
 0x9ea   :  { %v1816_v5 = vpop.f32.mrf.mxu0 }
 0x9eb   :  { %v1821_v37 = vadd.f32 %v1816_v5, %v5194_v56 }
 0x9ed   :  { %v5334_v9 = vadd.f32 %v3957_v12, %v1821_v37  ;;  %v3959_v37 = vld [vmem:[%s5552_s13] ss:$0 sm:$0xff] }
 0x9ef   :  { %v1831_v48 = vsel %vm239_vm1, %v5334_v9, 0.0 }
 0x9f0   :  { %1832 = vadd.xlane.f32.xlu2 %v1831_v48 }
 0x9f2   :  { %v1818_v47 = vpop.f32.mrf.mxu0 }
 0x9f3   :  { %v1822_v6 = vadd.f32 %v1818_v47, %v5201_v38 }
 0x9f5   :  { %v5339_v24 = vadd.f32 %v3957_v12, %v1822_v6 }
 0x9f7   :  { %v1834_v36 = vsel %vm1314_vm2, %v5339_v24, 0.0 }
 0x9f8   :  { %1835 = vadd.xlane.f32.xlu1 %v1834_v36 }
 0xa63   :  { %v1833_v53 = vpop.xlane.xlu2 %1832 }
 0xa64   :  { %v1837_v31 = vmul.f32 %v1833_v53, %v5205_v40 }
 0xa66   :  { %v5345_v56 = vsub.f32 %v5334_v9, %v1837_v31 }
 0xa68   :  { %v1841_v22 = vmul.f32 %v5345_v56, %v5345_v56 }
 0xa6a   :  { %v1843_v32 = vsel %vm239_vm1, %v1841_v22, 0.0  ;;  %v3563_v22 = vld [vmem:[#allocation11 + $0x30] sm:$0xff] }
 0xa6b   :  { %1844 = vadd.xlane.f32.xlu0 %v1843_v32  ;;  %v1836_v14 = vpop.xlane.xlu1 %1835  ;;  %v3572_v32 = vld [vmem:[#allocation11 + $0x78] sm:$0xff] }
 0xa6c   :  { %v1838_v38 = vmul.f32 %v1836_v14, %v5205_v40  ;;  %2155 = vmatpush.bf16.msrb.mxu0 %v3572_v32  ;;  %v3562_v14 = vld [vmem:[#allocation11 + $0x28] sm:$0xff] }
 0xa6e   :  { %v5352_v26 = vsub.f32 %v5339_v24, %v1838_v38  ;;  %v3571_v38 = vld [vmem:[#allocation11 + $0x70] sm:$0xff] }
 0xa70   :  { %v1842_v59 = vmul.f32 %v5352_v26, %v5352_v26  ;;  %2156 = vmatpush.bf16.msrb.mxu0 %v3571_v38  ;;  %v3960_v38 = vld [vmem:[%s5556_s17] ss:$0 sm:$0xff] }
 0xa72   :  { %v1846_v23 = vsel %vm1314_vm2, %v1842_v59, 0.0  ;;  %v3561_v59 = vld [vmem:[#allocation11 + $0x20] sm:$0xff] }
 0xa73   :  { %1847 = vadd.xlane.f32.xlu2 %v1846_v23  ;;  %v3560_v23 = vld [vmem:[#allocation11 + $0x18] sm:$0xff] }
 0xade   :  { %v1845_v29 = vpop.xlane.xlu0 %1844 }
 0xadf   :  { %v1849_v28 = vmul.f32 %v1845_v29, %v5205_v40 }
 0xae1   :  { %v1851_v7 = vadd.f32 1e-06, %v1849_v28  ;;  %v3566_v28 = vld [vmem:[#allocation11 + $0x48] sm:$0xff] }
 0xae3   :  { %4025 = vrsqrt.f32 %v1851_v7  ;;  %vm1859_vm8 = vweird.f32 %v1851_v7 }
 0xae6   :  { %v1848_v49 = vpop.xlane.xlu2 %1847 }
 0xae7   :  { %v1850_v19 = vmul.f32 %v1848_v49, %v5205_v40 }
 0xae9   :  { %v4026_v52 = vpop.eup %4025  ;;  %v1852_v8 = vadd.f32 1e-06, %v1850_v19 }
 0xaea   :  { %v1854_v21 = vmul.f32 %v4026_v52, %v1851_v7  ;;  %vm1860_vm7 = vweird.f32 %v4026_v52 }
 0xaeb   :  { %4027 = vrsqrt.f32 %v1852_v8  ;;  %vm1861_vm9 = vmor %vm1859_vm8, %vm1860_vm7  ;;  %vm1869_vm11 = vweird.f32 %v1852_v8 }
 0xaec   :  { %v1855_v60 = vmul.f32 %v4026_v52, %v1854_v21 }
 0xaee   :  { %v1856_v50 = vmul.f32 0.5, %v1855_v60 }
 0xaf0   :  { %v1857_v42 = vsub.f32 1.5, %v1856_v50 }
 0xaf1   :  { %v4028_v62 = vpop.eup %4027 }
 0xaf2   :  { %v1858_v27 = vmul.f32 %v4026_v52, %v1857_v42  ;;  %v1864_v17 = vmul.f32 %v4028_v62, %v1852_v8  ;;  %vm1870_vm10 = vweird.f32 %v4028_v62 }
 0xaf3   :  { %vm1871_vm13 = vmor %vm1869_vm11, %vm1870_vm10 }
 0xaf4   :  { %v1865_v0 = vmul.f32 %v4028_v62, %v1864_v17  ;;  %v1862_v61 = vsel %vm1861_vm9, %v4026_v52, %v1858_v27 }
 0xaf5   :  { %v1873_v41 = vmul.f32 %v1862_v61, %v5345_v56  ;;  %v3564_v56 = vld [vmem:[#allocation11 + $0x38] sm:$0xff] }
 0xaf6   :  { %v1866_v3 = vmul.f32 0.5, %v1865_v0  ;;  %2141 = vmatpush.bf16.msra.mxu3 %v3564_v56 }
 0xaf7   :  { %v1878_v48 = vmul.f32 %v3958_v11, %v1873_v41 }
 0xaf8   :  { %v1867_v46 = vsub.f32 1.5, %v1866_v3 }
 0xaf9   :  { %v1883_v36 = vadd.f32 %v3959_v37, %v1878_v48 }
 0xafa   :  { %v1868_v12 = vmul.f32 %v4028_v62, %v1867_v46  ;;  %2142 = vmatpush.bf16.msra.mxu3 %v3563_v22 }
 0xafc   :  { %v1872_v5 = vsel %vm1871_vm13, %v4028_v62, %v1868_v12 }
 0xafd   :  { %v1874_v47 = vmul.f32 %v1872_v5, %v5352_v26  ;;  %v3570_v26 = vld [vmem:[#allocation11 + $0x68] sm:$0xff] }
 0xafe   :  { %2143 = vmatpush.bf16.msra.mxu3 %v3562_v14  ;;  %2157 = vmatpush.bf16.msrb.mxu0 %v3570_v26 }
 0xaff   :  { %v1879_v6 = vmul.f32 %v3958_v11, %v1874_v47 }
 0xb01   :  { %v1884_v53 = vadd.f32 %v3959_v37, %v1879_v6 }
 0xb02   :  { %2144 = vmatpush.bf16.msra.mxu3 %v3561_v59  ;;  %2158 = vmatpush.bf16.msrb.mxu0 %v3569_v35 }
 0xb03   :  { %v1885_v31 = vpack.c.bf16 %v1884_v53, %v1883_v36 }
 0xb05   :  { %3290 = vmatmul.msk.bf16.vlgmr.msrb.gmra.mxu1 %vm239_vm1, %v1885_v31  ;;  %3291 = vmatmul.msk.bf16.vlgmr.msra.gmra.mxu2 %vm239_vm1, %v1885_v31 }
 0xb06   :  { %2145 = vmatpush.bf16.msra.mxu3 %v3560_v23  ;;  %2159 = vmatpush.bf16.msrb.mxu0 %v3568_v63 }
 0xb0a   :  { %2146 = vmatpush.bf16.msra.mxu3 %v3559_v13  ;;  %2160 = vmatpush.bf16.msrb.mxu0 %v3567_v4 }
 0xb0e   :  { %2147 = vmatpush.bf16.msra.mxu3 %v3558_v34  ;;  %2161 = vmatpush.bf16.msrb.mxu0 %v3566_v28 }
 0xb12   :  { %2148 = vmatpush.bf16.msra.mxu3 %v3557_v39  ;;  %2162 = vmatpush.bf16.msrb.mxu0 %v3565_v55  ;;  %v3385_v55 = vld [vmem:[#allocation7 + $0x70] sm:$0xf] }
 0xb82   :  { %v1952_v2 = vpop.f32.mrf.mxu1 }
 0xb83   :  { %v1953_v18 = vadd.f32 %v1952_v2, %v1896_v54 }
 0xb85   :  { %v1971_v10 = vmul.f32 %v1953_v18, %v1953_v18 }
 0xb87   :  { %v1975_v29 = vmul.f32 %v1971_v10, %v1953_v18 }
 0xb88   :  { %v1966_v51 = vpop.f32.mrf.mxu2 }
 0xb89   :  { %v1979_v57 = vmul.f32 0.044715, %v1975_v29  ;;  %v1967_v33 = vadd.f32 %v1966_v51, %v1897_v58 }
 0xb8a   :  { %v1954_v30 = vpop.f32.mrf.mxu1 }
 0xb8b   :  { %v1983_v7 = vadd.f32 %v1979_v57, %v1953_v18  ;;  %v1972_v25 = vmul.f32 %v1967_v33, %v1967_v33  ;;  %v1955_v43 = vadd.f32 %v1954_v30, %v1896_v54  ;;  %v3580_v30 = vld [vmem:[#allocation7 + $0x74] sm:$0xf0] }
 0xb8d   :  { %v1987_v15 = vmul.f32 0.7978846, %v1983_v7  ;;  %v1976_v44 = vmul.f32 %v1972_v25, %v1967_v33  ;;  %v1973_v45 = vmul.f32 %v1955_v43, %v1955_v43  ;;  %v3579_v7 = vld [vmem:[#allocation7 + $0x74] sm:$0xf]  ;;  %v3386_v25 = vor.u32 %v3580_v30, %v3385_v55 }
 0xb8f   :  { %v1980_v16 = vmul.f32 0.044715, %v1976_v44  ;;  %v1977_v1 = vmul.f32 %v1973_v45, %v1955_v43  ;;  %4029 = vtanh.f32 %v1987_v15  ;;  %2293 = vmatpush.bf16.msra.mxu1 %v3386_v25  ;;  %v3377_v44 = vld [vmem:[#allocation7 + $0x60] sm:$0xf]  ;;  %v3578_v45 = vld [vmem:[#allocation7 + $0x64] sm:$0xf0] }
 0xb90   :  { %v1968_v49 = vpop.f32.mrf.mxu2 }
 0xb91   :  { %v1984_v19 = vadd.f32 %v1980_v16, %v1967_v33  ;;  %v1981_v52 = vmul.f32 0.044715, %v1977_v1  ;;  %v1969_v8 = vadd.f32 %v1968_v49, %v1897_v58  ;;  %v3577_v16 = vld [vmem:[#allocation7 + $0x64] sm:$0xf]  ;;  %v3378_v1 = vor.u32 %v3578_v45, %v3377_v44  ;;  %v3379_v49 = vld [vmem:[#allocation7 + $0x68] sm:$0xf0] }
 0xb93   :  { %v1988_v21 = vmul.f32 0.7978846, %v1984_v19  ;;  %v1985_v60 = vadd.f32 %v1981_v52, %v1955_v43  ;;  %v1974_v50 = vmul.f32 %v1969_v8, %v1969_v8  ;;  %v3382_v19 = vor.u32 %v3577_v16, %v3379_v49  ;;  %2294 = vmatpush.bf16.msra.mxu1 %v3378_v1 }
 0xb95   :  { %v1989_v42 = vmul.f32 0.7978846, %v1985_v60  ;;  %v1978_v62 = vmul.f32 %v1974_v50, %v1969_v8  ;;  %4031 = vtanh.f32 %v1988_v21  ;;  %v4030_v27 = vpop.eup %4029  ;;  %v3369_v21 = vld [vmem:[#allocation7 + $0x50] sm:$0xf]  ;;  %v3576_v60 = vld [vmem:[#allocation7 + $0x54] sm:$0xf0] }
 0xb96   :  { %v1995_v61 = vadd.f32 1.0, %v4030_v27  ;;  %v3575_v50 = vld [vmem:[#allocation7 + $0x54] sm:$0xf] }
 0xb97   :  { %4033 = vtanh.f32 %v1989_v42  ;;  %v1982_v17 = vmul.f32 0.044715, %v1978_v62  ;;  %v3370_v42 = vor.u32 %v3576_v60, %v3369_v21  ;;  %v3371_v62 = vld [vmem:[#allocation7 + $0x58] sm:$0xf0] }
 0xb98   :  { %v1999_v41 = vmul.f32 0.5, %v1995_v61  ;;  %v3574_v61 = vld [vmem:[#allocation7 + $0x44] sm:$0xf0] }
 0xb99   :  { %v1986_v0 = vadd.f32 %v1982_v17, %v1969_v8  ;;  %v3374_v17 = vor.u32 %v3575_v50, %v3371_v62  ;;  %2295 = vmatpush.bf16.msra.mxu1 %v3370_v42 }
 0xb9a   :  { %v2003_v48 = vmul.f32 %v1999_v41, %v1953_v18 }
 0xb9b   :  { %v1990_v3 = vmul.f32 0.7978846, %v1986_v0  ;;  %v4032_v46 = vpop.eup %4031  ;;  %v3361_v0 = vld [vmem:[#allocation7 + $0x40] sm:$0xf] }
 0xb9c   :  { %v1996_v5 = vadd.f32 1.0, %v4032_v46  ;;  %v3573_v46 = vld [vmem:[#allocation7 + $0x44] sm:$0xf] }
 0xb9d   :  { %v4034_v11 = vpop.eup %4033  ;;  %4035 = vtanh.f32 %v1990_v3  ;;  %v3362_v3 = vor.u32 %v3574_v61, %v3361_v0  ;;  %v4087_v61 = vld [vmem:[%s5544_s5] sm:$0xff] }
 0xb9e   :  { %v1997_v12 = vadd.f32 1.0, %v4034_v11  ;;  %v2000_v36 = vmul.f32 0.5, %v1996_v5  ;;  %v3363_v11 = vld [vmem:[#allocation7 + $0x48] sm:$0xf0] }
 0xb9f   :  { %v3366_v41 = vor.u32 %v3573_v46, %v3363_v11  ;;  %2296 = vmatpush.bf16.msra.mxu1 %v3362_v3 }
 0xba0   :  { %v2001_v37 = vmul.f32 0.5, %v1997_v12  ;;  %v2004_v22 = vmul.f32 %v2000_v36, %v1967_v33 }
 0xba2   :  { %v2005_v47 = vmul.f32 %v2001_v37, %v1955_v43  ;;  %v3387_v43 = vld [vmem:[#allocation7 + $0x78] sm:$0xf0] }
 0xba3   :  { %v4036_v6 = vpop.eup %4035  ;;  %v3390_v15 = vor.u32 %v3579_v7, %v3387_v43 }
 0xba4   :  { %v1998_v53 = vadd.f32 1.0, %v4036_v6  ;;  %v2007_v31 = vpack.c.bf16 %v2005_v47, %v2003_v48 }
 0xba5   :  { %2307 = vmatpush.bf16.msrb.mxu2 %v3390_v15 }
 0xba6   :  { %v2002_v56 = vmul.f32 0.5, %v1998_v53  ;;  %2149 = vmatmul.bf16.vlgmr.msra.gmra.mxu3 %v2007_v31 }
 0xba8   :  { %v2006_v32 = vmul.f32 %v2002_v56, %v1969_v8 }
 0xba9   :  { %2308 = vmatpush.bf16.msrb.mxu2 %v3382_v19 }
 0xbaa   :  { %v2008_v14 = vpack.c.bf16 %v2006_v32, %v2004_v22 }
 0xbac   :  { %2163 = vmatmul.bf16.vlgmr.msrb.gmra.mxu0 %v2008_v14 }
 0xbad   :  { %2309 = vmatpush.bf16.msrb.mxu2 %v3374_v17 }
 0xbb1   :  { %2310 = vmatpush.bf16.msrb.mxu2 %v3366_v41 }
 0xc29   :  { %v2150_v59 = vpop.f32.mrf.mxu3  ;;  %v2164_v26 = vpop.f32.mrf.mxu0 }
 0xc2a   :  { %v2151_v23 = vadd.f32 %v3960_v38, %v2150_v59 }
 0xc2c   :  { %v2165_v35 = vadd.f32 %v2164_v26, %v2151_v23  ;;  %v3961_v26 = vld [vmem:[%s5545_s6 + $0x1] ss:$0 sm:$0xff] }
 0xc2e   :  { %v5376_v20 = vadd.f32 %v2165_v35, %v5334_v9 }
 0xc30   :  { %v2175_v13 = vsel %vm239_vm1, %v5376_v20, 0.0 }
 0xc31   :  { %v2152_v54 = vpop.f32.mrf.mxu3  ;;  %2176 = vadd.xlane.f32.xlu1 %v2175_v13  ;;  %v2166_v34 = vpop.f32.mrf.mxu0 }
 0xc32   :  { %v2153_v63 = vadd.f32 %v3960_v38, %v2152_v54  ;;  %v3962_v54 = vld [vmem:[%s5546_s7 + $0x1] ss:$0 sm:$0xff] }
 0xc34   :  { %v2167_v2 = vadd.f32 %v2166_v34, %v2153_v63 }
 0xc36   :  { %v5381_v18 = vadd.f32 %v2167_v2, %v5339_v24 }
 0xc38   :  { %v2178_v4 = vsel %vm1314_vm2, %v5381_v18, 0.0 }
 0xc39   :  { %2179 = vadd.xlane.f32.xlu0 %v2178_v4 }
 0xca4   :  { %v2177_v10 = vpop.xlane.xlu1 %2176 }
 0xca5   :  { %v2181_v58 = vmul.f32 %v2177_v10, %v5205_v40 }
 0xca7   :  { %v5387_v9 = vsub.f32 %v5376_v20, %v2181_v58 }
 0xca9   :  { %v2185_v39 = vmul.f32 %v5387_v9, %v5387_v9 }
 0xcab   :  { %v2187_v29 = vsel %vm239_vm1, %v2185_v39, 0.0 }
 0xcac   :  { %v2180_v28 = vpop.xlane.xlu0 %2179  ;;  %2188 = vadd.xlane.f32.xlu2 %v2187_v29 }
 0xcad   :  { %v2182_v24 = vmul.f32 %v2180_v28, %v5205_v40 }
 0xcaf   :  { %v5394_v51 = vsub.f32 %v5381_v18, %v2182_v24 }
 0xcb1   :  { %v2186_v57 = vmul.f32 %v5394_v51, %v5394_v51 }
 0xcb3   :  { %v2190_v33 = vsel %vm1314_vm2, %v2186_v57, 0.0 }
 0xcb4   :  { %2191 = vadd.xlane.f32.xlu1 %v2190_v33 }
 0xd1f   :  { %v2189_v52 = vpop.xlane.xlu2 %2188 }
 0xd20   :  { %v2193_v8 = vmul.f32 %v2189_v52, %v5205_v40 }
 0xd22   :  { %v2195_v27 = vadd.f32 1e-06, %v2193_v8 }
 0xd24   :  { %4037 = vrsqrt.f32 %v2195_v27  ;;  %vm2203_vm7 = vweird.f32 %v2195_v27 }
 0xd27   :  { %v2192_v12 = vpop.xlane.xlu1 %2191 }
 0xd28   :  { %v2194_v5 = vmul.f32 %v2192_v12, %v5205_v40 }
 0xd2a   :  { %v4038_v37 = vpop.eup %4037  ;;  %v2196_v48 = vadd.f32 1e-06, %v2194_v5 }
 0xd2b   :  { %v2198_v47 = vmul.f32 %v4038_v37, %v2195_v27  ;;  %vm2204_vm14 = vweird.f32 %v4038_v37 }
 0xd2c   :  { %4039 = vrsqrt.f32 %v2196_v48  ;;  %vm2205_vm8 = vmor %vm2203_vm7, %vm2204_vm14  ;;  %vm2213_vm10 = vweird.f32 %v2196_v48 }
 0xd2d   :  { %v2199_v6 = vmul.f32 %v4038_v37, %v2198_v47 }
 0xd2f   :  { %v2200_v36 = vmul.f32 0.5, %v2199_v6 }
 0xd31   :  { %v2201_v53 = vsub.f32 1.5, %v2200_v36 }
 0xd32   :  { %v4040_v31 = vpop.eup %4039 }
 0xd33   :  { %v2202_v56 = vmul.f32 %v4038_v37, %v2201_v53  ;;  %v2208_v22 = vmul.f32 %v4040_v31, %v2196_v48  ;;  %vm2214_vm9 = vweird.f32 %v4040_v31 }
 0xd34   :  { %vm2215_vm11 = vmor %vm2213_vm10, %vm2214_vm9 }
 0xd35   :  { %v2209_v32 = vmul.f32 %v4040_v31, %v2208_v22  ;;  %v2206_v14 = vsel %vm2205_vm8, %v4038_v37, %v2202_v56  ;;  %v4088_v37 = vld [vmem:[%s5544_s5 + $0x8] sm:$0xf] }
 0xd36   :  { %v2217_v23 = vmul.f32 %v2206_v14, %v5387_v9  ;;  %v3358_v9 = vld [vmem:[%s5548_s9 + $0x2] sm:$0x3] }
 0xd37   :  { %v2210_v38 = vmul.f32 0.5, %v2209_v32  ;;  %v2242_v29 = vperm.slane %v3358_v9, 0 }
 0xd38   :  { %v2222_v63 = vmul.f32 %v3961_v26, %v2217_v23 }
 0xd39   :  { %v2211_v59 = vsub.f32 1.5, %v2210_v38 }
 0xd3a   :  { %v2227_v4 = vadd.f32 %v3962_v54, %v2222_v63 }
 0xd3b   :  { %v2212_v35 = vmul.f32 %v4040_v31, %v2211_v59 }
 0xd3d   :  { %v2216_v13 = vsel %vm2215_vm11, %v4040_v31, %v2212_v35 }
 0xd3e   :  { %v2218_v34 = vmul.f32 %v2216_v13, %v5394_v51  ;;  %v2243_v51 = vperm.slane %v3358_v9, 1 }
 0xd40   :  { %v2223_v2 = vmul.f32 %v3961_v26, %v2218_v34 }
 0xd42   :  { %v2228_v10 = vadd.f32 %v3962_v54, %v2223_v2 }
 0xd44   :  { %v2229_v58 = vpack.c.bf16 %v2228_v10, %v2227_v4 }
 0xd46   :  { %3391 = vmatmul.msk.bf16.vlgmr.msra.gmra.mxu1 %vm239_vm1, %v2229_v58  ;;  %3392 = vmatmul.msk.bf16.vlgmr.msrb.gmra.mxu2 %vm239_vm1, %v2229_v58 }
 0xdc3   :  { %v2298_v39 = vpop.f32.mrf.mxu1 }
 0xdc4   :  { %v2299_v24 = vadd.f32 %v2298_v39, %v2242_v29 }
 0xdc6   :  { %v2317_v55 = vmul.f32 0.25, %v2299_v24 }
 0xdc9   :  { %v2312_v28 = vpop.f32.mrf.mxu2 }
 0xdca   :  { %v2313_v15 = vadd.f32 %v2312_v28, %v2243_v51 }
 0xdcb   :  { %v2300_v57 = vpop.f32.mrf.mxu1 }
 0xdcc   :  { %v2301_v33 = vadd.f32 %v2300_v57, %v2242_v29 }
 0xdce   :  { %v2318_v30 = vmul.f32 0.25, %v2301_v33  ;;  %v2320_v7 = vpack.c.bf16 %v2301_v33, %v2299_v24 }
 0xdd0   :  { %v2319_v25 = vpack.c.bf16 %v2318_v30, %v2317_v55  ;;  %2391 = vrot.lane.b32.xlu2 %v2320_v7, %s4280_s10  ;;  %2322 = vrot.lane.b32.xlu0 %v2320_v7, %s5573_s23 }
 0xdd1   :  { %v2314_v43 = vpop.f32.mrf.mxu2 }
 0xdd2   :  { %v2315_v44 = vadd.f32 %v2314_v43, %v2243_v51  ;;  %2389 = vrot.lane.b32.xlu1 %v2319_v25, %s4278_s24 }
 0xdd4   :  { %v5417_v45 = vpack.c.bf16 %v2315_v44, %v2313_v15 }
 0xdd6   :  { %v2372_v16 = vsel %vm197_vm0, %v5417_v45, 0 }
 0xdd7   :  { %2381 = vmatpush.bf16.msra.mxu2 %v2372_v16 }
 0xdd8   :  { %2530 = vrot.lane.b32.xlu2 %v2320_v7, %s4279_s30  ;;  %2461 = vrot.lane.b32.xlu0 %v2320_v7, %s4281_s2 }
 0xdda   :  { %2528 = vrot.lane.b32.xlu1 %v2319_v25, %s4283_s22 }
 0xde0   :  { %2459 = vrot.lane.b32.xlu0 %v2319_v25, %s4282_s8 }
 0xe2a   :  { %v2392_v1 = vpop.permute.xlu2 %2391 }
 0xe2b   :  { %v2397_v49 = vsel %vm614_vm5, %v2392_v1, 0 }
 0xe2c   :  { %2406 = vmatpush.bf16.xpose.msrb.mxu3 %v2397_v49 }
 0xe32   :  { %v2531_v19 = vpop.permute.xlu2 %2530 }
 0xe33   :  { %v2536_v52 = vsel %vm614_vm5, %v2531_v19, 0 }
 0xe34   :  { %2545 = vmatpush.bf16.xpose.msra.mxu3 %v2536_v52 }
 0xe42   :  { %v2323_v8 = vpop.permute.xlu0 %2322 }
 0xe43   :  { %v2328_v21 = vsel %vm614_vm5, %v2323_v8, 0 }
 0xe44   :  { %2337 = vmatpush.bf16.xpose.msrb.mxu1 %v2328_v21  ;;  %v2390_v60 = vpop.permute.xlu1 %2389 }
 0xe45   :  { %3395 = vmatmul.msk.bf16.vlgmr.msrb.gmra.mxu3 %vm614_vm5, %v2390_v60 }
 0xe4a   :  { %v2462_v50 = vpop.permute.xlu0 %2461 }
 0xe4b   :  { %v2467_v42 = vsel %vm614_vm5, %v2462_v50, 0  ;;  %3393 = vmatmul.msk.bf16.vlgmr.msrb.gmra.mxu1 %vm614_vm5, %v2319_v25 }
 0xe4c   :  { %2476 = vmatpush.bf16.xpose.msra.mxu1 %v2467_v42  ;;  %v2529_v62 = vpop.permute.xlu1 %2528 }
 0xe52   :  { %v2460_v27 = vpop.permute.xlu0 %2459 }
 0xe55   :  { %3399 = vmatmul.msk.bf16.vlgmr.msra.gmra.mxu3 %vm614_vm5, %v2529_v62 }
 0xe5b   :  { %3397 = vmatmul.msk.bf16.vlgmr.msra.gmra.mxu1 %vm614_vm5, %v2460_v27 }
 0xec8   :  { %v2339_v17 = vpop.f32.mrf.mxu1  ;;  %v2408_v0 = vpop.f32.mrf.mxu3 }
 0xec9   :  { %v2340_v3 = vadd.f32 %v4087_v61, %v2339_v17  ;;  %v2409_v46 = vadd.f32 %v4087_v61, %v2408_v0 }
 0xecb   :  { %v2413_v11 = vsel %vm1486_vm15, %v2409_v46, -inf  ;;  %v2344_v41 = vsel %vm1486_vm15, %v2340_v3, -inf }
 0xecc   :  { %2414 = vmax.xlane.f32.xlu1 %v2413_v11  ;;  %2345 = vmax.xlane.f32.xlu2 %v2344_v41 }
 0xed0   :  { %v2341_v12 = vpop.f32.mrf.mxu1  ;;  %v2410_v5 = vpop.f32.mrf.mxu3 }
 0xed1   :  { %v2342_v48 = vadd.f32 %v4088_v37, %v2341_v12  ;;  %v2411_v47 = vadd.f32 %v4088_v37, %v2410_v5 }
 0xed3   :  { %v2347_v6 = vsel %vm1490_vm3, %v2342_v48, -inf  ;;  %v2416_v36 = vsel %vm1490_vm3, %v2411_v47, -inf }
 0xed4   :  { %2348 = vmax.xlane.f32.xlu0 %v2347_v6  ;;  %2417 = vmax.xlane.f32.xlu2 %v2416_v36 }
 0xed8   :  { %v2478_v53 = vpop.f32.mrf.mxu1  ;;  %v2547_v31 = vpop.f32.mrf.mxu3 }
 0xed9   :  { %v2479_v56 = vadd.f32 %v4087_v61, %v2478_v53  ;;  %v2548_v22 = vadd.f32 %v4087_v61, %v2547_v31 }
 0xedb   :  { %v2552_v32 = vsel %vm1486_vm15, %v2548_v22, -inf  ;;  %v2483_v14 = vsel %vm1486_vm15, %v2479_v56, -inf }
 0xedc   :  { %2553 = vmax.xlane.f32.xlu1 %v2552_v32  ;;  %2484 = vmax.xlane.f32.xlu0 %v2483_v14 }
 0xee0   :  { %v2480_v38 = vpop.f32.mrf.mxu1  ;;  %v2549_v59 = vpop.f32.mrf.mxu3 }
 0xee1   :  { %v2481_v26 = vadd.f32 %v4088_v37, %v2480_v38  ;;  %v2550_v23 = vadd.f32 %v4088_v37, %v2549_v59 }
 0xee3   :  { %v2555_v35 = vsel %vm1490_vm3, %v2550_v23, -inf  ;;  %v2486_v13 = vsel %vm1490_vm3, %v2481_v26, -inf }
 0xee4   :  { %2556 = vmax.xlane.f32.xlu0 %v2555_v35  ;;  %2487 = vmax.xlane.f32.xlu2 %v2486_v13 }
 0xf3f   :  { %v2415_v54 = vpop.xlane.xlu1 %2414  ;;  %v2346_v63 = vpop.xlane.xlu2 %2345 }
 0xf40   :  { %v2419_v34 = vsub.f32 %v2409_v46, %v2415_v54  ;;  %v2350_v2 = vsub.f32 %v2340_v3, %v2346_v63 }
 0xf42   :  { %v2421_v4 = vmul.f32 1.442695, %v2419_v34  ;;  %v2352_v10 = vmul.f32 1.442695, %v2350_v2 }
 0xf44   :  { %4041 = vpow2.f32 %v2421_v4 }
 0xf45   :  { %4043 = vpow2.f32 %v2352_v10 }
 0xf47   :  { %v2349_v58 = vpop.xlane.xlu0 %2348  ;;  %v2418_v9 = vpop.xlane.xlu2 %2417 }
 0xf48   :  { %v2351_v39 = vsub.f32 %v2342_v48, %v2349_v58  ;;  %v2420_v29 = vsub.f32 %v2411_v47, %v2418_v9 }
 0xf4a   :  { %v5447_v28 = vpop.eup %4041  ;;  %v2354_v24 = vmul.f32 1.442695, %v2351_v39  ;;  %v2423_v57 = vmul.f32 1.442695, %v2420_v29 }
 0xf4b   :  { %v4044_v33 = vpop.eup %4043  ;;  %v2425_v55 = vsel %vm1486_vm15, %v5447_v28, 0.0 }
 0xf4c   :  { %4045 = vpow2.f32 %v2354_v24  ;;  %2426 = vadd.xlane.f32.xlu0 %v2425_v55  ;;  %v2356_v51 = vsel %vm1486_vm15, %v4044_v33, 0.0 }
 0xf4d   :  { %4047 = vpow2.f32 %v2423_v57  ;;  %2357 = vadd.xlane.f32.xlu2 %v2356_v51 }
 0xf4f   :  { %v2485_v30 = vpop.xlane.xlu0 %2484  ;;  %v2554_v7 = vpop.xlane.xlu1 %2553 }
 0xf50   :  { %v2489_v25 = vsub.f32 %v2479_v56, %v2485_v30  ;;  %v2558_v16 = vsub.f32 %v2548_v22, %v2554_v7 }
 0xf52   :  { %v4046_v43 = vpop.eup %4045  ;;  %v2491_v15 = vmul.f32 1.442695, %v2489_v25  ;;  %v2560_v19 = vmul.f32 1.442695, %v2558_v16 }
 0xf53   :  { %v4048_v44 = vpop.eup %4047  ;;  %v2359_v1 = vsel %vm1490_vm3, %v4046_v43, 0.0 }
 0xf54   :  { %2360 = vadd.xlane.f32.xlu1 %v2359_v1  ;;  %v2428_v49 = vsel %vm1490_vm3, %v4048_v44, 0.0  ;;  %4049 = vpow2.f32 %v2491_v15 }
 0xf55   :  { %2429 = vadd.xlane.f32.xlu2 %v2428_v49  ;;  %4051 = vpow2.f32 %v2560_v19  ;;  %v3584_v49 = vld [vmem:[#allocation8 + $0x38] sm:$0xff]  ;;  %v3583_v19 = vld [vmem:[#allocation8 + $0x30] sm:$0xff] }
 0xf56   :  { %2668 = vmatpush.bf16.msrb.mxu1 %v3584_v49 }
 0xf57   :  { %v2488_v52 = vpop.xlane.xlu2 %2487  ;;  %v2557_v8 = vpop.xlane.xlu0 %2556 }
 0xf58   :  { %v2490_v21 = vsub.f32 %v2481_v26, %v2488_v52  ;;  %v2559_v42 = vsub.f32 %v2550_v23, %v2557_v8  ;;  %v3582_v52 = vld [vmem:[#allocation8 + $0x28] sm:$0xff]  ;;  %v3581_v8 = vld [vmem:[#allocation8 + $0x20] sm:$0xff] }
 0xf5a   :  { %v2493_v60 = vmul.f32 1.442695, %v2490_v21  ;;  %v4050_v50 = vpop.eup %4049  ;;  %v2562_v27 = vmul.f32 1.442695, %v2559_v42  ;;  %2669 = vmatpush.bf16.msrb.mxu1 %v3583_v19  ;;  %v3426_v19 = vld [vmem:[#allocation10 + $0x48] sm:$0xf0] }
 0xf5b   :  { %v2495_v62 = vsel %vm1486_vm15, %v4050_v50, 0.0  ;;  %v4052_v17 = vpop.eup %4051 }
 0xf5c   :  { %4053 = vpow2.f32 %v2493_v60  ;;  %2496 = vadd.xlane.f32.xlu0 %v2495_v62  ;;  %v2564_v61 = vsel %vm1486_vm15, %v4052_v17, 0.0 }
 0xf5d   :  { %4055 = vpow2.f32 %v2562_v27 }
 0xf5e   :  { %2670 = vmatpush.bf16.msrb.mxu1 %v3582_v52 }
 0xf62   :  { %v4054_v0 = vpop.eup %4053  ;;  %2671 = vmatpush.bf16.msrb.mxu1 %v3581_v8 }
 0xf63   :  { %v2498_v3 = vsel %vm1490_vm3, %v4054_v0, 0.0  ;;  %v4056_v46 = vpop.eup %4055 }
 0xf64   :  { %2565 = vadd.xlane.f32.xlu0 %v2564_v61  ;;  %2499 = vadd.xlane.f32.xlu2 %v2498_v3  ;;  %v2567_v11 = vsel %vm1490_vm3, %v4056_v46, 0.0 }
 0xf6c   :  { %2568 = vadd.xlane.f32.xlu2 %v2567_v11 }
 0xf6d   :  { %2437 = vrot.lane.b32.xlu1 %v5417_v45, %s4278_s24 }
 0xf78   :  { %2506 = vrot.lane.b32.xlu0 %v5417_v45, %s4282_s8 }
 0xf84   :  { %2575 = vrot.lane.b32.xlu2 %v5417_v45, %s4283_s22 }
 0xfbf   :  { %v2427_v36 = vpop.xlane.xlu0 %2426 }
 0xfc0   :  { %v2358_v41 = vpop.xlane.xlu2 %2357 }
 0xfc1   :  { %4057 = vrcp.f32 %v2358_v41 }
 0xfc7   :  { %v2361_v12 = vpop.xlane.xlu1 %2360  ;;  %v4058_v5 = vpop.eup %4057 }
 0xfc8   :  { %4059 = vrcp.f32 %v2361_v12  ;;  %v2364_v48 = vmul.f32 %v4058_v5, %v4044_v33  ;;  %v2430_v6 = vpop.xlane.xlu2 %2429 }
 0xfc9   :  { %4061 = vrcp.f32 %v2430_v6 }
 0xfca   :  { %4063 = vrcp.f32 %v2427_v36 }
 0xfce   :  { %v4060_v37 = vpop.eup %4059 }
 0xfcf   :  { %v2365_v47 = vmul.f32 %v4060_v37, %v4046_v43  ;;  %v2497_v56 = vpop.xlane.xlu0 %2496  ;;  %v4062_v22 = vpop.eup %4061 }
 0xfd0   :  { %v4064_v32 = vpop.eup %4063  ;;  %v2434_v45 = vmul.f32 %v4062_v22, %v4048_v44 }
 0xfd1   :  { %v2366_v53 = vpack.c.bf16 %v2365_v47, %v2364_v48  ;;  %v2433_v38 = vmul.f32 %v4064_v32, %v5447_v28  ;;  %v3963_v48 = vld [vmem:[%s5550_s11 + $0x1] ss:$0 sm:$0xff] }
 0xfd3   :  { %3394 = vmatmul.msk.bf16.vlgmr.msra.gmra.mxu2 %vm1486_vm15, %v2366_v53  ;;  %v2435_v23 = vpack.c.bf16 %v2434_v45, %v2433_v38 }
 0xfd7   :  { %v2500_v31 = vpop.xlane.xlu2 %2499  ;;  %v2566_v35 = vpop.xlane.xlu0 %2565 }
 0xfd8   :  { %4065 = vrcp.f32 %v2500_v31 }
 0xfd9   :  { %4067 = vrcp.f32 %v2497_v56 }
 0xfde   :  { %v4066_v13 = vpop.eup %4065 }
 0xfdf   :  { %v2438_v14 = vpop.permute.xlu1 %2437  ;;  %v2569_v26 = vpop.xlane.xlu2 %2568  ;;  %v2504_v2 = vmul.f32 %v4066_v13, %v4054_v0 }
 0xfe0   :  { %v2443_v59 = vsel %vm197_vm0, %v2438_v14, 0  ;;  %4069 = vrcp.f32 %v2569_v26  ;;  %v4068_v63 = vpop.eup %4067 }
 0xfe1   :  { %2452 = vmatpush.bf16.msra.mxu0 %v2443_v59  ;;  %4071 = vrcp.f32 %v2566_v35  ;;  %v2503_v58 = vmul.f32 %v4068_v63, %v4050_v50  ;;  %v3592_v63 = vld [vmem:[#allocation10 + $0x74] sm:$0xf0] }
 0xfe3   :  { %v2505_v29 = vpack.c.bf16 %v2504_v2, %v2503_v58  ;;  %v3440_v58 = vld [vmem:[#allocation10 + $0x60] sm:$0xf] }
 0xfe4   :  { %3396 = vmatmul.msk.bf16.vlgmr.msra.gmra.mxu0 %vm1486_vm15, %v2435_v23 }
 0xfe6   :  { %v4070_v4 = vpop.eup %4069 }
 0xfe7   :  { %v2576_v54 = vpop.permute.xlu2 %2575  ;;  %v4072_v39 = vpop.eup %4071  ;;  %v2573_v28 = vmul.f32 %v4070_v4, %v4056_v46  ;;  %v3450_v4 = vld [vmem:[#allocation10 + $0x78] sm:$0xf0] }
 0xfe8   :  { %v2581_v34 = vsel %vm197_vm0, %v2576_v54, 0  ;;  %v2572_v24 = vmul.f32 %v4072_v39, %v4052_v17  ;;  %v3448_v54 = vld [vmem:[#allocation10 + $0x70] sm:$0xf]  ;;  %v3589_v39 = vld [vmem:[#allocation10 + $0x64] sm:$0xf] }
 0xfe9   :  { %2590 = vmatpush.bf16.msrb.mxu0 %v2581_v34  ;;  %v3591_v34 = vld [vmem:[#allocation10 + $0x74] sm:$0xf]  ;;  %v3449_v2 = vor.u32 %v3592_v63, %v3448_v54  ;;  %v3604_v54 = vld [vmem:[#allocation11 + $0xd8] sm:$0xff]  ;;  %v3421_v63 = vld [vmem:[%s5554_s15 + $0x2] sm:$0x3] }
 0xfea   :  { %v2507_v10 = vpop.permute.xlu0 %2506  ;;  %v2574_v57 = vpack.c.bf16 %v2573_v28, %v2572_v24  ;;  %v3442_v28 = vld [vmem:[#allocation10 + $0x68] sm:$0xf0] }
 0xfeb   :  { %v2512_v9 = vsel %vm197_vm0, %v2507_v10, 0  ;;  %v3453_v10 = vor.u32 %v3591_v34, %v3450_v4  ;;  %v3445_v24 = vor.u32 %v3589_v39, %v3442_v28  ;;  %v3595_v34 = vld [vmem:[#allocation11 + $0x90] sm:$0xff]  ;;  %v2758_v4 = vperm.slane %v3421_v63, 0 }
 0xfec   :  { %2521 = vmatpush.bf16.msrb.mxu2 %v2512_v9  ;;  %v3590_v9 = vld [vmem:[#allocation10 + $0x64] sm:$0xf0] }
 0xfed   :  { %2823 = vmatpush.bf16.msrb.mxu3 %v3453_v10  ;;  %v2759_v10 = vperm.slane %v3421_v63, 1 }
 0xfef   :  { %3398 = vmatmul.msk.bf16.vlgmr.msrb.gmra.mxu2 %vm1486_vm15, %v2505_v29  ;;  %v3441_v29 = vor.u32 %v3590_v9, %v3440_v58  ;;  %v3594_v58 = vld [vmem:[#allocation11 + $0x88] sm:$0xff] }
 0xff0   :  { %2809 = vmatpush.bf16.msra.mxu2 %v3449_v2  ;;  %v3603_v2 = vld [vmem:[#allocation11 + $0xd0] sm:$0xff]  ;;  %v3602_v9 = vld [vmem:[#allocation11 + $0xc8] sm:$0xff] }
 0xff1   :  { %2824 = vmatpush.bf16.msrb.mxu3 %v3445_v24 }
 0xff4   :  { %3400 = vmatmul.msk.bf16.vlgmr.msrb.gmra.mxu0 %vm1486_vm15, %v2574_v57  ;;  %2810 = vmatpush.bf16.msra.mxu2 %v3441_v29 }
0x1056   :  { %v2383_v33 = vpop.f32.mrf.mxu2 }
0x105e   :  { %v2385_v7 = vpop.f32.mrf.mxu2 }
0x1061   :  { %v2454_v55 = vpop.f32.mrf.mxu0 }
0x1069   :  { %v2456_v51 = vpop.f32.mrf.mxu0 }
0x106a   :  { %v3940_v30 = vpack.i.bf16 %v2456_v51, %v2454_v55  ;;  %v3588_v55 = vld [vmem:[#allocation10 + $0x54] sm:$0xf0]  ;;  %v3587_v51 = vld [vmem:[#allocation10 + $0x54] sm:$0xf] }
0x106c   :  { %3941 = vrot.lane.b32.xlu1 %v3940_v30, %s4279_s30 }
0x1071   :  { %v2592_v25 = vpop.f32.mrf.mxu0 }
0x1072   :  { %v2523_v43 = vpop.f32.mrf.mxu2 }
0x1079   :  { %v2594_v15 = vpop.f32.mrf.mxu0 }
0x107a   :  { %v3950_v44 = vpack.i.bf16 %v2594_v15, %v2592_v25  ;;  %v2525_v16 = vpop.f32.mrf.mxu2  ;;  %v3434_v25 = vld [vmem:[#allocation10 + $0x58] sm:$0xf0] }
0x107b   :  { %v3945_v1 = vpack.i.bf16 %v2525_v16, %v2523_v43  ;;  %v3437_v43 = vor.u32 %v3587_v51, %v3434_v25  ;;  %v3586_v16 = vld [vmem:[#allocation10 + $0x44] sm:$0xf0] }
0x107c   :  { %3951 = vrot.lane.b32.xlu0 %v3950_v44, %s4280_s10  ;;  %v3424_v44 = vld [vmem:[#allocation10 + $0x40] sm:$0xf] }
0x107d   :  { %3946 = vrot.lane.b32.xlu1 %v3945_v1, %s4281_s2  ;;  %2825 = vmatpush.bf16.msrb.mxu3 %v3437_v43  ;;  %v3585_v1 = vld [vmem:[#allocation10 + $0x44] sm:$0xf]  ;;  %v3425_v49 = vor.u32 %v3586_v16, %v3424_v44 }
0x107e   :  { %v3429_v52 = vor.u32 %v3585_v1, %v3426_v19 }
0x1081   :  { %2826 = vmatpush.bf16.msrb.mxu3 %v3429_v52 }
0x10de   :  { %v3942_v21 = vpop.permute.xlu1 %3941 }
0x10df   :  { %v3944_v60 = vunpack.i.h.bf16 %v3942_v21  ;;  %v3943_v50 = vunpack.i.l.bf16 %v3942_v21 }
0x10e1   :  { %v2622_v0 = vsel %vm614_vm5, %v2385_v7, %v3944_v60  ;;  %v2621_v61 = vsel %vm614_vm5, %v2383_v33, %v3943_v50  ;;  %v3432_v33 = vld [vmem:[#allocation10 + $0x50] sm:$0xf] }
0x10e2   :  { %v3433_v7 = vor.u32 %v3588_v55, %v3432_v33  ;;  %v3601_v33 = vld [vmem:[#allocation11 + $0xc0] sm:$0xff] }
0x10e4   :  { %2811 = vmatpush.bf16.msra.mxu2 %v3433_v7 }
0x10e8   :  { %2812 = vmatpush.bf16.msra.mxu2 %v3425_v49 }
0x10ee   :  { %v3952_v42 = vpop.permute.xlu0 %3951 }
0x10ef   :  { %v3947_v62 = vpop.permute.xlu1 %3946  ;;  %v3954_v3 = vunpack.i.h.bf16 %v3952_v42  ;;  %v3953_v46 = vunpack.i.l.bf16 %v3952_v42 }
0x10f0   :  { %v3949_v27 = vunpack.i.h.bf16 %v3947_v62  ;;  %v3948_v17 = vunpack.i.l.bf16 %v3947_v62 }
0x10f2   :  { %v2624_v11 = vsel %vm616_vm4, %v2622_v0, %v3949_v27  ;;  %v2623_v41 = vsel %vm616_vm4, %v2621_v61, %v3948_v17 }
0x10f3   :  { %v2625_v12 = vsel %vm618_vm6, %v2623_v41, %v3953_v46  ;;  %v2626_v5 = vsel %vm618_vm6, %v2624_v11, %v3954_v3 }
0x10f4   :  { %v2627_v37 = vpack.c.bf16 %v2626_v5, %v2625_v12  ;;  %v3964_v5 = vld [vmem:[%s5551_s12 + $0x1] ss:$0 sm:$0xff] }
0x10f6   :  { %3417 = vmatmul.msk.bf16.vlgmr.msrb.gmra.mxu1 %vm239_vm1, %v2627_v37 }
0x1173   :  { %v2673_v47 = vpop.f32.mrf.mxu1 }
0x1174   :  { %v2678_v6 = vadd.f32 %v2673_v47, %v5376_v20 }
0x1176   :  { %v5486_v36 = vadd.f32 %v3963_v48, %v2678_v6  ;;  %v3965_v6 = vld [vmem:[%s5552_s13 + $0x1] ss:$0 sm:$0xff] }
0x1178   :  { %v2691_v53 = vsel %vm239_vm1, %v5486_v36, 0.0 }
0x1179   :  { %2692 = vadd.xlane.f32.xlu1 %v2691_v53 }
0x117b   :  { %v2675_v31 = vpop.f32.mrf.mxu1 }
0x117c   :  { %v2679_v56 = vadd.f32 %v2675_v31, %v5381_v18 }
0x117e   :  { %v2686_v22 = vadd.f32 %v3963_v48, %v2679_v56 }
0x1180   :  { %v2694_v32 = vsel %vm1314_vm2, %v2686_v22, 0.0 }
0x1181   :  { %2695 = vadd.xlane.f32.xlu2 %v2694_v32 }
0x11ec   :  { %v2693_v45 = vpop.xlane.xlu1 %2692 }
0x11ed   :  { %v2697_v14 = vmul.f32 %v2693_v45, %v5205_v40 }
0x11ef   :  { %v5494_v38 = vsub.f32 %v5486_v36, %v2697_v14  ;;  %v3600_v14 = vld [vmem:[#allocation11 + $0xb8] sm:$0xff] }
0x11f0   :  { %3005 = vmatpush.bf16.msra.mxu0 %v3600_v14 }
0x11f1   :  { %v2701_v20 = vmul.f32 %v5494_v38, %v5494_v38 }
0x11f3   :  { %v2703_v59 = vsel %vm239_vm1, %v2701_v20, 0.0  ;;  %v3599_v20 = vld [vmem:[#allocation11 + $0xb0] sm:$0xff] }
0x11f4   :  { %2704 = vadd.xlane.f32.xlu0 %v2703_v59  ;;  %v2696_v26 = vpop.xlane.xlu2 %2695  ;;  %v3607_v59 = vld [vmem:[#allocation11 + $0xf0] sm:$0xff]  ;;  %3006 = vmatpush.bf16.msra.mxu0 %v3599_v20 }
0x11f5   :  { %v2698_v23 = vmul.f32 %v2696_v26, %v5205_v40  ;;  %v3598_v26 = vld [vmem:[#allocation11 + $0xa8] sm:$0xff] }
0x11f7   :  { %v5500_v18 = vsub.f32 %v2686_v22, %v2698_v23  ;;  %v3606_v23 = vld [vmem:[#allocation11 + $0xe8] sm:$0xff] }
0x11f8   :  { %3007 = vmatpush.bf16.msra.mxu0 %v3598_v26 }
0x11f9   :  { %v2702_v35 = vmul.f32 %v5500_v18, %v5500_v18 }
0x11fb   :  { %v2706_v13 = vsel %vm1314_vm2, %v2702_v35, 0.0  ;;  %v3605_v35 = vld [vmem:[#allocation11 + $0xe0] sm:$0xff] }
0x11fc   :  { %2707 = vadd.xlane.f32.xlu1 %v2706_v13  ;;  %v3596_v13 = vld [vmem:[#allocation11 + $0x98] sm:$0xff] }
0x1267   :  { %v2705_v57 = vpop.xlane.xlu0 %2704 }
0x1268   :  { %v2709_v30 = vmul.f32 %v2705_v57, %v5205_v40  ;;  %v3593_v57 = vld [vmem:[#allocation11 + $0x80] sm:$0xff] }
0x126a   :  { %v2711_v15 = vadd.f32 1e-06, %v2709_v30 }
0x126c   :  { %4073 = vrsqrt.f32 %v2711_v15  ;;  %vm2719_vm4 = vweird.f32 %v2711_v15 }
0x126f   :  { %v2708_v8 = vpop.xlane.xlu1 %2707 }
0x1270   :  { %v2710_v21 = vmul.f32 %v2708_v8, %v5205_v40 }
0x1272   :  { %v4074_v60 = vpop.eup %4073  ;;  %v2712_v50 = vadd.f32 1e-06, %v2710_v21 }
0x1273   :  { %v2714_v42 = vmul.f32 %v4074_v60, %v2711_v15  ;;  %vm2720_vm0 = vweird.f32 %v4074_v60 }
0x1274   :  { %4075 = vrsqrt.f32 %v2712_v50  ;;  %vm2721_vm5 = vmor %vm2719_vm4, %vm2720_vm0  ;;  %vm2729_vm2 = vweird.f32 %v2712_v50 }
0x1275   :  { %v2715_v62 = vmul.f32 %v4074_v60, %v2714_v42 }
0x1277   :  { %v2716_v27 = vmul.f32 0.5, %v2715_v62 }
0x1279   :  { %v2717_v17 = vsub.f32 1.5, %v2716_v27 }
0x127a   :  { %v4076_v0 = vpop.eup %4075 }
0x127b   :  { %v2718_v61 = vmul.f32 %v4074_v60, %v2717_v17  ;;  %v2724_v3 = vmul.f32 %v4076_v0, %v2712_v50  ;;  %vm2730_vm6 = vweird.f32 %v4076_v0 }
0x127c   :  { %vm2731_vm15 = vmor %vm2729_vm2, %vm2730_vm6 }
0x127d   :  { %v2725_v46 = vmul.f32 %v4076_v0, %v2724_v3  ;;  %v2722_v11 = vsel %vm2721_vm5, %v4074_v60, %v2718_v61 }
0x127e   :  { %v2733_v37 = vmul.f32 %v2722_v11, %v5494_v38  ;;  %v3608_v38 = vld [vmem:[#allocation11 + $0xf8] sm:$0xff] }
0x127f   :  { %v2726_v41 = vmul.f32 0.5, %v2725_v46  ;;  %3018 = vmatpush.bf16.msra.mxu1 %v3608_v38 }
0x1280   :  { %v2738_v53 = vmul.f32 %v3964_v5, %v2733_v37 }
0x1281   :  { %v2727_v12 = vsub.f32 1.5, %v2726_v41 }
0x1282   :  { %v2743_v22 = vadd.f32 %v3965_v6, %v2738_v53 }
0x1283   :  { %v2728_v48 = vmul.f32 %v4076_v0, %v2727_v12  ;;  %3019 = vmatpush.bf16.msra.mxu1 %v3607_v59  ;;  %v3966_v59 = vld [vmem:[%s5556_s17 + $0x1] ss:$0 sm:$0xff] }
0x1285   :  { %v2732_v47 = vsel %vm2731_vm15, %v4076_v0, %v2728_v48 }
0x1286   :  { %v2734_v31 = vmul.f32 %v2732_v47, %v5500_v18  ;;  %v3597_v18 = vld [vmem:[#allocation11 + $0xa0] sm:$0xff] }
0x1287   :  { %3020 = vmatpush.bf16.msra.mxu1 %v3606_v23  ;;  %3008 = vmatpush.bf16.msra.mxu0 %v3597_v18 }
0x1288   :  { %v2739_v56 = vmul.f32 %v3964_v5, %v2734_v31 }
0x128a   :  { %v2744_v32 = vadd.f32 %v3965_v6, %v2739_v56 }
0x128b   :  { %3021 = vmatpush.bf16.msra.mxu1 %v3605_v35  ;;  %3009 = vmatpush.bf16.msra.mxu0 %v3596_v13 }
0x128c   :  { %v2745_v45 = vpack.c.bf16 %v2744_v32, %v2743_v22 }
0x128e   :  { %3454 = vmatmul.msk.bf16.vlgmr.msra.gmra.mxu2 %vm239_vm1, %v2745_v45  ;;  %3455 = vmatmul.msk.bf16.vlgmr.msrb.gmra.mxu3 %vm239_vm1, %v2745_v45 }
0x128f   :  { %3022 = vmatpush.bf16.msra.mxu1 %v3604_v54  ;;  %3010 = vmatpush.bf16.msra.mxu0 %v3595_v34 }
0x1293   :  { %3023 = vmatpush.bf16.msra.mxu1 %v3603_v2  ;;  %3011 = vmatpush.bf16.msra.mxu0 %v3594_v58 }
0x1297   :  { %3024 = vmatpush.bf16.msra.mxu1 %v3602_v9  ;;  %3012 = vmatpush.bf16.msra.mxu0 %v3593_v57 }
0x129b   :  { %3025 = vmatpush.bf16.msra.mxu1 %v3601_v33 }
0x1311   :  { %v2814_v39 = vpop.f32.mrf.mxu2  ;;  %v2828_v29 = vpop.f32.mrf.mxu3 }
0x1312   :  { %v2815_v28 = vadd.f32 %v2814_v39, %v2758_v4  ;;  %v2829_v24 = vadd.f32 %v2828_v29, %v2759_v10 }
0x1314   :  { %v2833_v55 = vmul.f32 %v2815_v28, %v2815_v28  ;;  %v2834_v51 = vmul.f32 %v2829_v24, %v2829_v24 }
0x1316   :  { %v2837_v30 = vmul.f32 %v2833_v55, %v2815_v28  ;;  %v2838_v7 = vmul.f32 %v2834_v51, %v2829_v24 }
0x1318   :  { %v2841_v25 = vmul.f32 0.044715, %v2837_v30  ;;  %v2842_v43 = vmul.f32 0.044715, %v2838_v7  ;;  %v3967_v30 = vld [vmem:[%s5557_s18] ss:$0 sm:$0xff] }
0x1319   :  { %v2816_v15 = vpop.f32.mrf.mxu2  ;;  %v2830_v44 = vpop.f32.mrf.mxu3 }
0x131a   :  { %v2845_v16 = vadd.f32 %v2841_v25, %v2815_v28  ;;  %v2846_v1 = vadd.f32 %v2842_v43, %v2829_v24  ;;  %v2817_v49 = vadd.f32 %v2816_v15, %v2758_v4  ;;  %v2831_v19 = vadd.f32 %v2830_v44, %v2759_v10 }
0x131c   :  { %v2849_v52 = vmul.f32 0.7978846, %v2845_v16  ;;  %v2835_v8 = vmul.f32 %v2817_v49, %v2817_v49  ;;  %v2836_v21 = vmul.f32 %v2831_v19, %v2831_v19  ;;  %v2850_v60 = vmul.f32 0.7978846, %v2846_v1 }
0x131e   :  { %v2839_v50 = vmul.f32 %v2835_v8, %v2817_v49  ;;  %v2840_v42 = vmul.f32 %v2836_v21, %v2831_v19  ;;  %4077 = vtanh.f32 %v2849_v52 }
0x131f   :  { %4079 = vtanh.f32 %v2850_v60 }
0x1320   :  { %v2843_v62 = vmul.f32 0.044715, %v2839_v50  ;;  %v2844_v27 = vmul.f32 0.044715, %v2840_v42 }
0x1322   :  { %v2847_v17 = vadd.f32 %v2843_v62, %v2817_v49  ;;  %v2848_v0 = vadd.f32 %v2844_v27, %v2831_v19 }
0x1324   :  { %v2851_v61 = vmul.f32 0.7978846, %v2847_v17  ;;  %v2852_v3 = vmul.f32 0.7978846, %v2848_v0  ;;  %v4078_v46 = vpop.eup %4077 }
0x1325   :  { %v4080_v11 = vpop.eup %4079  ;;  %v2857_v41 = vadd.f32 1.0, %v4078_v46 }
0x1326   :  { %4081 = vtanh.f32 %v2851_v61  ;;  %v2858_v12 = vadd.f32 1.0, %v4080_v11 }
0x1327   :  { %4083 = vtanh.f32 %v2852_v3  ;;  %v2861_v48 = vmul.f32 0.5, %v2857_v41 }
0x1328   :  { %v2862_v6 = vmul.f32 0.5, %v2858_v12 }
0x1329   :  { %v2865_v22 = vmul.f32 %v2861_v48, %v2815_v28 }
0x132a   :  { %v2866_v45 = vmul.f32 %v2862_v6, %v2829_v24 }
0x132c   :  { %v4082_v5 = vpop.eup %4081 }
0x132d   :  { %v4084_v37 = vpop.eup %4083  ;;  %v2859_v47 = vadd.f32 1.0, %v4082_v5 }
0x132e   :  { %v2860_v53 = vadd.f32 1.0, %v4084_v37 }
0x132f   :  { %v2863_v31 = vmul.f32 0.5, %v2859_v47 }
0x1330   :  { %v2864_v56 = vmul.f32 0.5, %v2860_v53 }
0x1331   :  { %v2867_v32 = vmul.f32 %v2863_v31, %v2817_v49 }
0x1332   :  { %v2868_v14 = vmul.f32 %v2864_v56, %v2831_v19 }
0x1333   :  { %v2869_v38 = vpack.c.bf16 %v2867_v32, %v2865_v22 }
0x1334   :  { %v2870_v20 = vpack.c.bf16 %v2868_v14, %v2866_v45 }
0x1335   :  { %3013 = vmatmul.bf16.vlgmr.msra.gmra.mxu0 %v2869_v38 }
0x1336   :  { %3026 = vmatmul.bf16.vlgmr.msra.gmra.mxu1 %v2870_v20 }
0x13b2   :  { %v3014_v26 = vpop.f32.mrf.mxu0 }
0x13b3   :  { %v3015_v23 = vadd.f32 %v3966_v59, %v3014_v26  ;;  %v3027_v18 = vpop.f32.mrf.mxu1 }
0x13b5   :  { %v3028_v35 = vadd.f32 %v3027_v18, %v3015_v23 }
0x13b7   :  { %v3031_v13 = vadd.f32 %v3028_v35, %v5486_v36 }
0x13b9   :  { %v3034_v54 = vsel %vm239_vm1, %v3031_v13, 0.0 }
0x13ba   :  { %v3016_v63 = vpop.f32.mrf.mxu0  ;;  %3035 = vadd.xlane.f32.xlu2 %v3034_v54 }
0x13bb   :  { %v3029_v34 = vpop.f32.mrf.mxu1 }
0x142d   :  { %v3036_v2 = vpop.xlane.xlu2 %3035 }
0x142e   :  { %v3037_v4 = vmul.f32 %v3036_v2, %v5205_v40 }
0x1430   :  { %v3038_v10 = vsub.f32 %v3031_v13, %v3037_v4 }
0x1432   :  { %v3039_v58 = vmul.f32 %v3038_v10, %v3038_v10 }
0x1434   :  { %v3040_v9 = vsel %vm239_vm1, %v3039_v58, 0.0  ;;  %vm3075_vm1 = vcmask 517120  }
0x1435   :  { %3041 = vadd.xlane.f32.xlu0 %v3040_v9 }
0x14a8   :  { %v3042_v39 = vpop.xlane.xlu0 %3041 }
0x14a9   :  { %v3043_v29 = vmul.f32 %v3042_v39, %v5205_v40  ;;  %v3968_v40 = vld [vmem:[%s5558_s19] ss:$0 sm:$0xff] }
0x14ab   :  { %v3044_v28 = vadd.f32 1e-06, %v3043_v29 }
0x14ad   :  { %4085 = vrsqrt.f32 %v3044_v28  ;;  %vm3051_vm13 = vweird.f32 %v3044_v28 }
0x14b3   :  { %v4086_v24 = vpop.eup %4085 }
0x14b4   :  { %v3046_v36 = vmul.f32 %v4086_v24, %v3044_v28  ;;  %vm3052_vm3 = vweird.f32 %v4086_v24 }
0x14b5   :  { %vm3053_vm14 = vmor %vm3051_vm13, %vm3052_vm3 }
0x14b6   :  { %v3047_v57 = vmul.f32 %v4086_v24, %v3046_v36 }
0x14b8   :  { %v3048_v33 = vmul.f32 0.5, %v3047_v57 }
0x14ba   :  { %v3049_v55 = vsub.f32 1.5, %v3048_v33 }
0x14bc   :  { %v3050_v51 = vmul.f32 %v4086_v24, %v3049_v55 }
0x14be   :  { %v3054_v7 = vsel %vm3053_vm14, %v4086_v24, %v3050_v51 }
0x14bf   :  { %v3055_v25 = vmul.f32 %v3054_v7, %v3038_v10 }
0x14c1   :  { %v3059_v43 = vmul.f32 %v3967_v30, %v3055_v25 }
0x14c3   :  { %v3063_v15 = vadd.f32 %v3968_v40, %v3059_v43 }
0x14c5   :  { %v3065_v44 = vrot.slane %v3063_v15, 5  ;;  %v3068_v16 = vrot.slane %v3063_v15, 1  ;;  %v3070_v1 = vrot.slane %v3063_v15, 6 }
0x14c7   :  { %v3067_v49 = vsel %vm1140_vm12, %v3063_v15, %v3065_v44  ;;  %v3072_v19 = vsel %vm1140_vm12, %v3068_v16, %v3070_v1 }
0x14c8   :  { %v3073_v52 = vadd.f32 %v3072_v19, %v3067_v49 }
0x14ca   :  { %v3074_v8 = vmul.f32 0.5, %v3073_v52 }
0x14cc   :  { %3076 = vst.msk [vmem:[#allocation13] sm:$0x3] %vm3075_vm1, %v3074_v8 }
0x14cd   :  { %3087 = dma.vmem_to_hbm [thread:$0]  %s3083_s0, 32, %s3085_s28, [#allocation4]  }
0x14ce   :  { %4265 = dma.done.wait [#allocation4], 32  }
0x14cf   :  { %4266 = vsyncadd [#allocation4], 4294967264 }
0x14d0   :  { %3092 = vsyncpa [#allocation3], 1 }
0x14d1   :  { %3093 = vsyncpa [#allocation6], 1 }
0x14d2   :  { %3094 = vsyncpa [#allocation9], 1 }
0x14d3   :  { %3095 = vsyncpa [#allocation12], 1 }
0x14d4   :  { %3096 = vsyncpa [#allocation4], 1 }

</bundles_post_ra>
